<compile_context>
chip_gen: v7x
topology: tpu7x:2x2x1
jax: 0.10.0
libtpu: 0.0.40
codegen_flags: <defaults>
</compile_context>

<pallas_src>
import functools

import jax
import jax.numpy as jnp
from jax.experimental import pallas as pl
from jax.experimental.pallas import tpu as pltpu


# ----------------------------------------------------------------------------
# Pallas kernels
# ----------------------------------------------------------------------------
def _conv_lrelu_kernel(w_ref, p_ref, o_ref):
    """One M-block of y^T = W(Cout,K) @ patches^T(K,M), fused LeakyReLU(0.2)."""
    acc = jnp.dot(w_ref[...], p_ref[...], preferred_element_type=jnp.float32)
    y = jnp.where(acc > 0, acc, 0.2 * acc)
    o_ref[...] = y.astype(o_ref.dtype)


def _conv_bn_lrelu_kernel(w_ref, p_ref, g_ref, b_ref, o_ref, *, inv_m):
    """Conv matmul + BatchNorm (batch stats over the M columns, per channel
    row) + LeakyReLU(0.2), single block."""
    acc = jnp.dot(w_ref[...], p_ref[...], preferred_element_type=jnp.float32)  # (Cout, M) f32
    mean = jnp.sum(acc, axis=1, keepdims=True) * inv_m
    ex2 = jnp.sum(acc * acc, axis=1, keepdims=True) * inv_m
    var = ex2 - mean * mean                     # biased variance, as PyTorch BN uses
    xn = (acc - mean) * jax.lax.rsqrt(var + 1e-5)
    y = xn * g_ref[...] + b_ref[...]
    o_ref[...] = jnp.where(y > 0, y, 0.2 * y).astype(o_ref.dtype)


def _head_kernel(w4_ref, p_ref, g_ref, b_ref, w5_ref, sel_ref, o_ref, *, inv_m):
    """conv4 + BatchNorm + LeakyReLU with conv5 (4x4 valid conv -> one patch
    per image) + Sigmoid folded into the epilogue."""
    acc = jnp.dot(w4_ref[...], p_ref[...], preferred_element_type=jnp.float32)  # (C4, M4)
    mean = jnp.sum(acc, axis=1, keepdims=True) * inv_m
    ex2 = jnp.sum(acc * acc, axis=1, keepdims=True) * inv_m
    var = ex2 - mean * mean
    xn = (acc - mean) * jax.lax.rsqrt(var + 1e-5)
    y = xn * g_ref[...] + b_ref[...]
    y = jnp.where(y > 0, y, 0.2 * y)                             # (C4, M4) f32
    # conv5: per-image sum over channels x the 4x4 spatial map.
    prod = y * w5_ref[...]                                       # (C4, M4)
    per_chan = jnp.dot(prod, sel_ref[...],
                       preferred_element_type=jnp.float32)       # (C4, Nb)
    logits = jnp.sum(per_chan, axis=0, keepdims=True)            # (1, Nb)
    o_ref[...] = 1.0 / (1.0 + jnp.exp(-logits))


# ----------------------------------------------------------------------------
# pallas_call wrappers
# ----------------------------------------------------------------------------
def conv_lrelu_t(w_t, patches_t, block_m=4096):
    """w_t: (Cout, K) bf16, patches_t: (K, M) bf16 -> (Cout, M) bf16."""
    cout, k = w_t.shape
    k2, m = patches_t.shape
    assert k == k2
    mb = min(m, block_m)
    assert m % mb == 0, (m, mb)
    return pl.pallas_call(
        _conv_lrelu_kernel,
        out_shape=jax.ShapeDtypeStruct((cout, m), jnp.bfloat16),
        grid_spec=pltpu.PrefetchScalarGridSpec(
            num_scalar_prefetch=0,
            grid=(m // mb,),
            in_specs=[
                pl.BlockSpec((cout, k), lambda i: (0, 0)),
                pl.BlockSpec((k, mb), lambda i: (0, i)),
            ],
            out_specs=pl.BlockSpec((cout, mb), lambda i: (0, i)),
        ),
        compiler_params=pltpu.CompilerParams(dimension_semantics=("parallel",)),
    )(w_t, patches_t)


def conv_bn_lrelu_t(w_t, patches_t, gamma, beta):
    """w_t: (Cout, K) bf16, patches_t: (K, M) bf16 -> (Cout, M) bf16."""
    cout, k = w_t.shape
    _, m = patches_t.shape
    kernel = functools.partial(_conv_bn_lrelu_kernel, inv_m=1.0 / m)
    return pl.pallas_call(
        kernel,
        out_shape=jax.ShapeDtypeStruct((cout, m), jnp.bfloat16),
        grid_spec=pltpu.PrefetchScalarGridSpec(
            num_scalar_prefetch=0,
            grid=(1,),
            in_specs=[
                pl.BlockSpec((cout, k), lambda i: (0, 0)),
                pl.BlockSpec((k, m), lambda i: (0, 0)),
                pl.BlockSpec((cout, 1), lambda i: (0, 0)),
                pl.BlockSpec((cout, 1), lambda i: (0, 0)),
            ],
            out_specs=pl.BlockSpec((cout, m), lambda i: (0, 0)),
        ),
    )(w_t, patches_t, gamma.reshape(cout, 1), beta.reshape(cout, 1))


def head_t(w4_t, patches_t, gamma, beta, w5_r, n_batch):
    """conv4+BN+lrelu+conv5+sigmoid. patches_t: (K4, n_batch*16) bf16,
    w5_r: (C4, 16) f32 -> (1, n_batch) f32."""
    c4, k4 = w4_t.shape
    _, m = patches_t.shape
    assert m == n_batch * 16
    w5_tiled = jnp.tile(w5_r, (1, n_batch)).astype(jnp.float32)           # (C4, M)
    sel = (jnp.arange(m)[:, None] // 16
           == jnp.arange(n_batch)[None, :]).astype(jnp.float32)           # (M, Nb)
    kernel = functools.partial(_head_kernel, inv_m=1.0 / m)
    return pl.pallas_call(
        kernel,
        out_shape=jax.ShapeDtypeStruct((1, n_batch), jnp.float32),
        grid_spec=pltpu.PrefetchScalarGridSpec(
            num_scalar_prefetch=0,
            grid=(1,),
            in_specs=[
                pl.BlockSpec((c4, k4), lambda i: (0, 0)),
                pl.BlockSpec((k4, m), lambda i: (0, 0)),
                pl.BlockSpec((c4, 1), lambda i: (0, 0)),
                pl.BlockSpec((c4, 1), lambda i: (0, 0)),
                pl.BlockSpec((c4, m), lambda i: (0, 0)),
                pl.BlockSpec((m, n_batch), lambda i: (0, 0)),
            ],
            out_specs=pl.BlockSpec((1, n_batch), lambda i: (0, 0)),
        ),
    )(w4_t, patches_t, gamma.reshape(c4, 1), beta.reshape(c4, 1), w5_tiled, sel)


# ----------------------------------------------------------------------------
# Plain-JAX glue: channels-first im2col and layout plumbing
# ----------------------------------------------------------------------------
def im2col_t(x_nchw, k, s, p):
    """x: (N,C,H,W) -> patches^T of shape (C*k*k, N*Ho*Wo), rows ordered
    (c, ki, kj) to match PyTorch weight.reshape(Cout, Cin*k*k)."""
    n, c, h, w = x_nchw.shape
    if p:
        x_nchw = jnp.pad(x_nchw, ((0, 0), (0, 0), (p, p), (p, p)))
    hp, wp = h + 2 * p, w + 2 * p
    ho = (hp - k) // s + 1
    wo = (wp - k) // s + 1
    slabs = []
    for ki in range(k):
        for kj in range(k):
            slabs.append(
                x_nchw[:, :, ki:ki + s * (ho - 1) + 1:s, kj:kj + s * (wo - 1) + 1:s])
    pat = jnp.stack(slabs, axis=2)                 # (N, C, k*k, Ho, Wo)
    pat = jnp.transpose(pat, (1, 2, 0, 3, 4))      # (C, k*k, N, Ho, Wo)
    return pat.reshape(c * k * k, n * ho * wo), (ho, wo)


def t_to_nchw(y_t, c, n, h, w):
    """(Cout, N*H*W) -> (N, Cout, H, W)."""
    return jnp.transpose(y_t.reshape(c, n, h, w), (1, 0, 2, 3))


# ----------------------------------------------------------------------------
# Discriminator parameters and forward pass
# ----------------------------------------------------------------------------
def init_params(key, nc, ndf):
    """Weights stored PyTorch-style (Cout, Cin, 4, 4), pre-reshaped/cast for
    the transposed bf16 matmuls."""
    chans = [nc, ndf, 2 * ndf, 4 * ndf, 8 * ndf, 16 * ndf]
    params = {}
    keys = jax.random.split(key, 6)
    for i in range(5):
        cin, cout = chans[i], chans[i + 1]
        wi = 0.02 * jax.random.normal(keys[i], (cout, cin, 4, 4), dtype=jnp.float32)
        params[f"w{i}"] = wi.reshape(cout, cin * 16).astype(jnp.bfloat16)
        if i >= 1:  # BatchNorm2d after conv1..conv4 (PyTorch default init)
            params[f"gamma{i}"] = jnp.ones((cout,), jnp.float32)
            params[f"beta{i}"] = jnp.zeros((cout,), jnp.float32)
    w5 = 0.02 * jax.random.normal(keys[5], (1, chans[5], 4, 4), dtype=jnp.float32)
    params["w5"] = w5.reshape(chans[5], 16).astype(jnp.float32)   # (16*ndf, 16)
    return params


def discriminator_forward(x_nchw, params):
    n = x_nchw.shape[0]
    x = x_nchw.astype(jnp.bfloat16)

    # conv0: Conv(nc -> ndf, 4, s2, p1) + LeakyReLU(0.2)
    p, (h, w) = im2col_t(x, 4, 2, 1)
    y = conv_lrelu_t(params["w0"], p)
    c = params["w0"].shape[0]

    # conv1..conv3: Conv(.., 4, s2, p1) + BatchNorm (batch stats) + LeakyReLU(0.2)
    for i in (1, 2, 3):
        x = t_to_nchw(y, c, n, h, w)
        p, (h, w) = im2col_t(x, 4, 2, 1)
        y = conv_bn_lrelu_t(params[f"w{i}"], p, params[f"gamma{i}"], params[f"beta{i}"])
        c = params[f"w{i}"].shape[0]

    # conv4 + BN + LeakyReLU, with conv5 (16*ndf -> 1, 4x4 valid) + Sigmoid
    # folded into the same kernel.
    x = t_to_nchw(y, c, n, h, w)
    p, (h, w) = im2col_t(x, 4, 2, 1)
    out = head_t(params["w4"], p, params["gamma4"], params["beta4"], params["w5"], n)

    # (1, N) -> (N, 1, 1, 1) like the PyTorch module.
    return out.reshape(n, 1, 1, 1).astype(jnp.float32)


if __name__ == "__main__":
    # Spatial size 128 is implied by the architecture: five stride-2 4x4 convs
    # take 128 -> 4, then the final 4x4 valid conv produces a 1x1 map.
    config = {"nc": 3, "nz": 100, "ndf": 8}
    N, H, W = 2, 128, 128

    key = jax.random.PRNGKey(0)
    pkey, xkey = jax.random.split(key)
    params = init_params(pkey, config["nc"], config["ndf"])
    x = jax.random.normal(xkey, (N, config["nc"], H, W), dtype=jnp.float32)

    fwd = jax.jit(discriminator_forward)
    out = jax.block_until_ready(fwd(x, params))

    assert out.shape == (N, 1, 1, 1), out.shape
    assert bool(jnp.all(jnp.isfinite(out)))
    assert bool(jnp.all((out >= 0.0) & (out <= 1.0)))
    print("KERNEL_OK")
</pallas_src>

<mosaic_0001>
module attributes {stable_mosaic.version = 11 : i64} {
  func.func @_conv_lrelu_kernel(%arg0: i32, %arg1: memref<8x48xbf16, #tpu.memory_space<vmem>>, %arg2: memref<48x4096xbf16, #tpu.memory_space<vmem>>, %arg3: memref<8x4096xbf16, #tpu.memory_space<vmem>>) attributes {dimension_semantics = [#tpu.dimension_semantics<parallel>], iteration_bounds = array<i64: 2>, scalar_prefetch = 0 : i64, scratch_operands = 0 : i64, tpu.core_type = #tpu.core_type<tc>, window_params = [{pipeline_mode = #tpu.pipeline_mode<synchronous>, transform_indices = @transform_0, window_bounds = array<i64: 8, 48>}, {transform_indices = @transform_1, window_bounds = array<i64: 48, 4096>}, {transform_indices = @transform_2, window_bounds = array<i64: 8, 4096>}]} {
    %c0 = arith.constant 0 : index
    %c0_0 = arith.constant 0 : index
    %0 = vector.load %arg1[%c0, %c0_0] : memref<8x48xbf16, #tpu.memory_space<vmem>>, vector<8x48xbf16>
    %c0_1 = arith.constant 0 : index
    %c0_2 = arith.constant 0 : index
    %1 = vector.load %arg2[%c0_1, %c0_2] : memref<48x4096xbf16, #tpu.memory_space<vmem>>, vector<48x4096xbf16>
    %cst = arith.constant dense<0.000000e+00> : vector<8x4096xf32>
    %2 = tpu.matmul %0, %1, %cst {dimension_numbers = #tpu.dot_dimension_numbers<[1], [0], [0], [1], [0, 0, 1, 1], [], []>} : vector<8x48xbf16>, vector<48x4096xbf16>, vector<8x4096xf32> -> vector<8x4096xf32>
    %cst_3 = arith.constant 0.000000e+00 : f32
    %3 = vector.broadcast %cst_3 : f32 to vector<8x4096xf32>
    %4 = arith.cmpf ogt, %2, %3 : vector<8x4096xf32>
    %cst_4 = arith.constant 2.000000e-01 : f32
    %5 = vector.broadcast %cst_4 : f32 to vector<8x4096xf32>
    %6 = arith.mulf %5, %2 : vector<8x4096xf32>
    %7 = arith.select %4, %2, %6 : vector<8x4096xi1>, vector<8x4096xf32>
    %8 = arith.truncf %7 : vector<8x4096xf32> to vector<8x4096xbf16>
    %c0_5 = arith.constant 0 : index
    %c0_6 = arith.constant 0 : index
    %9 = vector.load %arg3[%c0_5, %c0_6] : memref<8x4096xbf16, #tpu.memory_space<vmem>>, vector<8x4096xbf16>
    tpu.vector_store %arg3[%c0_5, %c0_6], %8 {strides = array<i32>} : memref<8x4096xbf16, #tpu.memory_space<vmem>>, vector<8x4096xbf16>,
    return
  }
  func.func @transform_0(%arg0: i32) -> (i32, i32) {
    %c0_i32 = arith.constant 0 : i32
    %c0_i32_0 = arith.constant 0 : i32
    %c0_i32_1 = arith.constant 0 : i32
    return %c0_i32, %c0_i32_0 : i32, i32
  }
  func.func @transform_1(%arg0: i32) -> (i32, i32) {
    %c0_i32 = arith.constant 0 : i32
    %c0_i32_0 = arith.constant 0 : i32
    return %c0_i32, %arg0 : i32, i32
  }
  func.func @transform_2(%arg0: i32) -> (i32, i32) {
    %c0_i32 = arith.constant 0 : i32
    %c0_i32_0 = arith.constant 0 : i32
    return %c0_i32, %arg0 : i32, i32
  }
}

module attributes {stable_mosaic.version = 11 : i64} {
  func.func @_conv_bn_lrelu_kernel(%arg0: i32, %arg1: memref<16x128xbf16, #tpu.memory_space<vmem>>, %arg2: memref<128x2048xbf16, #tpu.memory_space<vmem>>, %arg3: memref<16x1xf32, #tpu.memory_space<vmem>>, %arg4: memref<16x1xf32, #tpu.memory_space<vmem>>, %arg5: memref<16x2048xbf16, #tpu.memory_space<vmem>>) attributes {dimension_semantics = [#tpu.dimension_semantics<arbitrary>], iteration_bounds = array<i64: 1>, scalar_prefetch = 0 : i64, scratch_operands = 0 : i64, tpu.core_type = #tpu.core_type<tc>, window_params = [{pipeline_mode = #tpu.pipeline_mode<synchronous>, transform_indices = @transform_0, window_bounds = array<i64: 16, 128>}, {pipeline_mode = #tpu.pipeline_mode<synchronous>, transform_indices = @transform_1, window_bounds = array<i64: 128, 2048>}, {pipeline_mode = #tpu.pipeline_mode<synchronous>, transform_indices = @transform_2, window_bounds = array<i64: 16, 1>}, {pipeline_mode = #tpu.pipeline_mode<synchronous>, transform_indices = @transform_3, window_bounds = array<i64: 16, 1>}, {pipeline_mode = #tpu.pipeline_mode<synchronous>, transform_indices = @transform_4, window_bounds = array<i64: 16, 2048>}]} {
    %c0 = arith.constant 0 : index
    %c0_0 = arith.constant 0 : index
    %0 = vector.load %arg1[%c0, %c0_0] : memref<16x128xbf16, #tpu.memory_space<vmem>>, vector<16x128xbf16>
    %c0_1 = arith.constant 0 : index
    %c0_2 = arith.constant 0 : index
    %1 = vector.load %arg2[%c0_1, %c0_2] : memref<128x2048xbf16, #tpu.memory_space<vmem>>, vector<128x2048xbf16>
    %cst = arith.constant dense<0.000000e+00> : vector<16x2048xf32>
    %2 = tpu.matmul %0, %1, %cst {dimension_numbers = #tpu.dot_dimension_numbers<[1], [0], [0], [1], [0, 0, 1, 1], [], []>} : vector<16x128xbf16>, vector<128x2048xbf16>, vector<16x2048xf32> -> vector<16x2048xf32>
    %cst_3 = arith.constant dense<0.000000e+00> : vector<16xf32>
    %3 = vector.multi_reduction <add>, %2, %cst_3 [1] : vector<16x2048xf32> to vector<16xf32>
    %4 = vector.shape_cast %3 : vector<16xf32> to vector<16x1xf32>
    %cst_4 = arith.constant 4.8828125E-4 : f32
    %5 = vector.broadcast %cst_4 : f32 to vector<16x1xf32>
    %6 = arith.mulf %4, %5 : vector<16x1xf32>
    %7 = arith.mulf %2, %2 : vector<16x2048xf32>
    %cst_5 = arith.constant dense<0.000000e+00> : vector<16xf32>
    %8 = vector.multi_reduction <add>, %7, %cst_5 [1] : vector<16x2048xf32> to vector<16xf32>
    %9 = vector.shape_cast %8 : vector<16xf32> to vector<16x1xf32>
    %cst_6 = arith.constant 4.8828125E-4 : f32
    %10 = vector.broadcast %cst_6 : f32 to vector<16x1xf32>
    %11 = arith.mulf %9, %10 : vector<16x1xf32>
    %12 = arith.mulf %6, %6 : vector<16x1xf32>
    %13 = arith.subf %11, %12 : vector<16x1xf32>
    %14 = vector.broadcast %6 : vector<16x1xf32> to vector<16x2048xf32>
    %15 = arith.subf %2, %14 : vector<16x2048xf32>
    %cst_7 = arith.constant 9.99999974E-6 : f32
    %16 = vector.broadcast %cst_7 : f32 to vector<16x1xf32>
    %17 = arith.addf %13, %16 : vector<16x1xf32>
    %18 = math.rsqrt %17 : vector<16x1xf32>
    %19 = vector.broadcast %18 : vector<16x1xf32> to vector<16x2048xf32>
    %20 = arith.mulf %15, %19 : vector<16x2048xf32>
    %c0_8 = arith.constant 0 : index
    %c0_9 = arith.constant 0 : index
    %21 = vector.load %arg3[%c0_8, %c0_9] : memref<16x1xf32, #tpu.memory_space<vmem>>, vector<16x1xf32>
    %22 = vector.broadcast %21 : vector<16x1xf32> to vector<16x2048xf32>
    %23 = arith.mulf %20, %22 : vector<16x2048xf32>
    %c0_10 = arith.constant 0 : index
    %c0_11 = arith.constant 0 : index
    %24 = vector.load %arg4[%c0_10, %c0_11] : memref<16x1xf32, #tpu.memory_space<vmem>>, vector<16x1xf32>
    %25 = vector.broadcast %24 : vector<16x1xf32> to vector<16x2048xf32>
    %26 = arith.addf %23, %25 : vector<16x2048xf32>
    %cst_12 = arith.constant 0.000000e+00 : f32
    %27 = vector.broadcast %cst_12 : f32 to vector<16x2048xf32>
    %28 = arith.cmpf ogt, %26, %27 : vector<16x2048xf32>
    %cst_13 = arith.constant 2.000000e-01 : f32
    %29 = vector.broadcast %cst_13 : f32 to vector<16x2048xf32>
    %30 = arith.mulf %29, %26 : vector<16x2048xf32>
    %31 = arith.select %28, %26, %30 : vector<16x2048xi1>, vector<16x2048xf32>
    %32 = arith.truncf %31 : vector<16x2048xf32> to vector<16x2048xbf16>
    %c0_14 = arith.constant 0 : index
    %c0_15 = arith.constant 0 : index
    %33 = vector.load %arg5[%c0_14, %c0_15] : memref<16x2048xbf16, #tpu.memory_space<vmem>>, vector<16x2048xbf16>
    tpu.vector_store %arg5[%c0_14, %c0_15], %32 {strides = array<i32>} : memref<16x2048xbf16, #tpu.memory_space<vmem>>, vector<16x2048xbf16>,
    return
  }
  func.func @transform_0(%arg0: i32) -> (i32, i32) {
    %c0_i32 = arith.constant 0 : i32
    %c0_i32_0 = arith.constant 0 : i32
    %c0_i32_1 = arith.constant 0 : i32
    return %c0_i32, %c0_i32_0 : i32, i32
  }
  func.func @transform_1(%arg0: i32) -> (i32, i32) {
    %c0_i32 = arith.constant 0 : i32
    %c0_i32_0 = arith.constant 0 : i32
    %c0_i32_1 = arith.constant 0 : i32
    return %c0_i32, %c0_i32_0 : i32, i32
  }
  func.func @transform_2(%arg0: i32) -> (i32, i32) {
    %c0_i32 = arith.constant 0 : i32
    %c0_i32_0 = arith.constant 0 : i32
    %c0_i32_1 = arith.constant 0 : i32
    return %c0_i32, %c0_i32_0 : i32, i32
  }
  func.func @transform_3(%arg0: i32) -> (i32, i32) {
    %c0_i32 = arith.constant 0 : i32
    %c0_i32_0 = arith.constant 0 : i32
    %c0_i32_1 = arith.constant 0 : i32
    return %c0_i32, %c0_i32_0 : i32, i32
  }
  func.func @transform_4(%arg0: i32) -> (i32, i32) {
    %c0_i32 = arith.constant 0 : i32
    %c0_i32_0 = arith.constant 0 : i32
    %c0_i32_1 = arith.constant 0 : i32
    return %c0_i32, %c0_i32_0 : i32, i32
  }
}

module attributes {stable_mosaic.version = 11 : i64} {
  func.func @_conv_bn_lrelu_kernel(%arg0: i32, %arg1: memref<32x256xbf16, #tpu.memory_space<vmem>>, %arg2: memref<256x512xbf16, #tpu.memory_space<vmem>>, %arg3: memref<32x1xf32, #tpu.memory_space<vmem>>, %arg4: memref<32x1xf32, #tpu.memory_space<vmem>>, %arg5: memref<32x512xbf16, #tpu.memory_space<vmem>>) attributes {dimension_semantics = [#tpu.dimension_semantics<arbitrary>], iteration_bounds = array<i64: 1>, scalar_prefetch = 0 : i64, scratch_operands = 0 : i64, tpu.core_type = #tpu.core_type<tc>, window_params = [{pipeline_mode = #tpu.pipeline_mode<synchronous>, transform_indices = @transform_0, window_bounds = array<i64: 32, 256>}, {pipeline_mode = #tpu.pipeline_mode<synchronous>, transform_indices = @transform_1, window_bounds = array<i64: 256, 512>}, {pipeline_mode = #tpu.pipeline_mode<synchronous>, transform_indices = @transform_2, window_bounds = array<i64: 32, 1>}, {pipeline_mode = #tpu.pipeline_mode<synchronous>, transform_indices = @transform_3, window_bounds = array<i64: 32, 1>}, {pipeline_mode = #tpu.pipeline_mode<synchronous>, transform_indices = @transform_4, window_bounds = array<i64: 32, 512>}]} {
    %c0 = arith.constant 0 : index
    %c0_0 = arith.constant 0 : index
    %0 = vector.load %arg1[%c0, %c0_0] : memref<32x256xbf16, #tpu.memory_space<vmem>>, vector<32x256xbf16>
    %c0_1 = arith.constant 0 : index
    %c0_2 = arith.constant 0 : index
    %1 = vector.load %arg2[%c0_1, %c0_2] : memref<256x512xbf16, #tpu.memory_space<vmem>>, vector<256x512xbf16>
    %cst = arith.constant dense<0.000000e+00> : vector<32x512xf32>
    %2 = tpu.matmul %0, %1, %cst {dimension_numbers = #tpu.dot_dimension_numbers<[1], [0], [0], [1], [0, 0, 1, 1], [], []>} : vector<32x256xbf16>, vector<256x512xbf16>, vector<32x512xf32> -> vector<32x512xf32>
    %cst_3 = arith.constant dense<0.000000e+00> : vector<32xf32>
    %3 = vector.multi_reduction <add>, %2, %cst_3 [1] : vector<32x512xf32> to vector<32xf32>
    %4 = vector.shape_cast %3 : vector<32xf32> to vector<32x1xf32>
    %cst_4 = arith.constant 0.001953125 : f32
    %5 = vector.broadcast %cst_4 : f32 to vector<32x1xf32>
    %6 = arith.mulf %4, %5 : vector<32x1xf32>
    %7 = arith.mulf %2, %2 : vector<32x512xf32>
    %cst_5 = arith.constant dense<0.000000e+00> : vector<32xf32>
    %8 = vector.multi_reduction <add>, %7, %cst_5 [1] : vector<32x512xf32> to vector<32xf32>
    %9 = vector.shape_cast %8 : vector<32xf32> to vector<32x1xf32>
    %cst_6 = arith.constant 0.001953125 : f32
    %10 = vector.broadcast %cst_6 : f32 to vector<32x1xf32>
    %11 = arith.mulf %9, %10 : vector<32x1xf32>
    %12 = arith.mulf %6, %6 : vector<32x1xf32>
    %13 = arith.subf %11, %12 : vector<32x1xf32>
    %14 = vector.broadcast %6 : vector<32x1xf32> to vector<32x512xf32>
    %15 = arith.subf %2, %14 : vector<32x512xf32>
    %cst_7 = arith.constant 9.99999974E-6 : f32
    %16 = vector.broadcast %cst_7 : f32 to vector<32x1xf32>
    %17 = arith.addf %13, %16 : vector<32x1xf32>
    %18 = math.rsqrt %17 : vector<32x1xf32>
    %19 = vector.broadcast %18 : vector<32x1xf32> to vector<32x512xf32>
    %20 = arith.mulf %15, %19 : vector<32x512xf32>
    %c0_8 = arith.constant 0 : index
    %c0_9 = arith.constant 0 : index
    %21 = vector.load %arg3[%c0_8, %c0_9] : memref<32x1xf32, #tpu.memory_space<vmem>>, vector<32x1xf32>
    %22 = vector.broadcast %21 : vector<32x1xf32> to vector<32x512xf32>
    %23 = arith.mulf %20, %22 : vector<32x512xf32>
    %c0_10 = arith.constant 0 : index
    %c0_11 = arith.constant 0 : index
    %24 = vector.load %arg4[%c0_10, %c0_11] : memref<32x1xf32, #tpu.memory_space<vmem>>, vector<32x1xf32>
    %25 = vector.broadcast %24 : vector<32x1xf32> to vector<32x512xf32>
    %26 = arith.addf %23, %25 : vector<32x512xf32>
    %cst_12 = arith.constant 0.000000e+00 : f32
    %27 = vector.broadcast %cst_12 : f32 to vector<32x512xf32>
    %28 = arith.cmpf ogt, %26, %27 : vector<32x512xf32>
    %cst_13 = arith.constant 2.000000e-01 : f32
    %29 = vector.broadcast %cst_13 : f32 to vector<32x512xf32>
    %30 = arith.mulf %29, %26 : vector<32x512xf32>
    %31 = arith.select %28, %26, %30 : vector<32x512xi1>, vector<32x512xf32>
    %32 = arith.truncf %31 : vector<32x512xf32> to vector<32x512xbf16>
    %c0_14 = arith.constant 0 : index
    %c0_15 = arith.constant 0 : index
    %33 = vector.load %arg5[%c0_14, %c0_15] : memref<32x512xbf16, #tpu.memory_space<vmem>>, vector<32x512xbf16>
    tpu.vector_store %arg5[%c0_14, %c0_15], %32 {strides = array<i32>} : memref<32x512xbf16, #tpu.memory_space<vmem>>, vector<32x512xbf16>,
    return
  }
  func.func @transform_0(%arg0: i32) -> (i32, i32) {
    %c0_i32 = arith.constant 0 : i32
    %c0_i32_0 = arith.constant 0 : i32
    %c0_i32_1 = arith.constant 0 : i32
    return %c0_i32, %c0_i32_0 : i32, i32
  }
  func.func @transform_1(%arg0: i32) -> (i32, i32) {
    %c0_i32 = arith.constant 0 : i32
    %c0_i32_0 = arith.constant 0 : i32
    %c0_i32_1 = arith.constant 0 : i32
    return %c0_i32, %c0_i32_0 : i32, i32
  }
  func.func @transform_2(%arg0: i32) -> (i32, i32) {
    %c0_i32 = arith.constant 0 : i32
    %c0_i32_0 = arith.constant 0 : i32
    %c0_i32_1 = arith.constant 0 : i32
    return %c0_i32, %c0_i32_0 : i32, i32
  }
  func.func @transform_3(%arg0: i32) -> (i32, i32) {
    %c0_i32 = arith.constant 0 : i32
    %c0_i32_0 = arith.constant 0 : i32
    %c0_i32_1 = arith.constant 0 : i32
    return %c0_i32, %c0_i32_0 : i32, i32
  }
  func.func @transform_4(%arg0: i32) -> (i32, i32) {
    %c0_i32 = arith.constant 0 : i32
    %c0_i32_0 = arith.constant 0 : i32
    %c0_i32_1 = arith.constant 0 : i32
    return %c0_i32, %c0_i32_0 : i32, i32
  }
}

module attributes {stable_mosaic.version = 11 : i64} {
  func.func @_conv_bn_lrelu_kernel(%arg0: i32, %arg1: memref<64x512xbf16, #tpu.memory_space<vmem>>, %arg2: memref<512x128xbf16, #tpu.memory_space<vmem>>, %arg3: memref<64x1xf32, #tpu.memory_space<vmem>>, %arg4: memref<64x1xf32, #tpu.memory_space<vmem>>, %arg5: memref<64x128xbf16, #tpu.memory_space<vmem>>) attributes {dimension_semantics = [#tpu.dimension_semantics<arbitrary>], iteration_bounds = array<i64: 1>, scalar_prefetch = 0 : i64, scratch_operands = 0 : i64, tpu.core_type = #tpu.core_type<tc>, window_params = [{pipeline_mode = #tpu.pipeline_mode<synchronous>, transform_indices = @transform_0, window_bounds = array<i64: 64, 512>}, {pipeline_mode = #tpu.pipeline_mode<synchronous>, transform_indices = @transform_1, window_bounds = array<i64: 512, 128>}, {pipeline_mode = #tpu.pipeline_mode<synchronous>, transform_indices = @transform_2, window_bounds = array<i64: 64, 1>}, {pipeline_mode = #tpu.pipeline_mode<synchronous>, transform_indices = @transform_3, window_bounds = array<i64: 64, 1>}, {pipeline_mode = #tpu.pipeline_mode<synchronous>, transform_indices = @transform_4, window_bounds = array<i64: 64, 128>}]} {
    %c0 = arith.constant 0 : index
    %c0_0 = arith.constant 0 : index
    %0 = vector.load %arg1[%c0, %c0_0] : memref<64x512xbf16, #tpu.memory_space<vmem>>, vector<64x512xbf16>
    %c0_1 = arith.constant 0 : index
    %c0_2 = arith.constant 0 : index
    %1 = vector.load %arg2[%c0_1, %c0_2] : memref<512x128xbf16, #tpu.memory_space<vmem>>, vector<512x128xbf16>
    %cst = arith.constant dense<0.000000e+00> : vector<64x128xf32>
    %2 = tpu.matmul %0, %1, %cst {dimension_numbers = #tpu.dot_dimension_numbers<[1], [0], [0], [1], [0, 0, 1, 1], [], []>} : vector<64x512xbf16>, vector<512x128xbf16>, vector<64x128xf32> -> vector<64x128xf32>
    %cst_3 = arith.constant dense<0.000000e+00> : vector<64xf32>
    %3 = vector.multi_reduction <add>, %2, %cst_3 [1] : vector<64x128xf32> to vector<64xf32>
    %4 = vector.shape_cast %3 : vector<64xf32> to vector<64x1xf32>
    %cst_4 = arith.constant 7.812500e-03 : f32
    %5 = vector.broadcast %cst_4 : f32 to vector<64x1xf32>
    %6 = arith.mulf %4, %5 : vector<64x1xf32>
    %7 = arith.mulf %2, %2 : vector<64x128xf32>
    %cst_5 = arith.constant dense<0.000000e+00> : vector<64xf32>
    %8 = vector.multi_reduction <add>, %7, %cst_5 [1] : vector<64x128xf32> to vector<64xf32>
    %9 = vector.shape_cast %8 : vector<64xf32> to vector<64x1xf32>
    %cst_6 = arith.constant 7.812500e-03 : f32
    %10 = vector.broadcast %cst_6 : f32 to vector<64x1xf32>
    %11 = arith.mulf %9, %10 : vector<64x1xf32>
    %12 = arith.mulf %6, %6 : vector<64x1xf32>
    %13 = arith.subf %11, %12 : vector<64x1xf32>
    %14 = vector.broadcast %6 : vector<64x1xf32> to vector<64x128xf32>
    %15 = arith.subf %2, %14 : vector<64x128xf32>
    %cst_7 = arith.constant 9.99999974E-6 : f32
    %16 = vector.broadcast %cst_7 : f32 to vector<64x1xf32>
    %17 = arith.addf %13, %16 : vector<64x1xf32>
    %18 = math.rsqrt %17 : vector<64x1xf32>
    %19 = vector.broadcast %18 : vector<64x1xf32> to vector<64x128xf32>
    %20 = arith.mulf %15, %19 : vector<64x128xf32>
    %c0_8 = arith.constant 0 : index
    %c0_9 = arith.constant 0 : index
    %21 = vector.load %arg3[%c0_8, %c0_9] : memref<64x1xf32, #tpu.memory_space<vmem>>, vector<64x1xf32>
    %22 = vector.broadcast %21 : vector<64x1xf32> to vector<64x128xf32>
    %23 = arith.mulf %20, %22 : vector<64x128xf32>
    %c0_10 = arith.constant 0 : index
    %c0_11 = arith.constant 0 : index
    %24 = vector.load %arg4[%c0_10, %c0_11] : memref<64x1xf32, #tpu.memory_space<vmem>>, vector<64x1xf32>
    %25 = vector.broadcast %24 : vector<64x1xf32> to vector<64x128xf32>
    %26 = arith.addf %23, %25 : vector<64x128xf32>
    %cst_12 = arith.constant 0.000000e+00 : f32
    %27 = vector.broadcast %cst_12 : f32 to vector<64x128xf32>
    %28 = arith.cmpf ogt, %26, %27 : vector<64x128xf32>
    %cst_13 = arith.constant 2.000000e-01 : f32
    %29 = vector.broadcast %cst_13 : f32 to vector<64x128xf32>
    %30 = arith.mulf %29, %26 : vector<64x128xf32>
    %31 = arith.select %28, %26, %30 : vector<64x128xi1>, vector<64x128xf32>
    %32 = arith.truncf %31 : vector<64x128xf32> to vector<64x128xbf16>
    %c0_14 = arith.constant 0 : index
    %c0_15 = arith.constant 0 : index
    %33 = vector.load %arg5[%c0_14, %c0_15] : memref<64x128xbf16, #tpu.memory_space<vmem>>, vector<64x128xbf16>
    tpu.vector_store %arg5[%c0_14, %c0_15], %32 {strides = array<i32>} : memref<64x128xbf16, #tpu.memory_space<vmem>>, vector<64x128xbf16>,
    return
  }
  func.func @transform_0(%arg0: i32) -> (i32, i32) {
    %c0_i32 = arith.constant 0 : i32
    %c0_i32_0 = arith.constant 0 : i32
    %c0_i32_1 = arith.constant 0 : i32
    return %c0_i32, %c0_i32_0 : i32, i32
  }
  func.func @transform_1(%arg0: i32) -> (i32, i32) {
    %c0_i32 = arith.constant 0 : i32
    %c0_i32_0 = arith.constant 0 : i32
    %c0_i32_1 = arith.constant 0 : i32
    return %c0_i32, %c0_i32_0 : i32, i32
  }
  func.func @transform_2(%arg0: i32) -> (i32, i32) {
    %c0_i32 = arith.constant 0 : i32
    %c0_i32_0 = arith.constant 0 : i32
    %c0_i32_1 = arith.constant 0 : i32
    return %c0_i32, %c0_i32_0 : i32, i32
  }
  func.func @transform_3(%arg0: i32) -> (i32, i32) {
    %c0_i32 = arith.constant 0 : i32
    %c0_i32_0 = arith.constant 0 : i32
    %c0_i32_1 = arith.constant 0 : i32
    return %c0_i32, %c0_i32_0 : i32, i32
  }
  func.func @transform_4(%arg0: i32) -> (i32, i32) {
    %c0_i32 = arith.constant 0 : i32
    %c0_i32_0 = arith.constant 0 : i32
    %c0_i32_1 = arith.constant 0 : i32
    return %c0_i32, %c0_i32_0 : i32, i32
  }
}

module attributes {stable_mosaic.version = 11 : i64} {
  func.func @_head_kernel(%arg0: i32, %arg1: memref<128x1024xbf16, #tpu.memory_space<vmem>>, %arg2: memref<1024x32xbf16, #tpu.memory_space<vmem>>, %arg3: memref<128x1xf32, #tpu.memory_space<vmem>>, %arg4: memref<128x1xf32, #tpu.memory_space<vmem>>, %arg5: memref<128x32xf32, #tpu.memory_space<vmem>>, %arg6: memref<32x2xf32, #tpu.memory_space<vmem>>, %arg7: memref<1x2xf32, #tpu.memory_space<vmem>>) attributes {dimension_semantics = [#tpu.dimension_semantics<arbitrary>], iteration_bounds = array<i64: 1>, scalar_prefetch = 0 : i64, scratch_operands = 0 : i64, tpu.core_type = #tpu.core_type<tc>, window_params = [{pipeline_mode = #tpu.pipeline_mode<synchronous>, transform_indices = @transform_0, window_bounds = array<i64: 128, 1024>}, {pipeline_mode = #tpu.pipeline_mode<synchronous>, transform_indices = @transform_1, window_bounds = array<i64: 1024, 32>}, {pipeline_mode = #tpu.pipeline_mode<synchronous>, transform_indices = @transform_2, window_bounds = array<i64: 128, 1>}, {pipeline_mode = #tpu.pipeline_mode<synchronous>, transform_indices = @transform_3, window_bounds = array<i64: 128, 1>}, {pipeline_mode = #tpu.pipeline_mode<synchronous>, transform_indices = @transform_4, window_bounds = array<i64: 128, 32>}, {pipeline_mode = #tpu.pipeline_mode<synchronous>, transform_indices = @transform_5, window_bounds = array<i64: 32, 2>}, {pipeline_mode = #tpu.pipeline_mode<synchronous>, transform_indices = @transform_6, window_bounds = array<i64: 1, 2>}]} {
    %c0 = arith.constant 0 : index
    %c0_0 = arith.constant 0 : index
    %0 = vector.load %arg1[%c0, %c0_0] : memref<128x1024xbf16, #tpu.memory_space<vmem>>, vector<128x1024xbf16>
    %c0_1 = arith.constant 0 : index
    %c0_2 = arith.constant 0 : index
    %1 = vector.load %arg2[%c0_1, %c0_2] : memref<1024x32xbf16, #tpu.memory_space<vmem>>, vector<1024x32xbf16>
    %cst = arith.constant dense<0.000000e+00> : vector<128x32xf32>
    %2 = tpu.matmul %0, %1, %cst {dimension_numbers = #tpu.dot_dimension_numbers<[1], [0], [0], [1], [0, 0, 1, 1], [], []>} : vector<128x1024xbf16>, vector<1024x32xbf16>, vector<128x32xf32> -> vector<128x32xf32>
    %cst_3 = arith.constant dense<0.000000e+00> : vector<128xf32>
    %3 = vector.multi_reduction <add>, %2, %cst_3 [1] : vector<128x32xf32> to vector<128xf32>
    %4 = vector.shape_cast %3 : vector<128xf32> to vector<128x1xf32>
    %cst_4 = arith.constant 3.125000e-02 : f32
    %5 = vector.broadcast %cst_4 : f32 to vector<128x1xf32>
    %6 = arith.mulf %4, %5 : vector<128x1xf32>
    %7 = arith.mulf %2, %2 : vector<128x32xf32>
    %cst_5 = arith.constant dense<0.000000e+00> : vector<128xf32>
    %8 = vector.multi_reduction <add>, %7, %cst_5 [1] : vector<128x32xf32> to vector<128xf32>
    %9 = vector.shape_cast %8 : vector<128xf32> to vector<128x1xf32>
    %cst_6 = arith.constant 3.125000e-02 : f32
    %10 = vector.broadcast %cst_6 : f32 to vector<128x1xf32>
    %11 = arith.mulf %9, %10 : vector<128x1xf32>
    %12 = arith.mulf %6, %6 : vector<128x1xf32>
    %13 = arith.subf %11, %12 : vector<128x1xf32>
    %14 = vector.broadcast %6 : vector<128x1xf32> to vector<128x32xf32>
    %15 = arith.subf %2, %14 : vector<128x32xf32>
    %cst_7 = arith.constant 9.99999974E-6 : f32
    %16 = vector.broadcast %cst_7 : f32 to vector<128x1xf32>
    %17 = arith.addf %13, %16 : vector<128x1xf32>
    %18 = math.rsqrt %17 : vector<128x1xf32>
    %19 = vector.broadcast %18 : vector<128x1xf32> to vector<128x32xf32>
    %20 = arith.mulf %15, %19 : vector<128x32xf32>
    %c0_8 = arith.constant 0 : index
    %c0_9 = arith.constant 0 : index
    %21 = vector.load %arg3[%c0_8, %c0_9] : memref<128x1xf32, #tpu.memory_space<vmem>>, vector<128x1xf32>
    %22 = vector.broadcast %21 : vector<128x1xf32> to vector<128x32xf32>
    %23 = arith.mulf %20, %22 : vector<128x32xf32>
    %c0_10 = arith.constant 0 : index
    %c0_11 = arith.constant 0 : index
    %24 = vector.load %arg4[%c0_10, %c0_11] : memref<128x1xf32, #tpu.memory_space<vmem>>, vector<128x1xf32>
    %25 = vector.broadcast %24 : vector<128x1xf32> to vector<128x32xf32>
    %26 = arith.addf %23, %25 : vector<128x32xf32>
    %cst_12 = arith.constant 0.000000e+00 : f32
    %27 = vector.broadcast %cst_12 : f32 to vector<128x32xf32>
    %28 = arith.cmpf ogt, %26, %27 : vector<128x32xf32>
    %cst_13 = arith.constant 2.000000e-01 : f32
    %29 = vector.broadcast %cst_13 : f32 to vector<128x32xf32>
    %30 = arith.mulf %29, %26 : vector<128x32xf32>
    %31 = arith.select %28, %26, %30 : vector<128x32xi1>, vector<128x32xf32>
    %c0_14 = arith.constant 0 : index
    %c0_15 = arith.constant 0 : index
    %32 = vector.load %arg5[%c0_14, %c0_15] : memref<128x32xf32, #tpu.memory_space<vmem>>, vector<128x32xf32>
    %33 = arith.mulf %31, %32 : vector<128x32xf32>
    %c0_16 = arith.constant 0 : index
    %c0_17 = arith.constant 0 : index
    %34 = vector.load %arg6[%c0_16, %c0_17] : memref<32x2xf32, #tpu.memory_space<vmem>>, vector<32x2xf32>
    %cst_18 = arith.constant dense<0.000000e+00> : vector<128x2xf32>
    %35 = tpu.matmul %33, %34, %cst_18 {dimension_numbers = #tpu.dot_dimension_numbers<[1], [0], [0], [1], [0, 0, 1, 1], [], []>} : vector<128x32xf32>, vector<32x2xf32>, vector<128x2xf32> -> vector<128x2xf32>
    %cst_19 = arith.constant dense<0.000000e+00> : vector<2xf32>
    %36 = vector.multi_reduction <add>, %35, %cst_19 [0] : vector<128x2xf32> to vector<2xf32>
    %37 = vector.shape_cast %36 : vector<2xf32> to vector<1x2xf32>
    %cst_20 = arith.constant 0.000000e+00 : f32
    %38 = vector.broadcast %cst_20 : f32 to vector<1x2xf32>
    %39 = arith.subf %38, %37 : vector<1x2xf32>
    %40 = math.exp %39 : vector<1x2xf32>
    %cst_21 = arith.constant 1.000000e+00 : f32
    %41 = vector.broadcast %cst_21 : f32 to vector<1x2xf32>
    %42 = arith.addf %41, %40 : vector<1x2xf32>
    %cst_22 = arith.constant 1.000000e+00 : f32
    %43 = vector.broadcast %cst_22 : f32 to vector<1x2xf32>
    %44 = arith.divf %43, %42 : vector<1x2xf32>
    %c0_23 = arith.constant 0 : index
    %c0_24 = arith.constant 0 : index
    %45 = vector.load %arg7[%c0_23, %c0_24] : memref<1x2xf32, #tpu.memory_space<vmem>>, vector<1x2xf32>
    tpu.vector_store %arg7[%c0_23, %c0_24], %44 {strides = array<i32>} : memref<1x2xf32, #tpu.memory_space<vmem>>, vector<1x2xf32>,
    return
  }
  func.func @transform_0(%arg0: i32) -> (i32, i32) {
    %c0_i32 = arith.constant 0 : i32
    %c0_i32_0 = arith.constant 0 : i32
    %c0_i32_1 = arith.constant 0 : i32
    return %c0_i32, %c0_i32_0 : i32, i32
  }
  func.func @transform_1(%arg0: i32) -> (i32, i32) {
    %c0_i32 = arith.constant 0 : i32
    %c0_i32_0 = arith.constant 0 : i32
    %c0_i32_1 = arith.constant 0 : i32
    return %c0_i32, %c0_i32_0 : i32, i32
  }
  func.func @transform_2(%arg0: i32) -> (i32, i32) {
    %c0_i32 = arith.constant 0 : i32
    %c0_i32_0 = arith.constant 0 : i32
    %c0_i32_1 = arith.constant 0 : i32
    return %c0_i32, %c0_i32_0 : i32, i32
  }
  func.func @transform_3(%arg0: i32) -> (i32, i32) {
    %c0_i32 = arith.constant 0 : i32
    %c0_i32_0 = arith.constant 0 : i32
    %c0_i32_1 = arith.constant 0 : i32
    return %c0_i32, %c0_i32_0 : i32, i32
  }
  func.func @transform_4(%arg0: i32) -> (i32, i32) {
    %c0_i32 = arith.constant 0 : i32
    %c0_i32_0 = arith.constant 0 : i32
    %c0_i32_1 = arith.constant 0 : i32
    return %c0_i32, %c0_i32_0 : i32, i32
  }
  func.func @transform_5(%arg0: i32) -> (i32, i32) {
    %c0_i32 = arith.constant 0 : i32
    %c0_i32_0 = arith.constant 0 : i32
    %c0_i32_1 = arith.constant 0 : i32
    return %c0_i32, %c0_i32_0 : i32, i32
  }
  func.func @transform_6(%arg0: i32) -> (i32, i32) {
    %c0_i32 = arith.constant 0 : i32
    %c0_i32_0 = arith.constant 0 : i32
    %c0_i32_1 = arith.constant 0 : i32
    return %c0_i32, %c0_i32_0 : i32, i32
  }
}

</mosaic_0001>

<bundles_post_ra>
// kernel: discriminator_forward.5
= control target key start
LH: loop header
LB: loop body
LE: loop exit
PB: predicated region body
PF: predicated region fallthrough
CT: control target
= control target key end

     0   :  { %s2119_s9 = smov 0   ;;  %s2121_s10 = smov 0   ;;  %s2536_s0 = inlined_call_operand.vmem [shape: bf16[8,48], index: 0, kind: input, shape index: {}]   ;;  %s2537_s1 = inlined_call_operand.vmem [shape: bf16[48,8192], index: 1, kind: input, shape index: {}]   ;;  %s2538_s2 = inlined_call_operand.vmem [shape: bf16[8,8192], index: 2, kind: output, shape index: {}]  }
   0x1   :  { %s2123_s11 = smov 0  }
   0x2 LB: > { %s1896_s12 = sadd.s32 4294967295, %s2101_s11   ;;  %s2136_s13 = sadd.s32 1, %s2101_s11   ;;  %s2101_s11 = sphi %s2123_s11, %s2541_s11   ;;  %s2097_s10 = sphi %s2121_s10, %s2540_s10   ;;  %s2093_s9 = sphi %s2119_s9, %s2539_s9  }
   0x3   : > { %s37_s14 = ssub.s32 %s2101_s11, %s2136_s13  ;;  %s40_s15 = sadd.s32 1, %s2097_s10 }
   0x4   : > { %p38_p0 = scmp.eq.s32.totalorder %s37_s14, 0  ;;  %p47_p1 = scmp.ne.s32.totalorder %s2097_s10, %s2093_s9 }
   0x5   : > { %p48_p2 = scmp.eq.s32.totalorder %s2101_s11, 0  ;;  %p1899_p4 = scmp.ge.s32.totalorder %s2101_s11, 2 }
   0x6   : > { %s2145_s16 = scalar_select %p38_p0, %s2097_s10, %s40_s15  }
   0x7   : > { %p49_p3 = por %p48_p2, %p47_p1  ;;  %102 = sbr.rel (%p1899_p4) target bundleno = 67 (0x43), region = 20 }
   0xe   : > { %105 = sbr.rel (!%p49_p3) target bundleno = 67 (0x43), region = 24  ;;  %s107_s17 = sand.u32 (%p49_p3), 1, %s2097_s10  }
   0xf   : > { %s2035_s18 = sshll.u32 (%p49_p3), %s2101_s11, 7  ;;  %s2052_s19 = smul.u32 (%p49_p3), 768, %s107_s17 }
  0x10   : > { %s2153_s22 = scalar_lea.vmem (%p49_p3), %s2537_s1, %s2035_s18 }
  0x11   : > { %v125_v0 = vld [vmem:[%s2153_s22] sm:$0xff] (%p49_p3)  ;;  %v127_v1 = vld [vmem:[%s2153_s22 + $0x8] sm:$0xff] (%p49_p3)  ;;  %v129_v2 = vld [vmem:[%s2153_s22 + $0x10] sm:$0xff] (%p49_p3)  ;;  %s2161_s23 = scalar_lea.vmem (%p49_p3), [#allocation2], %s2052_s19 }
  0x12   : > { %v131_v3 = vld [vmem:[%s2153_s22 + $0x18] sm:$0xff] (%p49_p3)  ;;  %v133_v4 = vld [vmem:[%s2153_s22 + $0x20] sm:$0xff] (%p49_p3)  ;;  %v135_v5 = vld [vmem:[%s2153_s22 + $0x28] sm:$0xff] (%p49_p3)  ;;  %126 = vst [vmem:[%s2161_s23] sm:$0xff] (%p49_p3), %v125_v0 }
  0x13   : > { %128 = vst [vmem:[%s2161_s23 + $0x8] sm:$0xff] (%p49_p3), %v127_v1  ;;  %130 = vst [vmem:[%s2161_s23 + $0x10] sm:$0xff] (%p49_p3), %v129_v2  ;;  %v137_v6 = vld [vmem:[%s2153_s22 + $0x30] sm:$0xff] (%p49_p3)  ;;  %v139_v7 = vld [vmem:[%s2153_s22 + $0x38] sm:$0xff] (%p49_p3) }
  0x14   : > { %132 = vst [vmem:[%s2161_s23 + $0x18] sm:$0xff] (%p49_p3), %v131_v3  ;;  %134 = vst [vmem:[%s2161_s23 + $0x20] sm:$0xff] (%p49_p3), %v133_v4  ;;  %v141_v8 = vld [vmem:[%s2153_s22 + $0x40] sm:$0xff] (%p49_p3)  ;;  %v143_v9 = vld [vmem:[%s2153_s22 + $0x48] sm:$0xff] (%p49_p3) }
  0x15   : > { %136 = vst [vmem:[%s2161_s23 + $0x28] sm:$0xff] %v135_v5  ;;  %138 = vst [vmem:[%s2161_s23 + $0x30] sm:$0xff] %v137_v6  ;;  %v145_v10 = vld [vmem:[%s2153_s22 + $0x50] sm:$0xff]  ;;  %v147_v11 = vld [vmem:[%s2153_s22 + $0x58] sm:$0xff] }
  0x16   : > { %140 = vst [vmem:[%s2161_s23 + $0x38] sm:$0xff] %v139_v7  ;;  %142 = vst [vmem:[%s2161_s23 + $0x40] sm:$0xff] %v141_v8  ;;  %v149_v12 = vld [vmem:[%s2153_s22 + $0x60] sm:$0xff]  ;;  %v151_v13 = vld [vmem:[%s2153_s22 + $0x68] sm:$0xff] }
  0x17   : > { %144 = vst [vmem:[%s2161_s23 + $0x48] sm:$0xff] %v143_v9  ;;  %146 = vst [vmem:[%s2161_s23 + $0x50] sm:$0xff] %v145_v10  ;;  %v153_v14 = vld [vmem:[%s2153_s22 + $0x70] sm:$0xff]  ;;  %v155_v15 = vld [vmem:[%s2153_s22 + $0x78] sm:$0xff] }
  0x18   : > { %148 = vst [vmem:[%s2161_s23 + $0x58] sm:$0xff] %v147_v11  ;;  %150 = vst [vmem:[%s2161_s23 + $0x60] sm:$0xff] %v149_v12  ;;  %v157_v16 = vld [vmem:[%s2153_s22 + $0x100] sm:$0xff]  ;;  %v159_v17 = vld [vmem:[%s2153_s22 + $0x108] sm:$0xff] }
  0x19   : > { %152 = vst [vmem:[%s2161_s23 + $0x68] sm:$0xff] %v151_v13  ;;  %154 = vst [vmem:[%s2161_s23 + $0x70] sm:$0xff] %v153_v14  ;;  %v161_v18 = vld [vmem:[%s2153_s22 + $0x110] sm:$0xff]  ;;  %v163_v19 = vld [vmem:[%s2153_s22 + $0x118] sm:$0xff] }
  0x1a   : > { %156 = vst [vmem:[%s2161_s23 + $0x78] sm:$0xff] %v155_v15  ;;  %158 = vst [vmem:[%s2161_s23 + $0x80] sm:$0xff] %v157_v16  ;;  %v165_v20 = vld [vmem:[%s2153_s22 + $0x120] sm:$0xff]  ;;  %v167_v21 = vld [vmem:[%s2153_s22 + $0x128] sm:$0xff] }
  0x1b   : > { %160 = vst [vmem:[%s2161_s23 + $0x88] sm:$0xff] %v159_v17  ;;  %162 = vst [vmem:[%s2161_s23 + $0x90] sm:$0xff] %v161_v18  ;;  %v169_v22 = vld [vmem:[%s2153_s22 + $0x130] sm:$0xff]  ;;  %v171_v23 = vld [vmem:[%s2153_s22 + $0x138] sm:$0xff] }
  0x1c   : > { %164 = vst [vmem:[%s2161_s23 + $0x98] sm:$0xff] %v163_v19  ;;  %166 = vst [vmem:[%s2161_s23 + $0xa0] sm:$0xff] %v165_v20  ;;  %v173_v24 = vld [vmem:[%s2153_s22 + $0x140] sm:$0xff]  ;;  %v175_v25 = vld [vmem:[%s2153_s22 + $0x148] sm:$0xff] }
  0x1d   : > { %168 = vst [vmem:[%s2161_s23 + $0xa8] sm:$0xff] %v167_v21  ;;  %170 = vst [vmem:[%s2161_s23 + $0xb0] sm:$0xff] %v169_v22  ;;  %v177_v26 = vld [vmem:[%s2153_s22 + $0x150] sm:$0xff]  ;;  %v179_v27 = vld [vmem:[%s2153_s22 + $0x158] sm:$0xff] }
  0x1e   : > { %172 = vst [vmem:[%s2161_s23 + $0xb8] sm:$0xff] %v171_v23  ;;  %174 = vst [vmem:[%s2161_s23 + $0xc0] sm:$0xff] %v173_v24  ;;  %v181_v28 = vld [vmem:[%s2153_s22 + $0x160] sm:$0xff]  ;;  %v183_v29 = vld [vmem:[%s2153_s22 + $0x168] sm:$0xff] }
  0x1f   : > { %176 = vst [vmem:[%s2161_s23 + $0xc8] sm:$0xff] %v175_v25  ;;  %178 = vst [vmem:[%s2161_s23 + $0xd0] sm:$0xff] %v177_v26  ;;  %v185_v30 = vld [vmem:[%s2153_s22 + $0x170] sm:$0xff]  ;;  %v187_v31 = vld [vmem:[%s2153_s22 + $0x178] sm:$0xff] }
  0x20   : > { %180 = vst [vmem:[%s2161_s23 + $0xd8] sm:$0xff] %v179_v27  ;;  %182 = vst [vmem:[%s2161_s23 + $0xe0] sm:$0xff] %v181_v28  ;;  %v189_v32 = vld [vmem:[%s2153_s22 + $0x200] sm:$0xff]  ;;  %v191_v33 = vld [vmem:[%s2153_s22 + $0x208] sm:$0xff] }
  0x21   : > { %184 = vst [vmem:[%s2161_s23 + $0xe8] sm:$0xff] %v183_v29  ;;  %186 = vst [vmem:[%s2161_s23 + $0xf0] sm:$0xff] %v185_v30  ;;  %v193_v34 = vld [vmem:[%s2153_s22 + $0x210] sm:$0xff]  ;;  %v195_v35 = vld [vmem:[%s2153_s22 + $0x218] sm:$0xff] }
  0x22   : > { %188 = vst [vmem:[%s2161_s23 + $0xf8] sm:$0xff] %v187_v31  ;;  %190 = vst [vmem:[%s2161_s23 + $0x100] sm:$0xff] %v189_v32  ;;  %v197_v36 = vld [vmem:[%s2153_s22 + $0x220] sm:$0xff]  ;;  %v199_v37 = vld [vmem:[%s2153_s22 + $0x228] sm:$0xff] }
  0x23   : > { %192 = vst [vmem:[%s2161_s23 + $0x108] sm:$0xff] %v191_v33  ;;  %194 = vst [vmem:[%s2161_s23 + $0x110] sm:$0xff] %v193_v34  ;;  %v201_v38 = vld [vmem:[%s2153_s22 + $0x230] sm:$0xff]  ;;  %v203_v39 = vld [vmem:[%s2153_s22 + $0x238] sm:$0xff] }
  0x24   : > { %196 = vst [vmem:[%s2161_s23 + $0x118] sm:$0xff] %v195_v35  ;;  %198 = vst [vmem:[%s2161_s23 + $0x120] sm:$0xff] %v197_v36  ;;  %v205_v40 = vld [vmem:[%s2153_s22 + $0x240] sm:$0xff]  ;;  %v207_v41 = vld [vmem:[%s2153_s22 + $0x248] sm:$0xff] }
  0x25   : > { %200 = vst [vmem:[%s2161_s23 + $0x128] sm:$0xff] %v199_v37  ;;  %202 = vst [vmem:[%s2161_s23 + $0x130] sm:$0xff] %v201_v38  ;;  %v209_v42 = vld [vmem:[%s2153_s22 + $0x250] sm:$0xff]  ;;  %v211_v43 = vld [vmem:[%s2153_s22 + $0x258] sm:$0xff] }
  0x26   : > { %204 = vst [vmem:[%s2161_s23 + $0x138] sm:$0xff] %v203_v39  ;;  %206 = vst [vmem:[%s2161_s23 + $0x140] sm:$0xff] %v205_v40  ;;  %v213_v44 = vld [vmem:[%s2153_s22 + $0x260] sm:$0xff]  ;;  %v215_v45 = vld [vmem:[%s2153_s22 + $0x268] sm:$0xff] }
  0x27   : > { %208 = vst [vmem:[%s2161_s23 + $0x148] sm:$0xff] %v207_v41  ;;  %210 = vst [vmem:[%s2161_s23 + $0x150] sm:$0xff] %v209_v42  ;;  %v217_v46 = vld [vmem:[%s2153_s22 + $0x270] sm:$0xff]  ;;  %v219_v47 = vld [vmem:[%s2153_s22 + $0x278] sm:$0xff] }
  0x28   : > { %212 = vst [vmem:[%s2161_s23 + $0x158] sm:$0xff] %v211_v43  ;;  %214 = vst [vmem:[%s2161_s23 + $0x160] sm:$0xff] %v213_v44  ;;  %v221_v48 = vld [vmem:[%s2153_s22 + $0x300] sm:$0xff]  ;;  %v223_v49 = vld [vmem:[%s2153_s22 + $0x308] sm:$0xff] }
  0x29   : > { %216 = vst [vmem:[%s2161_s23 + $0x168] sm:$0xff] %v215_v45  ;;  %218 = vst [vmem:[%s2161_s23 + $0x170] sm:$0xff] %v217_v46  ;;  %v225_v50 = vld [vmem:[%s2153_s22 + $0x310] sm:$0xff]  ;;  %v227_v51 = vld [vmem:[%s2153_s22 + $0x318] sm:$0xff] }
  0x2a   : > { %220 = vst [vmem:[%s2161_s23 + $0x178] sm:$0xff] %v219_v47  ;;  %222 = vst [vmem:[%s2161_s23 + $0x180] sm:$0xff] %v221_v48  ;;  %v229_v52 = vld [vmem:[%s2153_s22 + $0x320] sm:$0xff]  ;;  %v231_v53 = vld [vmem:[%s2153_s22 + $0x328] sm:$0xff] }
  0x2b   : > { %224 = vst [vmem:[%s2161_s23 + $0x188] sm:$0xff] %v223_v49  ;;  %226 = vst [vmem:[%s2161_s23 + $0x190] sm:$0xff] %v225_v50  ;;  %v233_v54 = vld [vmem:[%s2153_s22 + $0x330] sm:$0xff]  ;;  %v235_v55 = vld [vmem:[%s2153_s22 + $0x338] sm:$0xff] }
  0x2c   : > { %228 = vst [vmem:[%s2161_s23 + $0x198] sm:$0xff] %v227_v51  ;;  %230 = vst [vmem:[%s2161_s23 + $0x1a0] sm:$0xff] %v229_v52  ;;  %v237_v56 = vld [vmem:[%s2153_s22 + $0x340] sm:$0xff]  ;;  %v239_v57 = vld [vmem:[%s2153_s22 + $0x348] sm:$0xff] }
  0x2d   : > { %232 = vst [vmem:[%s2161_s23 + $0x1a8] sm:$0xff] %v231_v53  ;;  %234 = vst [vmem:[%s2161_s23 + $0x1b0] sm:$0xff] %v233_v54  ;;  %v241_v58 = vld [vmem:[%s2153_s22 + $0x350] sm:$0xff]  ;;  %v243_v59 = vld [vmem:[%s2153_s22 + $0x358] sm:$0xff] }
  0x2e   : > { %236 = vst [vmem:[%s2161_s23 + $0x1b8] sm:$0xff] %v235_v55  ;;  %238 = vst [vmem:[%s2161_s23 + $0x1c0] sm:$0xff] %v237_v56  ;;  %v245_v60 = vld [vmem:[%s2153_s22 + $0x360] sm:$0xff]  ;;  %v247_v61 = vld [vmem:[%s2153_s22 + $0x368] sm:$0xff] }
  0x2f   : > { %240 = vst [vmem:[%s2161_s23 + $0x1c8] sm:$0xff] %v239_v57  ;;  %242 = vst [vmem:[%s2161_s23 + $0x1d0] sm:$0xff] %v241_v58  ;;  %v249_v62 = vld [vmem:[%s2153_s22 + $0x370] sm:$0xff]  ;;  %v251_v63 = vld [vmem:[%s2153_s22 + $0x378] sm:$0xff] }
  0x30   : > { %244 = vst [vmem:[%s2161_s23 + $0x1d8] sm:$0xff] %v243_v59  ;;  %246 = vst [vmem:[%s2161_s23 + $0x1e0] sm:$0xff] %v245_v60  ;;  %v253_v0 = vld [vmem:[%s2153_s22 + $0x400] sm:$0xff]  ;;  %v255_v1 = vld [vmem:[%s2153_s22 + $0x408] sm:$0xff] }
  0x31   : > { %248 = vst [vmem:[%s2161_s23 + $0x1e8] sm:$0xff] %v247_v61  ;;  %250 = vst [vmem:[%s2161_s23 + $0x1f0] sm:$0xff] %v249_v62  ;;  %v257_v2 = vld [vmem:[%s2153_s22 + $0x410] sm:$0xff]  ;;  %v259_v3 = vld [vmem:[%s2153_s22 + $0x418] sm:$0xff] }
  0x32   : > { %252 = vst [vmem:[%s2161_s23 + $0x1f8] sm:$0xff] %v251_v63  ;;  %254 = vst [vmem:[%s2161_s23 + $0x200] sm:$0xff] %v253_v0  ;;  %v261_v4 = vld [vmem:[%s2153_s22 + $0x420] sm:$0xff]  ;;  %v263_v5 = vld [vmem:[%s2153_s22 + $0x428] sm:$0xff] }
  0x33   : > { %256 = vst [vmem:[%s2161_s23 + $0x208] sm:$0xff] %v255_v1  ;;  %258 = vst [vmem:[%s2161_s23 + $0x210] sm:$0xff] %v257_v2  ;;  %v265_v6 = vld [vmem:[%s2153_s22 + $0x430] sm:$0xff]  ;;  %v267_v7 = vld [vmem:[%s2153_s22 + $0x438] sm:$0xff] }
  0x34   : > { %260 = vst [vmem:[%s2161_s23 + $0x218] sm:$0xff] %v259_v3  ;;  %262 = vst [vmem:[%s2161_s23 + $0x220] sm:$0xff] %v261_v4  ;;  %v269_v8 = vld [vmem:[%s2153_s22 + $0x440] sm:$0xff]  ;;  %v271_v9 = vld [vmem:[%s2153_s22 + $0x448] sm:$0xff] }
  0x35   : > { %264 = vst [vmem:[%s2161_s23 + $0x228] sm:$0xff] %v263_v5  ;;  %266 = vst [vmem:[%s2161_s23 + $0x230] sm:$0xff] %v265_v6  ;;  %v273_v10 = vld [vmem:[%s2153_s22 + $0x450] sm:$0xff]  ;;  %v275_v11 = vld [vmem:[%s2153_s22 + $0x458] sm:$0xff] }
  0x36   : > { %268 = vst [vmem:[%s2161_s23 + $0x238] sm:$0xff] %v267_v7  ;;  %270 = vst [vmem:[%s2161_s23 + $0x240] sm:$0xff] %v269_v8  ;;  %v277_v12 = vld [vmem:[%s2153_s22 + $0x460] sm:$0xff]  ;;  %v279_v13 = vld [vmem:[%s2153_s22 + $0x468] sm:$0xff] }
  0x37   : > { %272 = vst [vmem:[%s2161_s23 + $0x248] sm:$0xff] %v271_v9  ;;  %274 = vst [vmem:[%s2161_s23 + $0x250] sm:$0xff] %v273_v10  ;;  %v281_v14 = vld [vmem:[%s2153_s22 + $0x470] sm:$0xff]  ;;  %v283_v15 = vld [vmem:[%s2153_s22 + $0x478] sm:$0xff] }
  0x38   : > { %276 = vst [vmem:[%s2161_s23 + $0x258] sm:$0xff] %v275_v11  ;;  %278 = vst [vmem:[%s2161_s23 + $0x260] sm:$0xff] %v277_v12  ;;  %v285_v16 = vld [vmem:[%s2153_s22 + $0x500] sm:$0xff]  ;;  %v287_v17 = vld [vmem:[%s2153_s22 + $0x508] sm:$0xff] }
  0x39   : > { %280 = vst [vmem:[%s2161_s23 + $0x268] sm:$0xff] %v279_v13  ;;  %282 = vst [vmem:[%s2161_s23 + $0x270] sm:$0xff] %v281_v14  ;;  %v289_v18 = vld [vmem:[%s2153_s22 + $0x510] sm:$0xff]  ;;  %v291_v19 = vld [vmem:[%s2153_s22 + $0x518] sm:$0xff] }
  0x3a   : > { %284 = vst [vmem:[%s2161_s23 + $0x278] sm:$0xff] %v283_v15  ;;  %286 = vst [vmem:[%s2161_s23 + $0x280] sm:$0xff] %v285_v16  ;;  %v293_v20 = vld [vmem:[%s2153_s22 + $0x520] sm:$0xff]  ;;  %v295_v21 = vld [vmem:[%s2153_s22 + $0x528] sm:$0xff] }
  0x3b   : > { %288 = vst [vmem:[%s2161_s23 + $0x288] sm:$0xff] %v287_v17  ;;  %290 = vst [vmem:[%s2161_s23 + $0x290] sm:$0xff] %v289_v18  ;;  %v297_v22 = vld [vmem:[%s2153_s22 + $0x530] sm:$0xff]  ;;  %v299_v23 = vld [vmem:[%s2153_s22 + $0x538] sm:$0xff] }
  0x3c   : > { %292 = vst [vmem:[%s2161_s23 + $0x298] sm:$0xff] %v291_v19  ;;  %294 = vst [vmem:[%s2161_s23 + $0x2a0] sm:$0xff] %v293_v20  ;;  %v301_v24 = vld [vmem:[%s2153_s22 + $0x540] sm:$0xff]  ;;  %v303_v25 = vld [vmem:[%s2153_s22 + $0x548] sm:$0xff] }
  0x3d   : > { %296 = vst [vmem:[%s2161_s23 + $0x2a8] sm:$0xff] %v295_v21  ;;  %298 = vst [vmem:[%s2161_s23 + $0x2b0] sm:$0xff] %v297_v22  ;;  %v305_v26 = vld [vmem:[%s2153_s22 + $0x550] sm:$0xff]  ;;  %v307_v27 = vld [vmem:[%s2153_s22 + $0x558] sm:$0xff] }
  0x3e   : > { %300 = vst [vmem:[%s2161_s23 + $0x2b8] sm:$0xff] %v299_v23  ;;  %302 = vst [vmem:[%s2161_s23 + $0x2c0] sm:$0xff] %v301_v24  ;;  %v309_v28 = vld [vmem:[%s2153_s22 + $0x560] sm:$0xff]  ;;  %v311_v29 = vld [vmem:[%s2153_s22 + $0x568] sm:$0xff] }
  0x3f   : > { %304 = vst [vmem:[%s2161_s23 + $0x2c8] sm:$0xff] %v303_v25  ;;  %306 = vst [vmem:[%s2161_s23 + $0x2d0] sm:$0xff] %v305_v26  ;;  %v313_v30 = vld [vmem:[%s2153_s22 + $0x570] sm:$0xff]  ;;  %v315_v31 = vld [vmem:[%s2153_s22 + $0x578] sm:$0xff] }
  0x40   : > { %308 = vst [vmem:[%s2161_s23 + $0x2d8] sm:$0xff] %v307_v27  ;;  %310 = vst [vmem:[%s2161_s23 + $0x2e0] sm:$0xff] %v309_v28 }
  0x41   : > { %312 = vst [vmem:[%s2161_s23 + $0x2e8] sm:$0xff] %v311_v29  ;;  %314 = vst [vmem:[%s2161_s23 + $0x2f0] sm:$0xff] %v313_v30 }
  0x42   : > { %316 = vst [vmem:[%s2161_s23 + $0x2f8] sm:$0xff] %v315_v31 }
  0x43 PF: > { %p1902_p5 = scmp.ge.s32.totalorder %s2101_s11, 1  ;;  %p321_p6 = scmp.lt.s32.totalorder %s2101_s11, 3 }
  0x45   : > { %p322_p7 = pnand %p1902_p5, %p321_p6 }
  0x46   : > { %s328_s24 = sand.u32 (!%p322_p7), 1, %s2093_s9   ;;  %v2103_v32 = vmov (!%p322_p7), 0   ;;  %v2379_v3 = vld [vmem:[%s2536_s0] sm:$0xf] (!%p322_p7)  ;;  %vm934_vm0 = vcmask (!%p322_p7), 392192   ;;  %s1903_s29 = sshll.u32 (!%p322_p7), %s1896_s12, 5 }
  0x47   : > { %325 = sbr.rel (%p322_p7) target bundleno = 395 (0x18b), region = 47  ;;  %970 = vmatprep.mubr.bf16.mxu0 (!%p322_p7), %v2103_v32  ;;  %1011 = vmatprep.mubr.bf16.mxu1 (!%p322_p7), %v2103_v32  ;;  %p351_p8 = scmp.lt.s32.totalorder (!%p322_p7), %s1903_s29, 63 }
  0x48   : > { %s2053_s25 = smul.u32 (!%p322_p7), 768, %s328_s24 }
  0x4a   : > { %s2354_s26 = scalar_lea.vmem (!%p322_p7), [#allocation2], %s2053_s25 }
  0x4b   : > { %v358_v33 = vld [vmem:[%s2354_s26] sm:$0xff] (!%p322_p7)  ;;  %v359_v35 = vld [vmem:[%s2354_s26 + $0x8] sm:$0xff] (!%p322_p7)  ;;  %v360_v55 = vld [vmem:[%s2354_s26 + $0x10] sm:$0xff] (!%p322_p7) }
  0x4c   : > { %v374_v34 = vld [vmem:[%s2354_s26 + $0x80] sm:$0xff] (!%p322_p7)  ;;  %v375_v37 = vld [vmem:[%s2354_s26 + $0x88] sm:$0xff] (!%p322_p7)  ;;  %v376_v56 = vld [vmem:[%s2354_s26 + $0x90] sm:$0xff] (!%p322_p7) }
  0x4d   : > { %v1906_v36 = vcombine.high (!%p322_p7), %v358_v33, %v374_v34  ;;  %v1905_v38 = vcombine.low (!%p322_p7), %v358_v33, %v374_v34  ;;  %v390_v39 = vld [vmem:[%s2354_s26 + $0x100] sm:$0xff] (!%p322_p7)  ;;  %v1908_v41 = vcombine.high (!%p322_p7), %v359_v35, %v375_v37  ;;  %v1907_v42 = vcombine.low (!%p322_p7), %v359_v35, %v375_v37  ;;  %v391_v44 = vld [vmem:[%s2354_s26 + $0x108] sm:$0xff] (!%p322_p7)  ;;  %v361_v57 = vld [vmem:[%s2354_s26 + $0x18] sm:$0xff] (!%p322_p7) }
  0x4e   : > { %v406_v40 = vld [vmem:[%s2354_s26 + $0x180] sm:$0xff]  ;;  %v407_v45 = vld [vmem:[%s2354_s26 + $0x188] sm:$0xff]  ;;  %v377_v58 = vld [vmem:[%s2354_s26 + $0x98] sm:$0xff]  ;;  %v1910_v61 = vcombine.high %v360_v55, %v376_v56  ;;  %v1909_v4 = vcombine.low %v360_v55, %v376_v56  ;;  %s2543_s29 = smov (!%p351_p8, %s1903_s29), 63 }
  0x4f   : > { %v1938_v43 = vcombine.high %v390_v39, %v406_v40  ;;  %v422_v46 = vld [vmem:[%s2354_s26 + $0x200] sm:$0xff]  ;;  %938 = vmatprep.subr.bf16.mxu0 %v1906_v36  ;;  %v1940_v47 = vcombine.high %v391_v44, %v407_v45  ;;  %v423_v49 = vld [vmem:[%s2354_s26 + $0x208] sm:$0xff]  ;;  %979 = vmatprep.subr.bf16.mxu1 %v1908_v41  ;;  %v1937_v51 = vcombine.low %v390_v39, %v406_v40  ;;  %v392_v63 = vld [vmem:[%s2354_s26 + $0x110] sm:$0xff]  ;;  %s1904_s30 = sshll.u32 %s2543_s29, 2 }
  0x50   : > { %v438_v48 = vld [vmem:[%s2354_s26 + $0x280] sm:$0xff]  ;;  %v439_v50 = vld [vmem:[%s2354_s26 + $0x288] sm:$0xff]  ;;  %939 = vmatpush1.bf16.msra.mxu0 %v1905_v38  ;;  %980 = vmatpush1.bf16.msra.mxu1 %v1907_v42  ;;  %v1939_v52 = vcombine.low %v391_v44, %v407_v45  ;;  %v1912_v62 = vcombine.high %v361_v57, %v377_v58  ;;  %v408_v0 = vld [vmem:[%s2354_s26 + $0x190] sm:$0xff]  ;;  %v1911_v5 = vcombine.low %v361_v57, %v377_v58  ;;  %s2508_s5 = scalar_lea.vmem %s2538_s2, %s1904_s30 }
  0x51   : > { %940 = vmatprep.subr.bf16.mxu0 %v1938_v43  ;;  %v1970_v53 = vcombine.high %v422_v46, %v438_v48  ;;  %981 = vmatprep.subr.bf16.mxu1 %v1940_v47  ;;  %v1972_v54 = vcombine.high %v423_v49, %v439_v50  ;;  %v1969_v59 = vcombine.low %v422_v46, %v438_v48  ;;  %v393_v1 = vld [vmem:[%s2354_s26 + $0x118] sm:$0xff]  ;;  %v424_v8 = vld [vmem:[%s2354_s26 + $0x210] sm:$0xff]  ;;  %v362_v16 = vld [vmem:[%s2354_s26 + $0x20] sm:$0xff] }
  0x52   : > { %v1971_v60 = vcombine.low %v423_v49, %v439_v50  ;;  %v409_v2 = vld [vmem:[%s2354_s26 + $0x198] sm:$0xff]  ;;  %v1942_v6 = vcombine.high %v392_v63, %v408_v0  ;;  %v440_v9 = vld [vmem:[%s2354_s26 + $0x290] sm:$0xff]  ;;  %v1941_v12 = vcombine.low %v392_v63, %v408_v0  ;;  %v378_v17 = vld [vmem:[%s2354_s26 + $0xa0] sm:$0xff] }
  0x53   : > { %v1944_v7 = vcombine.high %v393_v1, %v409_v2  ;;  %v425_v10 = vld [vmem:[%s2354_s26 + $0x218] sm:$0xff]  ;;  %v1943_v13 = vcombine.low %v393_v1, %v409_v2  ;;  %v1974_v14 = vcombine.high %v424_v8, %v440_v9  ;;  %v363_v18 = vld [vmem:[%s2354_s26 + $0x28] sm:$0xff]  ;;  %v1973_v20 = vcombine.low %v424_v8, %v440_v9  ;;  %v394_v24 = vld [vmem:[%s2354_s26 + $0x120] sm:$0xff] }
  0x54   : > { %941 = vmatpush1.bf16.msra.mxu0 %v1937_v51  ;;  %982 = vmatpush1.bf16.msra.mxu1 %v1939_v52  ;;  %v441_v11 = vld [vmem:[%s2354_s26 + $0x298] sm:$0xff]  ;;  %v379_v19 = vld [vmem:[%s2354_s26 + $0xa8] sm:$0xff]  ;;  %v1914_v22 = vcombine.high %v362_v16, %v378_v17  ;;  %v410_v25 = vld [vmem:[%s2354_s26 + $0x1a0] sm:$0xff]  ;;  %v1913_v28 = vcombine.low %v362_v16, %v378_v17 }
  0x55   : > { %942 = vmatprep.subr.bf16.mxu0 %v1970_v53  ;;  %983 = vmatprep.subr.bf16.mxu1 %v1972_v54  ;;  %v1976_v15 = vcombine.high %v425_v10, %v441_v11  ;;  %v1975_v21 = vcombine.low %v425_v10, %v441_v11  ;;  %v1916_v23 = vcombine.high %v363_v18, %v379_v19  ;;  %v395_v26 = vld [vmem:[%s2354_s26 + $0x128] sm:$0xff]  ;;  %v426_v33 = vld [vmem:[%s2354_s26 + $0x220] sm:$0xff]  ;;  %v364_v41 = vld [vmem:[%s2354_s26 + $0x30] sm:$0xff] }
  0x56   : > { %v411_v27 = vld [vmem:[%s2354_s26 + $0x1a8] sm:$0xff]  ;;  %v1915_v29 = vcombine.low %v363_v18, %v379_v19  ;;  %v1946_v30 = vcombine.high %v394_v24, %v410_v25  ;;  %v442_v34 = vld [vmem:[%s2354_s26 + $0x2a0] sm:$0xff]  ;;  %v1945_v37 = vcombine.low %v394_v24, %v410_v25  ;;  %v380_v42 = vld [vmem:[%s2354_s26 + $0xb0] sm:$0xff] }
  0x57   : > { %v1948_v31 = vcombine.high %v395_v26, %v411_v27  ;;  %v427_v35 = vld [vmem:[%s2354_s26 + $0x228] sm:$0xff]  ;;  %v1947_v38 = vcombine.low %v395_v26, %v411_v27  ;;  %v1978_v39 = vcombine.high %v426_v33, %v442_v34  ;;  %v365_v43 = vld [vmem:[%s2354_s26 + $0x38] sm:$0xff]  ;;  %v1977_v45 = vcombine.low %v426_v33, %v442_v34  ;;  %v396_v49 = vld [vmem:[%s2354_s26 + $0x130] sm:$0xff] }
  0x58   : > { %943 = vmatpush1.bf16.msra.mxu0 %v1969_v59  ;;  %984 = vmatpush1.bf16.msra.mxu1 %v1971_v60  ;;  %v443_v36 = vld [vmem:[%s2354_s26 + $0x2a8] sm:$0xff]  ;;  %v381_v44 = vld [vmem:[%s2354_s26 + $0xb8] sm:$0xff]  ;;  %v1918_v47 = vcombine.high %v364_v41, %v380_v42  ;;  %v412_v50 = vld [vmem:[%s2354_s26 + $0x1b0] sm:$0xff]  ;;  %v1917_v53 = vcombine.low %v364_v41, %v380_v42 }
  0x59   : > { %1020 = vmatprep.subr.bf16.mxu0 %v1910_v61  ;;  %1061 = vmatprep.subr.bf16.mxu1 %v1912_v62  ;;  %v1980_v40 = vcombine.high %v427_v35, %v443_v36  ;;  %v1979_v46 = vcombine.low %v427_v35, %v443_v36  ;;  %v1920_v48 = vcombine.high %v365_v43, %v381_v44  ;;  %v397_v51 = vld [vmem:[%s2354_s26 + $0x138] sm:$0xff]  ;;  %v428_v57 = vld [vmem:[%s2354_s26 + $0x230] sm:$0xff]  ;;  %v366_v1 = vld [vmem:[%s2354_s26 + $0x40] sm:$0xff] }
  0x5a   : > { %v413_v52 = vld [vmem:[%s2354_s26 + $0x1b8] sm:$0xff]  ;;  %v1919_v54 = vcombine.low %v365_v43, %v381_v44  ;;  %v1950_v55 = vcombine.high %v396_v49, %v412_v50  ;;  %v444_v58 = vld [vmem:[%s2354_s26 + $0x2b0] sm:$0xff]  ;;  %v1949_v61 = vcombine.low %v396_v49, %v412_v50  ;;  %v382_v2 = vld [vmem:[%s2354_s26 + $0xc0] sm:$0xff] }
  0x5b   : > { %2001 = vmatmul.mubr.msk.bf16.vlgmr.msra.gmra.mrb[0].mxu0 %vm934_vm0, %v2379_v3  ;;  %2002 = vmatmul.mubr.msk.bf16.vlgmr.msra.gmra.mrb[0].mxu1 %vm934_vm0, %v2379_v3  ;;  %v1952_v56 = vcombine.high %v397_v51, %v413_v52  ;;  %v429_v59 = vld [vmem:[%s2354_s26 + $0x238] sm:$0xff]  ;;  %v1951_v62 = vcombine.low %v397_v51, %v413_v52  ;;  %v1982_v63 = vcombine.high %v428_v57, %v444_v58  ;;  %v398_v10 = vld [vmem:[%s2354_s26 + $0x140] sm:$0xff]  ;;  %v368_v26 = vld [vmem:[%s2354_s26 + $0x50] sm:$0xff] }
  0x5c   : > { %1021 = vmatpush1.bf16.msra.mxu0 %v1909_v4  ;;  %1062 = vmatpush1.bf16.msra.mxu1 %v1911_v5  ;;  %v445_v60 = vld [vmem:[%s2354_s26 + $0x2b8] sm:$0xff]  ;;  %v367_v4 = vld [vmem:[%s2354_s26 + $0x48] sm:$0xff]  ;;  %v1922_v8 = vcombine.high %v366_v1, %v382_v2  ;;  %v414_v11 = vld [vmem:[%s2354_s26 + $0x1c0] sm:$0xff] }
  0x5d   : > { %1022 = vmatprep.subr.bf16.mxu0 %v1942_v6  ;;  %1063 = vmatprep.subr.bf16.mxu1 %v1944_v7  ;;  %v1984_v0 = vcombine.high %v429_v59, %v445_v60  ;;  %v383_v5 = vld [vmem:[%s2354_s26 + $0xc8] sm:$0xff]  ;;  %v1981_v6 = vcombine.low %v428_v57, %v444_v58  ;;  %v1983_v7 = vcombine.low %v429_v59, %v445_v60  ;;  %v430_v18 = vld [vmem:[%s2354_s26 + $0x240] sm:$0xff]  ;;  %v384_v27 = vld [vmem:[%s2354_s26 + $0xd0] sm:$0xff] }
  0x5e   : > { %1052 = vmatprep.mubr.bf16.mxu0 %v2103_v32  ;;  %1093 = vmatprep.mubr.bf16.mxu1 %v2103_v32  ;;  %v1924_v9 = vcombine.high %v367_v4, %v383_v5  ;;  %v1954_v16 = vcombine.high %v398_v10, %v414_v11  ;;  %v446_v19 = vld [vmem:[%s2354_s26 + $0x2c0] sm:$0xff]  ;;  %v1926_v33 = vcombine.high %v368_v26, %v384_v27  ;;  %v400_v35 = vld [vmem:[%s2354_s26 + $0x150] sm:$0xff] }
  0x5f   : > { %v1986_v24 = vcombine.high %v430_v18, %v446_v19  ;;  %v416_v36 = vld [vmem:[%s2354_s26 + $0x1d0] sm:$0xff]  ;;  %v370_v51 = vld [vmem:[%s2354_s26 + $0x60] sm:$0xff] }
  0x60   : > { %1023 = vmatpush1.bf16.msra.mxu0 %v1941_v12  ;;  %1064 = vmatpush1.bf16.msra.mxu1 %v1943_v13  ;;  %v399_v12 = vld [vmem:[%s2354_s26 + $0x148] sm:$0xff]  ;;  %v1958_v41 = vcombine.high %v400_v35, %v416_v36  ;;  %v432_v43 = vld [vmem:[%s2354_s26 + $0x250] sm:$0xff]  ;;  %v386_v52 = vld [vmem:[%s2354_s26 + $0xe0] sm:$0xff] }
  0x61   : > { %1024 = vmatprep.subr.bf16.mxu0 %v1974_v14  ;;  %1065 = vmatprep.subr.bf16.mxu1 %v1976_v15  ;;  %v415_v13 = vld [vmem:[%s2354_s26 + $0x1c8] sm:$0xff]  ;;  %v1921_v14 = vcombine.low %v366_v1, %v382_v2  ;;  %v1923_v15 = vcombine.low %v367_v4, %v383_v5  ;;  %v448_v44 = vld [vmem:[%s2354_s26 + $0x2d0] sm:$0xff]  ;;  %v1930_v57 = vcombine.high %v370_v51, %v386_v52  ;;  %v402_v59 = vld [vmem:[%s2354_s26 + $0x160] sm:$0xff] }
  0x62   : > { %v1956_v17 = vcombine.high %v399_v12, %v415_v13  ;;  %v1990_v49 = vcombine.high %v432_v43, %v448_v44  ;;  %v418_v60 = vld [vmem:[%s2354_s26 + $0x1e0] sm:$0xff] }
  0x63   : > { %v1962_v1 = vcombine.high %v402_v59, %v418_v60  ;;  %v434_v4 = vld [vmem:[%s2354_s26 + $0x260] sm:$0xff] }
  0x64   : > { %1025 = vmatpush1.bf16.msra.mxu0 %v1973_v20  ;;  %1066 = vmatpush1.bf16.msra.mxu1 %v1975_v21  ;;  %v431_v20 = vld [vmem:[%s2354_s26 + $0x248] sm:$0xff]  ;;  %v450_v5 = vld [vmem:[%s2354_s26 + $0x2e0] sm:$0xff] }
  0x65   : > { %1102 = vmatprep.subr.bf16.mxu0 %v1914_v22  ;;  %1143 = vmatprep.subr.bf16.mxu1 %v1916_v23  ;;  %v447_v21 = vld [vmem:[%s2354_s26 + $0x2c8] sm:$0xff]  ;;  %v1953_v22 = vcombine.low %v398_v10, %v414_v11  ;;  %v1955_v23 = vcombine.low %v399_v12, %v415_v13  ;;  %v1994_v10 = vcombine.high %v434_v4, %v450_v5  ;;  %v372_v12 = vld [vmem:[%s2354_s26 + $0x70] sm:$0xff] }
  0x66   : > { %v1988_v25 = vcombine.high %v431_v20, %v447_v21  ;;  %v388_v13 = vld [vmem:[%s2354_s26 + $0xf0] sm:$0xff] }
  0x67   : > { %2003 = vmatmul.mubr.msk.bf16.vlgmr.msra.gmra.mrb[4].mxu0 %vm934_vm0, %v2379_v3  ;;  %2004 = vmatmul.mubr.msk.bf16.vlgmr.msra.gmra.mrb[4].mxu1 %vm934_vm0, %v2379_v3 }
  0x68   : > { %1103 = vmatpush1.bf16.msra.mxu0 %v1913_v28  ;;  %1144 = vmatpush1.bf16.msra.mxu1 %v1915_v29  ;;  %v369_v28 = vld [vmem:[%s2354_s26 + $0x58] sm:$0xff] }
  0x69   : > { %1104 = vmatprep.subr.bf16.mxu0 %v1946_v30  ;;  %1145 = vmatprep.subr.bf16.mxu1 %v1948_v31  ;;  %v385_v29 = vld [vmem:[%s2354_s26 + $0xd8] sm:$0xff]  ;;  %v1985_v30 = vcombine.low %v430_v18, %v446_v19  ;;  %v1987_v31 = vcombine.low %v431_v20, %v447_v21  ;;  %v1934_v18 = vcombine.high %v372_v12, %v388_v13  ;;  %v404_v20 = vld [vmem:[%s2354_s26 + $0x170] sm:$0xff] }
  0x6a   : > { %1134 = vmatprep.mubr.bf16.mxu0 %v2103_v32  ;;  %1175 = vmatprep.mubr.bf16.mxu1 %v2103_v32  ;;  %v1928_v34 = vcombine.high %v369_v28, %v385_v29  ;;  %v420_v21 = vld [vmem:[%s2354_s26 + $0x1f0] sm:$0xff] }
  0x6c   : > { %1105 = vmatpush1.bf16.msra.mxu0 %v1945_v37  ;;  %1146 = vmatpush1.bf16.msra.mxu1 %v1947_v38  ;;  %v401_v37 = vld [vmem:[%s2354_s26 + $0x158] sm:$0xff] }
  0x6d   : > { %1106 = vmatprep.subr.bf16.mxu0 %v1978_v39  ;;  %1147 = vmatprep.subr.bf16.mxu1 %v1980_v40  ;;  %v417_v38 = vld [vmem:[%s2354_s26 + $0x1d8] sm:$0xff]  ;;  %v1925_v39 = vcombine.low %v368_v26, %v384_v27  ;;  %v1927_v40 = vcombine.low %v369_v28, %v385_v29  ;;  %v1966_v26 = vcombine.high %v404_v20, %v420_v21  ;;  %v436_v28 = vld [vmem:[%s2354_s26 + $0x270] sm:$0xff] }
  0x6e   : > { %v1960_v42 = vcombine.high %v401_v37, %v417_v38  ;;  %v452_v29 = vld [vmem:[%s2354_s26 + $0x2f0] sm:$0xff] }
  0x70   : > { %1107 = vmatpush1.bf16.msra.mxu0 %v1977_v45  ;;  %1148 = vmatpush1.bf16.msra.mxu1 %v1979_v46  ;;  %v433_v45 = vld [vmem:[%s2354_s26 + $0x258] sm:$0xff] }
  0x71   : > { %1184 = vmatprep.subr.bf16.mxu0 %v1918_v47  ;;  %1225 = vmatprep.subr.bf16.mxu1 %v1920_v48  ;;  %v449_v46 = vld [vmem:[%s2354_s26 + $0x2d8] sm:$0xff]  ;;  %v1957_v47 = vcombine.low %v400_v35, %v416_v36  ;;  %v1959_v48 = vcombine.low %v401_v37, %v417_v38  ;;  %v1998_v35 = vcombine.high %v436_v28, %v452_v29 }
  0x72   : > { %v1992_v50 = vcombine.high %v433_v45, %v449_v46  ;;  %v1997_v37 = vcombine.low %v436_v28, %v452_v29 }
  0x73   : > { %2005 = vmatmul.mubr.msk.bf16.vlgmr.msra.gmra.mrb[8].mxu0 %vm934_vm0, %v2379_v3  ;;  %2006 = vmatmul.mubr.msk.bf16.vlgmr.msra.gmra.mrb[8].mxu1 %vm934_vm0, %v2379_v3 }
  0x74   : > { %1185 = vmatpush1.bf16.msra.mxu0 %v1917_v53  ;;  %1226 = vmatpush1.bf16.msra.mxu1 %v1919_v54  ;;  %v371_v53 = vld [vmem:[%s2354_s26 + $0x68] sm:$0xff] }
  0x75   : > { %1186 = vmatprep.subr.bf16.mxu0 %v1950_v55  ;;  %1227 = vmatprep.subr.bf16.mxu1 %v1952_v56  ;;  %v387_v54 = vld [vmem:[%s2354_s26 + $0xe8] sm:$0xff]  ;;  %v1989_v55 = vcombine.low %v432_v43, %v448_v44  ;;  %v1991_v56 = vcombine.low %v433_v45, %v449_v46 }
  0x76   : > { %1216 = vmatprep.mubr.bf16.mxu0 %v2103_v32  ;;  %1257 = vmatprep.mubr.bf16.mxu1 %v2103_v32  ;;  %v1932_v58 = vcombine.high %v371_v53, %v387_v54 }
  0x78   : > { %1187 = vmatpush1.bf16.msra.mxu0 %v1949_v61  ;;  %1228 = vmatpush1.bf16.msra.mxu1 %v1951_v62  ;;  %v403_v61 = vld [vmem:[%s2354_s26 + $0x168] sm:$0xff] }
  0x79   : > { %1188 = vmatprep.subr.bf16.mxu0 %v1982_v63  ;;  %1229 = vmatprep.subr.bf16.mxu1 %v1984_v0  ;;  %v419_v62 = vld [vmem:[%s2354_s26 + $0x1e8] sm:$0xff]  ;;  %v1929_v63 = vcombine.low %v370_v51, %v386_v52  ;;  %v1931_v0 = vcombine.low %v371_v53, %v387_v54 }
  0x7a   : > { %v1964_v2 = vcombine.high %v403_v61, %v419_v62 }
  0x7c   : > { %1189 = vmatpush1.bf16.msra.mxu0 %v1981_v6  ;;  %1230 = vmatpush1.bf16.msra.mxu1 %v1983_v7  ;;  %v435_v6 = vld [vmem:[%s2354_s26 + $0x268] sm:$0xff] }
  0x7d   : > { %1266 = vmatprep.subr.bf16.mxu0 %v1922_v8  ;;  %1307 = vmatprep.subr.bf16.mxu1 %v1924_v9  ;;  %v451_v7 = vld [vmem:[%s2354_s26 + $0x2e8] sm:$0xff]  ;;  %v1961_v8 = vcombine.low %v402_v59, %v418_v60  ;;  %v1963_v9 = vcombine.low %v403_v61, %v419_v62 }
  0x7e   : > { %v1996_v11 = vcombine.high %v435_v6, %v451_v7 }
  0x7f   : > { %2007 = vmatmul.mubr.msk.bf16.vlgmr.msra.gmra.mrb[12].mxu0 %vm934_vm0, %v2379_v3  ;;  %2008 = vmatmul.mubr.msk.bf16.vlgmr.msra.gmra.mrb[12].mxu1 %vm934_vm0, %v2379_v3 }
  0x80   : > { %1267 = vmatpush1.bf16.msra.mxu0 %v1921_v14  ;;  %1308 = vmatpush1.bf16.msra.mxu1 %v1923_v15  ;;  %v373_v14 = vld [vmem:[%s2354_s26 + $0x78] sm:$0xff] }
  0x81   : > { %1268 = vmatprep.subr.bf16.mxu0 %v1954_v16  ;;  %1309 = vmatprep.subr.bf16.mxu1 %v1956_v17  ;;  %v389_v15 = vld [vmem:[%s2354_s26 + $0xf8] sm:$0xff]  ;;  %v1993_v16 = vcombine.low %v434_v4, %v450_v5  ;;  %v1995_v17 = vcombine.low %v435_v6, %v451_v7 }
  0x82   : > { %1298 = vmatprep.mubr.bf16.mxu0 %v2103_v32  ;;  %1339 = vmatprep.mubr.bf16.mxu1 %v2103_v32  ;;  %v1936_v19 = vcombine.high %v373_v14, %v389_v15 }
  0x84   : > { %1269 = vmatpush1.bf16.msra.mxu0 %v1953_v22  ;;  %1310 = vmatpush1.bf16.msra.mxu1 %v1955_v23  ;;  %v405_v22 = vld [vmem:[%s2354_s26 + $0x178] sm:$0xff] }
  0x85   : > { %1270 = vmatprep.subr.bf16.mxu0 %v1986_v24  ;;  %1311 = vmatprep.subr.bf16.mxu1 %v1988_v25  ;;  %v421_v23 = vld [vmem:[%s2354_s26 + $0x1f8] sm:$0xff]  ;;  %v1933_v24 = vcombine.low %v372_v12, %v388_v13  ;;  %v1935_v25 = vcombine.low %v373_v14, %v389_v15 }
  0x86   : > { %v1968_v27 = vcombine.high %v405_v22, %v421_v23 }
  0x88   : > { %1271 = vmatpush1.bf16.msra.mxu0 %v1985_v30  ;;  %1312 = vmatpush1.bf16.msra.mxu1 %v1987_v31  ;;  %v437_v30 = vld [vmem:[%s2354_s26 + $0x278] sm:$0xff] }
  0x89   : > { %1348 = vmatprep.subr.bf16.mxu0 %v1926_v33  ;;  %1389 = vmatprep.subr.bf16.mxu1 %v1928_v34  ;;  %v453_v31 = vld [vmem:[%s2354_s26 + $0x2f8] sm:$0xff]  ;;  %v1965_v33 = vcombine.low %v404_v20, %v420_v21  ;;  %v1967_v34 = vcombine.low %v405_v22, %v421_v23 }
  0x8a   : > { %v2000_v36 = vcombine.high %v437_v30, %v453_v31  ;;  %v1999_v38 = vcombine.low %v437_v30, %v453_v31 }
  0x8b   : > { %2009 = vmatmul.mubr.msk.bf16.vlgmr.msra.gmra.mrb[16].mxu0 %vm934_vm0, %v2379_v3  ;;  %2010 = vmatmul.mubr.msk.bf16.vlgmr.msra.gmra.mrb[16].mxu1 %vm934_vm0, %v2379_v3 }
  0x8c   : > { %1349 = vmatpush1.bf16.msra.mxu0 %v1925_v39  ;;  %1390 = vmatpush1.bf16.msra.mxu1 %v1927_v40 }
  0x8d   : > { %1350 = vmatprep.subr.bf16.mxu0 %v1958_v41  ;;  %1391 = vmatprep.subr.bf16.mxu1 %v1960_v42 }
  0x8e   : > { %1380 = vmatprep.mubr.bf16.mxu0 %v2103_v32  ;;  %1421 = vmatprep.mubr.bf16.mxu1 %v2103_v32 }
  0x90   : > { %1351 = vmatpush1.bf16.msra.mxu0 %v1957_v47  ;;  %1392 = vmatpush1.bf16.msra.mxu1 %v1959_v48 }
  0x91   : > { %1352 = vmatprep.subr.bf16.mxu0 %v1990_v49  ;;  %1393 = vmatprep.subr.bf16.mxu1 %v1992_v50 }
  0x94   : > { %1353 = vmatpush1.bf16.msra.mxu0 %v1989_v55  ;;  %1394 = vmatpush1.bf16.msra.mxu1 %v1991_v56 }
  0x95   : > { %1430 = vmatprep.subr.bf16.mxu0 %v1930_v57  ;;  %1471 = vmatprep.subr.bf16.mxu1 %v1932_v58 }
  0x97   : > { %2011 = vmatmul.mubr.msk.bf16.vlgmr.msra.gmra.mrb[20].mxu0 %vm934_vm0, %v2379_v3  ;;  %2012 = vmatmul.mubr.msk.bf16.vlgmr.msra.gmra.mrb[20].mxu1 %vm934_vm0, %v2379_v3 }
  0x98   : > { %1431 = vmatpush1.bf16.msra.mxu0 %v1929_v63  ;;  %1472 = vmatpush1.bf16.msra.mxu1 %v1931_v0 }
  0x99   : > { %1432 = vmatprep.subr.bf16.mxu0 %v1962_v1  ;;  %1473 = vmatprep.subr.bf16.mxu1 %v1964_v2 }
  0x9a   : > { %1462 = vmatprep.mubr.bf16.mxu0 %v2103_v32  ;;  %1503 = vmatprep.mubr.bf16.mxu1 %v2103_v32 }
  0x9c   : > { %1433 = vmatpush1.bf16.msra.mxu0 %v1961_v8  ;;  %1474 = vmatpush1.bf16.msra.mxu1 %v1963_v9 }
  0x9d   : > { %1434 = vmatprep.subr.bf16.mxu0 %v1994_v10  ;;  %1475 = vmatprep.subr.bf16.mxu1 %v1996_v11 }
  0xa0   : > { %1435 = vmatpush1.bf16.msra.mxu0 %v1993_v16  ;;  %1476 = vmatpush1.bf16.msra.mxu1 %v1995_v17 }
  0xa1   : > { %1512 = vmatprep.subr.bf16.mxu0 %v1934_v18  ;;  %1553 = vmatprep.subr.bf16.mxu1 %v1936_v19 }
  0xa3   : > { %2013 = vmatmul.mubr.msk.bf16.vlgmr.msra.gmra.mrb[24].mxu0 %vm934_vm0, %v2379_v3  ;;  %2014 = vmatmul.mubr.msk.bf16.vlgmr.msra.gmra.mrb[24].mxu1 %vm934_vm0, %v2379_v3 }
  0xa4   : > { %1513 = vmatpush1.bf16.msra.mxu0 %v1933_v24  ;;  %1554 = vmatpush1.bf16.msra.mxu1 %v1935_v25 }
  0xa5   : > { %1514 = vmatprep.subr.bf16.mxu0 %v1966_v26  ;;  %1555 = vmatprep.subr.bf16.mxu1 %v1968_v27 }
  0xa6   : > { %1544 = vmatprep.mubr.bf16.mxu0 %v2103_v32  ;;  %1585 = vmatprep.mubr.bf16.mxu1 %v2103_v32 }
  0xa8   : > { %1515 = vmatpush1.bf16.msra.mxu0 %v1965_v33  ;;  %1556 = vmatpush1.bf16.msra.mxu1 %v1967_v34 }
  0xa9   : > { %1516 = vmatprep.subr.bf16.mxu0 %v1998_v35  ;;  %1557 = vmatprep.subr.bf16.mxu1 %v2000_v36 }
  0xac   : > { %1517 = vmatpush1.bf16.msra.mxu0 %v1997_v37  ;;  %1558 = vmatpush1.bf16.msra.mxu1 %v1999_v38 }
  0xaf   : > { %2015 = vmatmul.mubr.msk.bf16.vlgmr.msra.gmra.mrb[28].mxu0 %vm934_vm0, %v2379_v3  ;;  %2016 = vmatmul.mubr.msk.bf16.vlgmr.msra.gmra.mrb[28].mxu1 %vm934_vm0, %v2379_v3 }
 0x12e   : > { %v972_v39 = vpop.f32.mrb[0].mxu0  ;;  %v1013_v40 = vpop.f32.mrb[0].mxu1 }
 0x12f   : > { %vm1594_vm1 = vcmp.gt.f32.partialorder %v972_v39, 0.0  ;;  %v1626_v32 = vmul.f32 0.2, %v972_v39  ;;  %v974_v41 = vpop.f32.mrb[1].mxu0  ;;  %vm1596_vm2 = vcmp.gt.f32.partialorder %v1013_v40, 0.0  ;;  %v1015_v45 = vpop.f32.mrb[1].mxu1 }
 0x130   : > { %v1628_v42 = vmul.f32 0.2, %v1013_v40  ;;  %vm1595_vm3 = vcmp.gt.f32.partialorder %v974_v41, 0.0  ;;  %v1627_v43 = vmul.f32 0.2, %v974_v41  ;;  %v976_v46 = vpop.f32.mrb[2].mxu0 }
 0x131   : > { %v1658_v44 = vsel %vm1594_vm1, %v972_v39, %v1626_v32  ;;  %vm1597_vm4 = vcmp.gt.f32.partialorder %v1015_v45, 0.0  ;;  %v1629_v48 = vmul.f32 0.2, %v1015_v45  ;;  %v1017_v49 = vpop.f32.mrb[2].mxu1  ;;  %v977_v50 = vpop.f32.mrb[3].mxu0 }
 0x132   : > { %v1660_v47 = vsel %vm1596_vm2, %v1013_v40, %v1628_v42  ;;  %v1659_v3 = vsel %vm1595_vm3, %v974_v41, %v1627_v43  ;;  %v1018_v52 = vpop.f32.mrb[3].mxu1 }
 0x133   : > { %v2036_v51 = vpack.c.bf16 %v1659_v3, %v1658_v44  ;;  %v1661_v53 = vsel %vm1597_vm4, %v1015_v45, %v1629_v48 }
 0x134   : > { %v2037_v54 = vpack.c.bf16 %v1661_v53, %v1660_v47 }
 0x135   : > { %1818 = vst [vmem:[%s2508_s5] sm:$0xff] %v2036_v51 }
 0x136   : > { %1819 = vst [vmem:[%s2508_s5 + $0x8] sm:$0xff] %v2037_v54 }
 0x13a   : > { %v1054_v55 = vpop.f32.mrb[4].mxu0  ;;  %v1095_v57 = vpop.f32.mrb[4].mxu1 }
 0x13b   : > { %vm1598_vm5 = vcmp.gt.f32.partialorder %v1054_v55, 0.0  ;;  %v1630_v56 = vmul.f32 0.2, %v1054_v55  ;;  %v1056_v58 = vpop.f32.mrb[5].mxu0  ;;  %vm1600_vm6 = vcmp.gt.f32.partialorder %v1095_v57, 0.0  ;;  %v1097_v62 = vpop.f32.mrb[5].mxu1 }
 0x13c   : > { %v1632_v59 = vmul.f32 0.2, %v1095_v57  ;;  %vm1599_vm7 = vcmp.gt.f32.partialorder %v1056_v58, 0.0  ;;  %v1631_v60 = vmul.f32 0.2, %v1056_v58  ;;  %v1058_v63 = vpop.f32.mrb[6].mxu0 }
 0x13d   : > { %v1662_v61 = vsel %vm1598_vm5, %v1054_v55, %v1630_v56  ;;  %vm1601_vm8 = vcmp.gt.f32.partialorder %v1097_v62, 0.0  ;;  %v1633_v2 = vmul.f32 0.2, %v1097_v62  ;;  %v1099_v4 = vpop.f32.mrb[6].mxu1  ;;  %v1059_v5 = vpop.f32.mrb[7].mxu0 }
 0x13e   : > { %v1664_v0 = vsel %vm1600_vm6, %v1095_v57, %v1632_v59  ;;  %v1663_v1 = vsel %vm1599_vm7, %v1056_v58, %v1631_v60  ;;  %v1100_v7 = vpop.f32.mrb[7].mxu1 }
 0x13f   : > { %v2038_v6 = vpack.c.bf16 %v1663_v1, %v1662_v61  ;;  %v1665_v8 = vsel %vm1601_vm8, %v1097_v62, %v1633_v2 }
 0x140   : > { %v2039_v9 = vpack.c.bf16 %v1665_v8, %v1664_v0 }
 0x141   : > { %1820 = vst [vmem:[%s2508_s5 + $0x10] sm:$0xff] %v2038_v6 }
 0x142   : > { %1821 = vst [vmem:[%s2508_s5 + $0x18] sm:$0xff] %v2039_v9 }
 0x146   : > { %v1136_v10 = vpop.f32.mrb[8].mxu0  ;;  %v1177_v12 = vpop.f32.mrb[8].mxu1 }
 0x147   : > { %vm1602_vm9 = vcmp.gt.f32.partialorder %v1136_v10, 0.0  ;;  %v1634_v11 = vmul.f32 0.2, %v1136_v10  ;;  %v1138_v13 = vpop.f32.mrb[9].mxu0  ;;  %vm1604_vm10 = vcmp.gt.f32.partialorder %v1177_v12, 0.0  ;;  %v1179_v17 = vpop.f32.mrb[9].mxu1 }
 0x148   : > { %v1636_v14 = vmul.f32 0.2, %v1177_v12  ;;  %vm1603_vm11 = vcmp.gt.f32.partialorder %v1138_v13, 0.0  ;;  %v1635_v15 = vmul.f32 0.2, %v1138_v13  ;;  %v1140_v18 = vpop.f32.mrb[10].mxu0 }
 0x149   : > { %v1666_v16 = vsel %vm1602_vm9, %v1136_v10, %v1634_v11  ;;  %vm1605_vm12 = vcmp.gt.f32.partialorder %v1179_v17, 0.0  ;;  %v1637_v21 = vmul.f32 0.2, %v1179_v17  ;;  %v1181_v22 = vpop.f32.mrb[10].mxu1  ;;  %v1141_v23 = vpop.f32.mrb[11].mxu0 }
 0x14a   : > { %v1668_v19 = vsel %vm1604_vm10, %v1177_v12, %v1636_v14  ;;  %v1667_v20 = vsel %vm1603_vm11, %v1138_v13, %v1635_v15  ;;  %v1182_v25 = vpop.f32.mrb[11].mxu1 }
 0x14b   : > { %v2040_v24 = vpack.c.bf16 %v1667_v20, %v1666_v16  ;;  %v1669_v26 = vsel %vm1605_vm12, %v1179_v17, %v1637_v21 }
 0x14c   : > { %v2041_v27 = vpack.c.bf16 %v1669_v26, %v1668_v19 }
 0x14d   : > { %1822 = vst [vmem:[%s2508_s5 + $0x20] sm:$0xff] %v2040_v24 }
 0x14e   : > { %1823 = vst [vmem:[%s2508_s5 + $0x28] sm:$0xff] %v2041_v27 }
 0x152   : > { %v1218_v28 = vpop.f32.mrb[12].mxu0  ;;  %v1259_v30 = vpop.f32.mrb[12].mxu1 }
 0x153   : > { %vm1606_vm13 = vcmp.gt.f32.partialorder %v1218_v28, 0.0  ;;  %v1638_v29 = vmul.f32 0.2, %v1218_v28  ;;  %v1220_v31 = vpop.f32.mrb[13].mxu0  ;;  %vm1608_vm14 = vcmp.gt.f32.partialorder %v1259_v30, 0.0  ;;  %v1261_v36 = vpop.f32.mrb[13].mxu1 }
 0x154   : > { %v1640_v33 = vmul.f32 0.2, %v1259_v30  ;;  %vm1607_vm15 = vcmp.gt.f32.partialorder %v1220_v31, 0.0  ;;  %v1639_v34 = vmul.f32 0.2, %v1220_v31  ;;  %v1222_v37 = vpop.f32.mrb[14].mxu0 }
 0x155   : > { %v1670_v35 = vsel %vm1606_vm13, %v1218_v28, %v1638_v29  ;;  %vm1609_vm0 = vcmp.gt.f32.partialorder %v1261_v36, 0.0  ;;  %v1641_v32 = vmul.f32 0.2, %v1261_v36  ;;  %v1263_v40 = vpop.f32.mrb[14].mxu1  ;;  %v1223_v41 = vpop.f32.mrb[15].mxu0 }
 0x156   : > { %v1672_v38 = vsel %vm1608_vm14, %v1259_v30, %v1640_v33  ;;  %v1671_v39 = vsel %vm1607_vm15, %v1220_v31, %v1639_v34  ;;  %v1264_v43 = vpop.f32.mrb[15].mxu1 }
 0x157   : > { %v2042_v42 = vpack.c.bf16 %v1671_v39, %v1670_v35  ;;  %v1673_v44 = vsel %vm1609_vm0, %v1261_v36, %v1641_v32 }
 0x158   : > { %v2043_v45 = vpack.c.bf16 %v1673_v44, %v1672_v38 }
 0x159   : > { %1824 = vst [vmem:[%s2508_s5 + $0x30] sm:$0xff] %v2042_v42 }
 0x15a   : > { %1825 = vst [vmem:[%s2508_s5 + $0x38] sm:$0xff] %v2043_v45 }
 0x15e   : > { %v1300_v46 = vpop.f32.mrb[16].mxu0  ;;  %v1341_v3 = vpop.f32.mrb[16].mxu1 }
 0x15f   : > { %vm1610_vm1 = vcmp.gt.f32.partialorder %v1300_v46, 0.0  ;;  %v1642_v47 = vmul.f32 0.2, %v1300_v46  ;;  %v1302_v48 = vpop.f32.mrb[17].mxu0  ;;  %vm1612_vm2 = vcmp.gt.f32.partialorder %v1341_v3, 0.0  ;;  %v1343_v52 = vpop.f32.mrb[17].mxu1 }
 0x160   : > { %v1644_v49 = vmul.f32 0.2, %v1341_v3  ;;  %vm1611_vm3 = vcmp.gt.f32.partialorder %v1302_v48, 0.0  ;;  %v1643_v50 = vmul.f32 0.2, %v1302_v48  ;;  %v1304_v53 = vpop.f32.mrb[18].mxu0 }
 0x161   : > { %v1674_v51 = vsel %vm1610_vm1, %v1300_v46, %v1642_v47  ;;  %vm1613_vm4 = vcmp.gt.f32.partialorder %v1343_v52, 0.0  ;;  %v1645_v56 = vmul.f32 0.2, %v1343_v52  ;;  %v1345_v57 = vpop.f32.mrb[18].mxu1  ;;  %v1305_v58 = vpop.f32.mrb[19].mxu0 }
 0x162   : > { %v1676_v54 = vsel %vm1612_vm2, %v1341_v3, %v1644_v49  ;;  %v1675_v55 = vsel %vm1611_vm3, %v1302_v48, %v1643_v50  ;;  %v1346_v60 = vpop.f32.mrb[19].mxu1 }
 0x163   : > { %v2044_v59 = vpack.c.bf16 %v1675_v55, %v1674_v51  ;;  %v1677_v61 = vsel %vm1613_vm4, %v1343_v52, %v1645_v56 }
 0x164   : > { %v2045_v62 = vpack.c.bf16 %v1677_v61, %v1676_v54 }
 0x165   : > { %1826 = vst [vmem:[%s2508_s5 + $0x40] sm:$0xff] %v2044_v59 }
 0x166   : > { %1827 = vst [vmem:[%s2508_s5 + $0x48] sm:$0xff] %v2045_v62 }
 0x16a   : > { %v1382_v63 = vpop.f32.mrb[20].mxu0  ;;  %v1423_v1 = vpop.f32.mrb[20].mxu1 }
 0x16b   : > { %vm1614_vm5 = vcmp.gt.f32.partialorder %v1382_v63, 0.0  ;;  %v1646_v0 = vmul.f32 0.2, %v1382_v63  ;;  %v1384_v2 = vpop.f32.mrb[21].mxu0  ;;  %vm1616_vm6 = vcmp.gt.f32.partialorder %v1423_v1, 0.0  ;;  %v1425_v7 = vpop.f32.mrb[21].mxu1 }
 0x16c   : > { %v1648_v4 = vmul.f32 0.2, %v1423_v1  ;;  %vm1615_vm7 = vcmp.gt.f32.partialorder %v1384_v2, 0.0  ;;  %v1647_v5 = vmul.f32 0.2, %v1384_v2  ;;  %v1386_v8 = vpop.f32.mrb[22].mxu0 }
 0x16d   : > { %v1678_v6 = vsel %vm1614_vm5, %v1382_v63, %v1646_v0  ;;  %vm1617_vm8 = vcmp.gt.f32.partialorder %v1425_v7, 0.0  ;;  %v1649_v11 = vmul.f32 0.2, %v1425_v7  ;;  %v1427_v12 = vpop.f32.mrb[22].mxu1  ;;  %v1387_v13 = vpop.f32.mrb[23].mxu0 }
 0x16e   : > { %v1680_v9 = vsel %vm1616_vm6, %v1423_v1, %v1648_v4  ;;  %v1679_v10 = vsel %vm1615_vm7, %v1384_v2, %v1647_v5  ;;  %v1428_v15 = vpop.f32.mrb[23].mxu1 }
 0x16f   : > { %v2046_v14 = vpack.c.bf16 %v1679_v10, %v1678_v6  ;;  %v1681_v16 = vsel %vm1617_vm8, %v1425_v7, %v1649_v11 }
 0x170   : > { %v2047_v17 = vpack.c.bf16 %v1681_v16, %v1680_v9 }
 0x171   : > { %1828 = vst [vmem:[%s2508_s5 + $0x50] sm:$0xff] %v2046_v14 }
 0x172   : > { %1829 = vst [vmem:[%s2508_s5 + $0x58] sm:$0xff] %v2047_v17 }
 0x176   : > { %v1464_v18 = vpop.f32.mrb[24].mxu0  ;;  %v1505_v20 = vpop.f32.mrb[24].mxu1 }
 0x177   : > { %vm1618_vm9 = vcmp.gt.f32.partialorder %v1464_v18, 0.0  ;;  %v1650_v19 = vmul.f32 0.2, %v1464_v18  ;;  %v1466_v21 = vpop.f32.mrb[25].mxu0  ;;  %vm1620_vm10 = vcmp.gt.f32.partialorder %v1505_v20, 0.0  ;;  %v1507_v25 = vpop.f32.mrb[25].mxu1 }
 0x178   : > { %v1652_v22 = vmul.f32 0.2, %v1505_v20  ;;  %vm1619_vm11 = vcmp.gt.f32.partialorder %v1466_v21, 0.0  ;;  %v1651_v23 = vmul.f32 0.2, %v1466_v21  ;;  %v1468_v26 = vpop.f32.mrb[26].mxu0 }
 0x179   : > { %v1682_v24 = vsel %vm1618_vm9, %v1464_v18, %v1650_v19  ;;  %vm1621_vm12 = vcmp.gt.f32.partialorder %v1507_v25, 0.0  ;;  %v1653_v29 = vmul.f32 0.2, %v1507_v25  ;;  %v1509_v30 = vpop.f32.mrb[26].mxu1  ;;  %v1469_v31 = vpop.f32.mrb[27].mxu0 }
 0x17a   : > { %v1684_v27 = vsel %vm1620_vm10, %v1505_v20, %v1652_v22  ;;  %v1683_v28 = vsel %vm1619_vm11, %v1466_v21, %v1651_v23  ;;  %v1510_v34 = vpop.f32.mrb[27].mxu1 }
 0x17b   : > { %v2048_v33 = vpack.c.bf16 %v1683_v28, %v1682_v24  ;;  %v1685_v35 = vsel %vm1621_vm12, %v1507_v25, %v1653_v29 }
 0x17c   : > { %v2049_v36 = vpack.c.bf16 %v1685_v35, %v1684_v27 }
 0x17d   : > { %1830 = vst [vmem:[%s2508_s5 + $0x60] sm:$0xff] %v2048_v33 }
 0x17e   : > { %1831 = vst [vmem:[%s2508_s5 + $0x68] sm:$0xff] %v2049_v36 }
 0x182   : > { %v1546_v37 = vpop.f32.mrb[28].mxu0  ;;  %v1587_v39 = vpop.f32.mrb[28].mxu1 }
 0x183   : > { %vm1622_vm13 = vcmp.gt.f32.partialorder %v1546_v37, 0.0  ;;  %v1654_v38 = vmul.f32 0.2, %v1546_v37  ;;  %v1548_v32 = vpop.f32.mrb[29].mxu0  ;;  %vm1624_vm14 = vcmp.gt.f32.partialorder %v1587_v39, 0.0  ;;  %v1589_v43 = vpop.f32.mrb[29].mxu1 }
 0x184   : > { %v1656_v40 = vmul.f32 0.2, %v1587_v39  ;;  %vm1623_vm15 = vcmp.gt.f32.partialorder %v1548_v32, 0.0  ;;  %v1655_v41 = vmul.f32 0.2, %v1548_v32  ;;  %v1550_v44 = vpop.f32.mrb[30].mxu0 }
 0x185   : > { %v1686_v42 = vsel %vm1622_vm13, %v1546_v37, %v1654_v38  ;;  %vm1625_vm0 = vcmp.gt.f32.partialorder %v1589_v43, 0.0  ;;  %v1657_v47 = vmul.f32 0.2, %v1589_v43  ;;  %v1591_v3 = vpop.f32.mrb[30].mxu1  ;;  %v1551_v48 = vpop.f32.mrb[31].mxu0 }
 0x186   : > { %v1688_v45 = vsel %vm1624_vm14, %v1587_v39, %v1656_v40  ;;  %v1687_v46 = vsel %vm1623_vm15, %v1548_v32, %v1655_v41  ;;  %v1592_v50 = vpop.f32.mrb[31].mxu1 }
 0x187   : > { %v2050_v49 = vpack.c.bf16 %v1687_v46, %v1686_v42  ;;  %v1689_v51 = vsel %vm1625_vm0, %v1589_v43, %v1657_v47 }
 0x188   : > { %v2051_v52 = vpack.c.bf16 %v1689_v51, %v1688_v45 }
 0x189   : > { %1832 = vst [vmem:[%s2508_s5 + $0x70] sm:$0xff] %v2050_v49 }
 0x18a   : > { %1833 = vst [vmem:[%s2508_s5 + $0x78] sm:$0xff] %v2051_v52 }
 0x18b PF: > { %p9_p9 = scmp.ge.s32.totalorder %s2136_s13, 4   ;;  %s2539_s9 = smov %s2097_s10 }
 0x18c   : > { %s2540_s10 = smov %s2145_s16  ;;  %s2541_s11 = smov %s2136_s13 }
 0x18d   :  { %11 = sbr.rel (!%p9_p9) target bundleno = 2 (0x2), region = 86 }

// kernel: discriminator_forward.6
= control target key start
LH: loop header
LB: loop body
LE: loop exit
PB: predicated region body
PF: predicated region fallthrough
CT: control target
= control target key end

     0   :  { %v1783_v3 = vmov 0   ;;  %s2642_s1 = inlined_call_operand.vmem [shape: bf16[128,2048], index: 1, kind: input, shape index: {}]   ;;  %s2643_s0 = inlined_call_operand.vmem [shape: bf16[16,128], index: 0, kind: input, shape index: {}]   ;;  %s2644_s2 = inlined_call_operand.vmem [shape: f32[16,1], index: 2, kind: input, shape index: {}]   ;;  %s2645_s3 = inlined_call_operand.vmem [shape: f32[16,1], index: 3, kind: input, shape index: {}]   ;;  %s2646_s4 = inlined_call_operand.vmem [shape: bf16[16,2048], index: 4, kind: output, shape index: {}]  }
   0x1   :  { %v20_v0 = vld [vmem:[%s2642_s1] sm:$0xff]  ;;  %v21_v2 = vld [vmem:[%s2642_s1 + $0x8] sm:$0xff]  ;;  %826 = vmatprep.mubr.bf16.mxu0 %v1783_v3  ;;  %869 = vmatprep.mubr.bf16.mxu1 %v1783_v3  ;;  %v22_v63 = vld [vmem:[%s2642_s1 + $0x10] sm:$0xff] }
   0x2   :  { %v28_v1 = vld [vmem:[%s2642_s1 + $0x40] sm:$0xff]  ;;  %v29_v6 = vld [vmem:[%s2642_s1 + $0x48] sm:$0xff]  ;;  %1777 = vset.pattern.permute.xlu1 %v1783_v3  ;;  %1776 = vset.pattern.permute.xlu0 %v1783_v3 }
   0x3   :  { %v1616_v4 = vcombine.high %v20_v0, %v28_v1  ;;  %v1615_v5 = vcombine.low %v20_v0, %v28_v1  ;;  %v36_v7 = vld [vmem:[%s2642_s1 + $0x80] sm:$0xff]  ;;  %v1618_v9 = vcombine.high %v21_v2, %v29_v6  ;;  %v1617_v10 = vcombine.low %v21_v2, %v29_v6  ;;  %v37_v12 = vld [vmem:[%s2642_s1 + $0x88] sm:$0xff]  ;;  %v30_v0 = vld [vmem:[%s2642_s1 + $0x50] sm:$0xff] }
   0x4   :  { %v44_v8 = vld [vmem:[%s2642_s1 + $0xc0] sm:$0xff]  ;;  %v45_v13 = vld [vmem:[%s2642_s1 + $0xc8] sm:$0xff]  ;;  %v23_v1 = vld [vmem:[%s2642_s1 + $0x18] sm:$0xff]  ;;  %v1620_v6 = vcombine.high %v22_v63, %v30_v0 }
   0x5   :  { %v1632_v11 = vcombine.high %v36_v7, %v44_v8  ;;  %v52_v14 = vld [vmem:[%s2642_s1 + $0x100] sm:$0xff]  ;;  %794 = vmatprep.subr.bf16.mxu0 %v1616_v4  ;;  %v1634_v15 = vcombine.high %v37_v12, %v45_v13  ;;  %v53_v17 = vld [vmem:[%s2642_s1 + $0x108] sm:$0xff]  ;;  %837 = vmatprep.subr.bf16.mxu1 %v1618_v9  ;;  %v1631_v19 = vcombine.low %v36_v7, %v44_v8  ;;  %v31_v2 = vld [vmem:[%s2642_s1 + $0x58] sm:$0xff] }
   0x6   :  { %v60_v16 = vld [vmem:[%s2642_s1 + $0x140] sm:$0xff]  ;;  %v61_v18 = vld [vmem:[%s2642_s1 + $0x148] sm:$0xff]  ;;  %795 = vmatpush1.bf16.msra.mxu0 %v1615_v5  ;;  %838 = vmatpush1.bf16.msra.mxu1 %v1617_v10  ;;  %v1633_v20 = vcombine.low %v37_v12, %v45_v13  ;;  %v1622_v7 = vcombine.high %v23_v1, %v31_v2  ;;  %v38_v8 = vld [vmem:[%s2642_s1 + $0x90] sm:$0xff]  ;;  %v1619_v13 = vcombine.low %v22_v63, %v30_v0 }
   0x7   :  { %796 = vmatprep.subr.bf16.mxu0 %v1632_v11  ;;  %v1648_v21 = vcombine.high %v52_v14, %v60_v16  ;;  %839 = vmatprep.subr.bf16.mxu1 %v1634_v15  ;;  %v1650_v22 = vcombine.high %v53_v17, %v61_v18  ;;  %v68_v23 = vld [vmem:[%s2642_s1 + $0x180] sm:$0xff]  ;;  %v69_v25 = vld [vmem:[%s2642_s1 + $0x188] sm:$0xff]  ;;  %v1647_v27 = vcombine.low %v52_v14, %v60_v16  ;;  %v46_v9 = vld [vmem:[%s2642_s1 + $0xd0] sm:$0xff] }
   0x8   :  { %v76_v24 = vld [vmem:[%s2642_s1 + $0x1c0] sm:$0xff]  ;;  %v77_v26 = vld [vmem:[%s2642_s1 + $0x1c8] sm:$0xff]  ;;  %v1649_v28 = vcombine.low %v53_v17, %v61_v18  ;;  %v39_v11 = vld [vmem:[%s2642_s1 + $0x98] sm:$0xff]  ;;  %v1621_v14 = vcombine.low %v23_v1, %v31_v2  ;;  %v1636_v15 = vcombine.high %v38_v8, %v46_v9 }
   0x9   :  { %v1664_v29 = vcombine.high %v68_v23, %v76_v24  ;;  %v1666_v30 = vcombine.high %v69_v25, %v77_v26  ;;  %v84_v31 = vld [vmem:[%s2642_s1 + $0x200] sm:$0xff]  ;;  %v85_v33 = vld [vmem:[%s2642_s1 + $0x208] sm:$0xff]  ;;  %v1663_v35 = vcombine.low %v68_v23, %v76_v24  ;;  %v1665_v36 = vcombine.low %v69_v25, %v77_v26  ;;  %v47_v12 = vld [vmem:[%s2642_s1 + $0xd8] sm:$0xff] }
   0xa   :  { %797 = vmatpush1.bf16.msra.mxu0 %v1631_v19  ;;  %840 = vmatpush1.bf16.msra.mxu1 %v1633_v20  ;;  %v92_v32 = vld [vmem:[%s2642_s1 + $0x240] sm:$0xff]  ;;  %v93_v34 = vld [vmem:[%s2642_s1 + $0x248] sm:$0xff]  ;;  %v1638_v16 = vcombine.high %v39_v11, %v47_v12  ;;  %v54_v17 = vld [vmem:[%s2642_s1 + $0x110] sm:$0xff] }
   0xb   :  { %798 = vmatprep.subr.bf16.mxu0 %v1648_v21  ;;  %841 = vmatprep.subr.bf16.mxu1 %v1650_v22  ;;  %v1680_v37 = vcombine.high %v84_v31, %v92_v32  ;;  %v1682_v38 = vcombine.high %v85_v33, %v93_v34  ;;  %v100_v39 = vld [vmem:[%s2642_s1 + $0x280] sm:$0xff]  ;;  %v101_v41 = vld [vmem:[%s2642_s1 + $0x288] sm:$0xff]  ;;  %v1679_v43 = vcombine.low %v84_v31, %v92_v32  ;;  %v62_v18 = vld [vmem:[%s2642_s1 + $0x150] sm:$0xff] }
   0xc   :  { %v108_v40 = vld [vmem:[%s2642_s1 + $0x2c0] sm:$0xff]  ;;  %v109_v42 = vld [vmem:[%s2642_s1 + $0x2c8] sm:$0xff]  ;;  %v1681_v44 = vcombine.low %v85_v33, %v93_v34  ;;  %v55_v19 = vld [vmem:[%s2642_s1 + $0x118] sm:$0xff]  ;;  %v1635_v21 = vcombine.low %v38_v8, %v46_v9  ;;  %v1637_v22 = vcombine.low %v39_v11, %v47_v12  ;;  %v1652_v23 = vcombine.high %v54_v17, %v62_v18 }
   0xd   :  { %v1696_v45 = vcombine.high %v100_v39, %v108_v40  ;;  %v1698_v46 = vcombine.high %v101_v41, %v109_v42  ;;  %v116_v47 = vld [vmem:[%s2642_s1 + $0x300] sm:$0xff]  ;;  %v117_v49 = vld [vmem:[%s2642_s1 + $0x308] sm:$0xff]  ;;  %v1695_v51 = vcombine.low %v100_v39, %v108_v40  ;;  %v1697_v52 = vcombine.low %v101_v41, %v109_v42  ;;  %v63_v20 = vld [vmem:[%s2642_s1 + $0x158] sm:$0xff] }
   0xe   :  { %799 = vmatpush1.bf16.msra.mxu0 %v1647_v27  ;;  %842 = vmatpush1.bf16.msra.mxu1 %v1649_v28  ;;  %v124_v48 = vld [vmem:[%s2642_s1 + $0x340] sm:$0xff]  ;;  %v125_v50 = vld [vmem:[%s2642_s1 + $0x348] sm:$0xff]  ;;  %v1654_v24 = vcombine.high %v55_v19, %v63_v20  ;;  %v70_v25 = vld [vmem:[%s2642_s1 + $0x190] sm:$0xff] }
   0xf   :  { %800 = vmatprep.subr.bf16.mxu0 %v1664_v29  ;;  %843 = vmatprep.subr.bf16.mxu1 %v1666_v30  ;;  %v1712_v53 = vcombine.high %v116_v47, %v124_v48  ;;  %v1714_v54 = vcombine.high %v117_v49, %v125_v50  ;;  %v132_v55 = vld [vmem:[%s2642_s1 + $0x380] sm:$0xff]  ;;  %v133_v57 = vld [vmem:[%s2642_s1 + $0x388] sm:$0xff]  ;;  %v1711_v59 = vcombine.low %v116_v47, %v124_v48  ;;  %v78_v26 = vld [vmem:[%s2642_s1 + $0x1d0] sm:$0xff] }
  0x10   :  { %v140_v56 = vld [vmem:[%s2642_s1 + $0x3c0] sm:$0xff]  ;;  %v141_v58 = vld [vmem:[%s2642_s1 + $0x3c8] sm:$0xff]  ;;  %v1713_v60 = vcombine.low %v117_v49, %v125_v50  ;;  %v71_v27 = vld [vmem:[%s2642_s1 + $0x198] sm:$0xff]  ;;  %v1651_v29 = vcombine.low %v54_v17, %v62_v18  ;;  %v1653_v30 = vcombine.low %v55_v19, %v63_v20  ;;  %v1668_v31 = vcombine.high %v70_v25, %v78_v26 }
  0x11   :  { %v1728_v61 = vcombine.high %v132_v55, %v140_v56  ;;  %v1730_v62 = vcombine.high %v133_v57, %v141_v58  ;;  %v1727_v4 = vcombine.low %v132_v55, %v140_v56  ;;  %v1729_v5 = vcombine.low %v133_v57, %v141_v58  ;;  %v1930_v10 = vld [vmem:[%s2643_s0] sm:$0xff]   ;;  %v79_v28 = vld [vmem:[%s2642_s1 + $0x1d8] sm:$0xff]  ;;  %v86_v33 = vld [vmem:[%s2642_s1 + $0x210] sm:$0xff] }
  0x12   :  { %801 = vmatpush1.bf16.msra.mxu0 %v1663_v35  ;;  %844 = vmatpush1.bf16.msra.mxu1 %v1665_v36  ;;  %v1670_v32 = vcombine.high %v71_v27, %v79_v28  ;;  %v94_v34 = vld [vmem:[%s2642_s1 + $0x250] sm:$0xff]  ;;  %v87_v35 = vld [vmem:[%s2642_s1 + $0x218] sm:$0xff]  ;;  %v24_v1 = vld [vmem:[%s2642_s1 + $0x20] sm:$0xff] }
  0x13   :  { %802 = vmatprep.subr.bf16.mxu0 %v1680_v37  ;;  %845 = vmatprep.subr.bf16.mxu1 %v1682_v38  ;;  %v95_v36 = vld [vmem:[%s2642_s1 + $0x258] sm:$0xff]  ;;  %v1667_v37 = vcombine.low %v70_v25, %v78_v26  ;;  %v1669_v38 = vcombine.low %v71_v27, %v79_v28  ;;  %v1684_v39 = vcombine.high %v86_v33, %v94_v34  ;;  %v102_v41 = vld [vmem:[%s2642_s1 + $0x290] sm:$0xff]  ;;  %v32_v2 = vld [vmem:[%s2642_s1 + $0x60] sm:$0xff] }
  0x14   :  { %v1686_v40 = vcombine.high %v87_v35, %v95_v36  ;;  %v110_v42 = vld [vmem:[%s2642_s1 + $0x2d0] sm:$0xff]  ;;  %v1624_v8 = vcombine.high %v24_v1, %v32_v2  ;;  %v40_v11 = vld [vmem:[%s2642_s1 + $0xa0] sm:$0xff] }
  0x15   :  { %v1700_v47 = vcombine.high %v102_v41, %v110_v42  ;;  %v118_v49 = vld [vmem:[%s2642_s1 + $0x310] sm:$0xff]  ;;  %v48_v12 = vld [vmem:[%s2642_s1 + $0xe0] sm:$0xff] }
  0x16   :  { %803 = vmatpush1.bf16.msra.mxu0 %v1679_v43  ;;  %846 = vmatpush1.bf16.msra.mxu1 %v1681_v44  ;;  %v103_v43 = vld [vmem:[%s2642_s1 + $0x298] sm:$0xff]  ;;  %v126_v50 = vld [vmem:[%s2642_s1 + $0x350] sm:$0xff]  ;;  %v1640_v17 = vcombine.high %v40_v11, %v48_v12  ;;  %v56_v19 = vld [vmem:[%s2642_s1 + $0x120] sm:$0xff] }
  0x17   :  { %804 = vmatprep.subr.bf16.mxu0 %v1696_v45  ;;  %847 = vmatprep.subr.bf16.mxu1 %v1698_v46  ;;  %v111_v44 = vld [vmem:[%s2642_s1 + $0x2d8] sm:$0xff]  ;;  %v1683_v45 = vcombine.low %v86_v33, %v94_v34  ;;  %v1685_v46 = vcombine.low %v87_v35, %v95_v36  ;;  %v1716_v55 = vcombine.high %v118_v49, %v126_v50  ;;  %v134_v57 = vld [vmem:[%s2642_s1 + $0x390] sm:$0xff]  ;;  %v64_v20 = vld [vmem:[%s2642_s1 + $0x160] sm:$0xff] }
  0x18   :  { %v1702_v48 = vcombine.high %v103_v43, %v111_v44  ;;  %v142_v58 = vld [vmem:[%s2642_s1 + $0x3d0] sm:$0xff]  ;;  %v1656_v25 = vcombine.high %v56_v19, %v64_v20  ;;  %v72_v27 = vld [vmem:[%s2642_s1 + $0x1a0] sm:$0xff] }
  0x19   :  { %v1732_v63 = vcombine.high %v134_v57, %v142_v58  ;;  %v80_v28 = vld [vmem:[%s2642_s1 + $0x1e0] sm:$0xff] }
  0x1a   :  { %805 = vmatpush1.bf16.msra.mxu0 %v1695_v51  ;;  %848 = vmatpush1.bf16.msra.mxu1 %v1697_v52  ;;  %v119_v51 = vld [vmem:[%s2642_s1 + $0x318] sm:$0xff]  ;;  %v1672_v33 = vcombine.high %v72_v27, %v80_v28  ;;  %v88_v35 = vld [vmem:[%s2642_s1 + $0x220] sm:$0xff] }
  0x1b   :  { %806 = vmatprep.subr.bf16.mxu0 %v1712_v53  ;;  %849 = vmatprep.subr.bf16.mxu1 %v1714_v54  ;;  %v127_v52 = vld [vmem:[%s2642_s1 + $0x358] sm:$0xff]  ;;  %v1699_v53 = vcombine.low %v102_v41, %v110_v42  ;;  %v1701_v54 = vcombine.low %v103_v43, %v111_v44  ;;  %v96_v36 = vld [vmem:[%s2642_s1 + $0x260] sm:$0xff] }
  0x1c   :  { %v1718_v56 = vcombine.high %v119_v51, %v127_v52  ;;  %v1688_v41 = vcombine.high %v88_v35, %v96_v36  ;;  %v104_v43 = vld [vmem:[%s2642_s1 + $0x2a0] sm:$0xff] }
  0x1d   :  { %v112_v44 = vld [vmem:[%s2642_s1 + $0x2e0] sm:$0xff] }
  0x1e   :  { %807 = vmatpush1.bf16.msra.mxu0 %v1711_v59  ;;  %850 = vmatpush1.bf16.msra.mxu1 %v1713_v60  ;;  %v135_v59 = vld [vmem:[%s2642_s1 + $0x398] sm:$0xff] }
  0x1f   :  { %808 = vmatprep.subr.bf16.mxu0 %v1728_v61  ;;  %851 = vmatprep.subr.bf16.mxu1 %v1730_v62  ;;  %v143_v60 = vld [vmem:[%s2642_s1 + $0x3d8] sm:$0xff]  ;;  %v1715_v61 = vcombine.low %v118_v49, %v126_v50  ;;  %v1717_v62 = vcombine.low %v119_v51, %v127_v52  ;;  %v1704_v49 = vcombine.high %v104_v43, %v112_v44  ;;  %v120_v51 = vld [vmem:[%s2642_s1 + $0x320] sm:$0xff] }
  0x20   :  { %v1734_v0 = vcombine.high %v135_v59, %v143_v60  ;;  %v128_v52 = vld [vmem:[%s2642_s1 + $0x360] sm:$0xff] }
  0x22   :  { %809 = vmatpush1.bf16.msra.mxu0 %v1727_v4  ;;  %852 = vmatpush1.bf16.msra.mxu1 %v1729_v5  ;;  %v25_v4 = vld [vmem:[%s2642_s1 + $0x28] sm:$0xff] }
  0x23   :  { %880 = vmatprep.subr.bf16.mxu0 %v1620_v6  ;;  %923 = vmatprep.subr.bf16.mxu1 %v1622_v7  ;;  %v33_v5 = vld [vmem:[%s2642_s1 + $0x68] sm:$0xff]  ;;  %v1731_v6 = vcombine.low %v134_v57, %v142_v58  ;;  %v1733_v7 = vcombine.low %v135_v59, %v143_v60  ;;  %v1720_v57 = vcombine.high %v120_v51, %v128_v52  ;;  %v136_v59 = vld [vmem:[%s2642_s1 + $0x3a0] sm:$0xff] }
  0x24   :  { %v1626_v9 = vcombine.high %v25_v4, %v33_v5  ;;  %v144_v60 = vld [vmem:[%s2642_s1 + $0x3e0] sm:$0xff] }
  0x25   :  { %827 = vmatmul.mubr.bf16.vlgmr.msra.gmra.mrb[0].mxu0 %v1930_v10  ;;  %870 = vmatmul.mubr.bf16.vlgmr.msra.gmra.mrb[0].mxu1 %v1930_v10 }
  0x26   :  { %881 = vmatpush1.bf16.msra.mxu0 %v1619_v13  ;;  %924 = vmatpush1.bf16.msra.mxu1 %v1621_v14  ;;  %v41_v13 = vld [vmem:[%s2642_s1 + $0xa8] sm:$0xff] }
  0x27   :  { %882 = vmatprep.subr.bf16.mxu0 %v1636_v15  ;;  %925 = vmatprep.subr.bf16.mxu1 %v1638_v16  ;;  %v49_v14 = vld [vmem:[%s2642_s1 + $0xe8] sm:$0xff]  ;;  %v1623_v15 = vcombine.low %v24_v1, %v32_v2  ;;  %v1625_v16 = vcombine.low %v25_v4, %v33_v5  ;;  %v1736_v1 = vcombine.high %v136_v59, %v144_v60  ;;  %v26_v4 = vld [vmem:[%s2642_s1 + $0x30] sm:$0xff] }
  0x28   :  { %912 = vmatprep.mubr.bf16.mxu0 %v1783_v3  ;;  %955 = vmatprep.mubr.bf16.mxu1 %v1783_v3  ;;  %v1642_v18 = vcombine.high %v41_v13, %v49_v14  ;;  %v34_v5 = vld [vmem:[%s2642_s1 + $0x70] sm:$0xff] }
  0x2a   :  { %883 = vmatpush1.bf16.msra.mxu0 %v1635_v21  ;;  %926 = vmatpush1.bf16.msra.mxu1 %v1637_v22  ;;  %v57_v21 = vld [vmem:[%s2642_s1 + $0x128] sm:$0xff] }
  0x2b   :  { %884 = vmatprep.subr.bf16.mxu0 %v1652_v23  ;;  %927 = vmatprep.subr.bf16.mxu1 %v1654_v24  ;;  %v65_v22 = vld [vmem:[%s2642_s1 + $0x168] sm:$0xff]  ;;  %v1639_v23 = vcombine.low %v40_v11, %v48_v12  ;;  %v1641_v24 = vcombine.low %v41_v13, %v49_v14  ;;  %v1628_v11 = vcombine.high %v26_v4, %v34_v5  ;;  %v42_v13 = vld [vmem:[%s2642_s1 + $0xb0] sm:$0xff] }
  0x2c   :  { %v1658_v26 = vcombine.high %v57_v21, %v65_v22  ;;  %v50_v14 = vld [vmem:[%s2642_s1 + $0xf0] sm:$0xff] }
  0x2e   :  { %885 = vmatpush1.bf16.msra.mxu0 %v1651_v29  ;;  %928 = vmatpush1.bf16.msra.mxu1 %v1653_v30  ;;  %v73_v29 = vld [vmem:[%s2642_s1 + $0x1a8] sm:$0xff] }
  0x2f   :  { %886 = vmatprep.subr.bf16.mxu0 %v1668_v31  ;;  %929 = vmatprep.subr.bf16.mxu1 %v1670_v32  ;;  %v81_v30 = vld [vmem:[%s2642_s1 + $0x1e8] sm:$0xff]  ;;  %v1655_v31 = vcombine.low %v56_v19, %v64_v20  ;;  %v1657_v32 = vcombine.low %v57_v21, %v65_v22  ;;  %v1644_v19 = vcombine.high %v42_v13, %v50_v14  ;;  %v58_v21 = vld [vmem:[%s2642_s1 + $0x130] sm:$0xff] }
  0x30   :  { %v1674_v34 = vcombine.high %v73_v29, %v81_v30  ;;  %v66_v22 = vld [vmem:[%s2642_s1 + $0x170] sm:$0xff] }
  0x32   :  { %887 = vmatpush1.bf16.msra.mxu0 %v1667_v37  ;;  %930 = vmatpush1.bf16.msra.mxu1 %v1669_v38  ;;  %v89_v37 = vld [vmem:[%s2642_s1 + $0x228] sm:$0xff] }
  0x33   :  { %888 = vmatprep.subr.bf16.mxu0 %v1684_v39  ;;  %931 = vmatprep.subr.bf16.mxu1 %v1686_v40  ;;  %v97_v38 = vld [vmem:[%s2642_s1 + $0x268] sm:$0xff]  ;;  %v1671_v39 = vcombine.low %v72_v27, %v80_v28  ;;  %v1673_v40 = vcombine.low %v73_v29, %v81_v30  ;;  %v1660_v27 = vcombine.high %v58_v21, %v66_v22  ;;  %v74_v29 = vld [vmem:[%s2642_s1 + $0x1b0] sm:$0xff] }
  0x34   :  { %v1690_v42 = vcombine.high %v89_v37, %v97_v38  ;;  %v82_v30 = vld [vmem:[%s2642_s1 + $0x1f0] sm:$0xff] }
  0x36   :  { %889 = vmatpush1.bf16.msra.mxu0 %v1683_v45  ;;  %932 = vmatpush1.bf16.msra.mxu1 %v1685_v46  ;;  %v105_v45 = vld [vmem:[%s2642_s1 + $0x2a8] sm:$0xff] }
  0x37   :  { %890 = vmatprep.subr.bf16.mxu0 %v1700_v47  ;;  %933 = vmatprep.subr.bf16.mxu1 %v1702_v48  ;;  %v113_v46 = vld [vmem:[%s2642_s1 + $0x2e8] sm:$0xff]  ;;  %v1687_v47 = vcombine.low %v88_v35, %v96_v36  ;;  %v1689_v48 = vcombine.low %v89_v37, %v97_v38  ;;  %v1676_v35 = vcombine.high %v74_v29, %v82_v30  ;;  %v90_v37 = vld [vmem:[%s2642_s1 + $0x230] sm:$0xff] }
  0x38   :  { %v1706_v50 = vcombine.high %v105_v45, %v113_v46  ;;  %v98_v38 = vld [vmem:[%s2642_s1 + $0x270] sm:$0xff] }
  0x3a   :  { %891 = vmatpush1.bf16.msra.mxu0 %v1699_v53  ;;  %934 = vmatpush1.bf16.msra.mxu1 %v1701_v54  ;;  %v121_v53 = vld [vmem:[%s2642_s1 + $0x328] sm:$0xff] }
  0x3b   :  { %892 = vmatprep.subr.bf16.mxu0 %v1716_v55  ;;  %935 = vmatprep.subr.bf16.mxu1 %v1718_v56  ;;  %v129_v54 = vld [vmem:[%s2642_s1 + $0x368] sm:$0xff]  ;;  %v1703_v55 = vcombine.low %v104_v43, %v112_v44  ;;  %v1705_v56 = vcombine.low %v105_v45, %v113_v46  ;;  %v106_v44 = vld [vmem:[%s2642_s1 + $0x2b0] sm:$0xff]  ;;  %v107_v46 = vld [vmem:[%s2642_s1 + $0x2b8] sm:$0xff] }
  0x3c   :  { %v1722_v58 = vcombine.high %v121_v53, %v129_v54  ;;  %v114_v45 = vld [vmem:[%s2642_s1 + $0x2f0] sm:$0xff] }
  0x3e   :  { %893 = vmatpush1.bf16.msra.mxu0 %v1715_v61  ;;  %936 = vmatpush1.bf16.msra.mxu1 %v1717_v62  ;;  %v137_v61 = vld [vmem:[%s2642_s1 + $0x3a8] sm:$0xff] }
  0x3f   :  { %894 = vmatprep.subr.bf16.mxu0 %v1732_v63  ;;  %937 = vmatprep.subr.bf16.mxu1 %v1734_v0  ;;  %v145_v62 = vld [vmem:[%s2642_s1 + $0x3e8] sm:$0xff]  ;;  %v1719_v63 = vcombine.low %v120_v51, %v128_v52  ;;  %v1721_v0 = vcombine.low %v121_v53, %v129_v54  ;;  %v122_v52 = vld [vmem:[%s2642_s1 + $0x330] sm:$0xff]  ;;  %v123_v54 = vld [vmem:[%s2642_s1 + $0x338] sm:$0xff] }
  0x40   :  { %v1738_v2 = vcombine.high %v137_v61, %v145_v62  ;;  %v130_v53 = vld [vmem:[%s2642_s1 + $0x370] sm:$0xff] }
  0x42   :  { %895 = vmatpush1.bf16.msra.mxu0 %v1731_v6  ;;  %938 = vmatpush1.bf16.msra.mxu1 %v1733_v7  ;;  %v27_v6 = vld [vmem:[%s2642_s1 + $0x38] sm:$0xff] }
  0x43   :  { %966 = vmatprep.subr.bf16.mxu0 %v1624_v8  ;;  %1009 = vmatprep.subr.bf16.mxu1 %v1626_v9  ;;  %v35_v7 = vld [vmem:[%s2642_s1 + $0x78] sm:$0xff]  ;;  %v1735_v8 = vcombine.low %v136_v59, %v144_v60  ;;  %v1737_v9 = vcombine.low %v137_v61, %v145_v62  ;;  %v138_v60 = vld [vmem:[%s2642_s1 + $0x3b0] sm:$0xff] }
  0x44   :  { %v1630_v12 = vcombine.high %v27_v6, %v35_v7  ;;  %v146_v61 = vld [vmem:[%s2642_s1 + $0x3f0] sm:$0xff]  ;;  %v139_v62 = vld [vmem:[%s2642_s1 + $0x3b8] sm:$0xff] }
  0x45   :  { %913 = vmatmul.mubr.bf16.vlgmr.msra.gmra.mrb[4].mxu0 %v1930_v10  ;;  %956 = vmatmul.mubr.bf16.vlgmr.msra.gmra.mrb[4].mxu1 %v1930_v10 }
  0x46   :  { %967 = vmatpush1.bf16.msra.mxu0 %v1623_v15  ;;  %1010 = vmatpush1.bf16.msra.mxu1 %v1625_v16  ;;  %v43_v15 = vld [vmem:[%s2642_s1 + $0xb8] sm:$0xff] }
  0x47   :  { %968 = vmatprep.subr.bf16.mxu0 %v1640_v17  ;;  %1011 = vmatprep.subr.bf16.mxu1 %v1642_v18  ;;  %v51_v16 = vld [vmem:[%s2642_s1 + $0xf8] sm:$0xff]  ;;  %v1627_v17 = vcombine.low %v26_v4, %v34_v5  ;;  %v1629_v18 = vcombine.low %v27_v6, %v35_v7  ;;  %v1739_v5 = vcombine.low %v138_v60, %v146_v61  ;;  %v1315_v7 = vld [vmem:[%s2644_s2 + $0x8] sm:$0xff] }
  0x48   :  { %998 = vmatprep.mubr.bf16.mxu0 %v1783_v3  ;;  %1041 = vmatprep.mubr.bf16.mxu1 %v1783_v3  ;;  %v1646_v20 = vcombine.high %v43_v15, %v51_v16 }
  0x49   :  { %1323 = vperm.xlu1 %1777, %v1315_v7  }
  0x4a   :  { %969 = vmatpush1.bf16.msra.mxu0 %v1639_v23  ;;  %1012 = vmatpush1.bf16.msra.mxu1 %v1641_v24  ;;  %v59_v23 = vld [vmem:[%s2642_s1 + $0x138] sm:$0xff] }
  0x4b   :  { %970 = vmatprep.subr.bf16.mxu0 %v1656_v25  ;;  %1013 = vmatprep.subr.bf16.mxu1 %v1658_v26  ;;  %v67_v24 = vld [vmem:[%s2642_s1 + $0x178] sm:$0xff]  ;;  %v1643_v25 = vcombine.low %v42_v13, %v50_v14  ;;  %v1645_v26 = vcombine.low %v43_v15, %v51_v16 }
  0x4c   :  { %v1662_v28 = vcombine.high %v59_v23, %v67_v24 }
  0x4e   :  { %971 = vmatpush1.bf16.msra.mxu0 %v1655_v31  ;;  %1014 = vmatpush1.bf16.msra.mxu1 %v1657_v32  ;;  %v75_v31 = vld [vmem:[%s2642_s1 + $0x1b8] sm:$0xff] }
  0x4f   :  { %972 = vmatprep.subr.bf16.mxu0 %v1672_v33  ;;  %1015 = vmatprep.subr.bf16.mxu1 %v1674_v34  ;;  %v83_v32 = vld [vmem:[%s2642_s1 + $0x1f8] sm:$0xff]  ;;  %v1659_v33 = vcombine.low %v58_v21, %v66_v22  ;;  %v1661_v34 = vcombine.low %v59_v23, %v67_v24 }
  0x50   :  { %v1678_v36 = vcombine.high %v75_v31, %v83_v32 }
  0x52   :  { %973 = vmatpush1.bf16.msra.mxu0 %v1671_v39  ;;  %1016 = vmatpush1.bf16.msra.mxu1 %v1673_v40  ;;  %v99_v39 = vld [vmem:[%s2642_s1 + $0x278] sm:$0xff]  ;;  %v1675_v40 = vcombine.low %v74_v29, %v82_v30 }
  0x53   :  { %974 = vmatprep.subr.bf16.mxu0 %v1688_v41  ;;  %1017 = vmatprep.subr.bf16.mxu1 %v1690_v42  ;;  %v1677_v41 = vcombine.low %v75_v31, %v83_v32  ;;  %v1692_v42 = vcombine.high %v90_v37, %v98_v38 }
  0x56   :  { %975 = vmatpush1.bf16.msra.mxu0 %v1687_v47  ;;  %1018 = vmatpush1.bf16.msra.mxu1 %v1689_v48  ;;  %v115_v47 = vld [vmem:[%s2642_s1 + $0x2f8] sm:$0xff]  ;;  %v1691_v48 = vcombine.low %v90_v37, %v98_v38 }
  0x57   :  { %976 = vmatprep.subr.bf16.mxu0 %v1704_v49  ;;  %1019 = vmatprep.subr.bf16.mxu1 %v1706_v50  ;;  %v1708_v50 = vcombine.high %v106_v44, %v114_v45  ;;  %v1710_v51 = vcombine.high %v107_v46, %v115_v47 }
  0x5a   :  { %977 = vmatpush1.bf16.msra.mxu0 %v1703_v55  ;;  %1020 = vmatpush1.bf16.msra.mxu1 %v1705_v56  ;;  %v131_v55 = vld [vmem:[%s2642_s1 + $0x378] sm:$0xff]  ;;  %v1707_v56 = vcombine.low %v106_v44, %v114_v45 }
  0x5b   :  { %978 = vmatprep.subr.bf16.mxu0 %v1720_v57  ;;  %1021 = vmatprep.subr.bf16.mxu1 %v1722_v58  ;;  %v1709_v57 = vcombine.low %v107_v46, %v115_v47  ;;  %v1724_v58 = vcombine.high %v122_v52, %v130_v53  ;;  %v1726_v59 = vcombine.high %v123_v54, %v131_v55 }
  0x5e   :  { %979 = vmatpush1.bf16.msra.mxu0 %v1719_v63  ;;  %1022 = vmatpush1.bf16.msra.mxu1 %v1721_v0  ;;  %v147_v63 = vld [vmem:[%s2642_s1 + $0x3f8] sm:$0xff]  ;;  %v1723_v0 = vcombine.low %v122_v52, %v130_v53 }
  0x5f   :  { %980 = vmatprep.subr.bf16.mxu0 %v1736_v1  ;;  %1023 = vmatprep.subr.bf16.mxu1 %v1738_v2  ;;  %v1725_v1 = vcombine.low %v123_v54, %v131_v55  ;;  %v1740_v2 = vcombine.high %v138_v60, %v146_v61  ;;  %v1742_v4 = vcombine.high %v139_v62, %v147_v63 }
  0x60   :  { %v1741_v6 = vcombine.low %v139_v62, %v147_v63 }
  0x62   :  { %981 = vmatpush1.bf16.msra.mxu0 %v1735_v8  ;;  %1024 = vmatpush1.bf16.msra.mxu1 %v1737_v9  ;;  %v1358_v8 = vld [vmem:[%s2645_s3] sm:$0xff] }
  0x63   :  { %1052 = vmatprep.subr.bf16.mxu0 %v1628_v11  ;;  %1095 = vmatprep.subr.bf16.mxu1 %v1630_v12 }
  0x64   :  { %1362 = vperm.xlu1 %1777, %v1358_v8  }
  0x65   :  { %999 = vmatmul.mubr.bf16.vlgmr.msra.gmra.mrb[8].mxu0 %v1930_v10  ;;  %1042 = vmatmul.mubr.bf16.vlgmr.msra.gmra.mrb[8].mxu1 %v1930_v10 }
  0x66   :  { %1053 = vmatpush1.bf16.msra.mxu0 %v1627_v17  ;;  %1096 = vmatpush1.bf16.msra.mxu1 %v1629_v18 }
  0x67   :  { %1054 = vmatprep.subr.bf16.mxu0 %v1644_v19  ;;  %1097 = vmatprep.subr.bf16.mxu1 %v1646_v20 }
  0x68   :  { %1084 = vmatprep.mubr.bf16.mxu0 %v1783_v3  ;;  %1127 = vmatprep.mubr.bf16.mxu1 %v1783_v3  ;;  %v91_v3 = vld [vmem:[%s2642_s1 + $0x238] sm:$0xff] }
  0x69   :  { %v1694_v43 = vcombine.high %v91_v3, %v99_v39  ;;  %v1693_v49 = vcombine.low %v91_v3, %v99_v39 }
  0x6a   :  { %1055 = vmatpush1.bf16.msra.mxu0 %v1643_v25  ;;  %1098 = vmatpush1.bf16.msra.mxu1 %v1645_v26 }
  0x6b   :  { %1056 = vmatprep.subr.bf16.mxu0 %v1660_v27  ;;  %1099 = vmatprep.subr.bf16.mxu1 %v1662_v28 }
  0x6e   :  { %1057 = vmatpush1.bf16.msra.mxu0 %v1659_v33  ;;  %1100 = vmatpush1.bf16.msra.mxu1 %v1661_v34 }
  0x6f   :  { %1058 = vmatprep.subr.bf16.mxu0 %v1676_v35  ;;  %1101 = vmatprep.subr.bf16.mxu1 %v1678_v36 }
  0x72   :  { %1059 = vmatpush1.bf16.msra.mxu0 %v1675_v40  ;;  %1102 = vmatpush1.bf16.msra.mxu1 %v1677_v41 }
  0x73   :  { %1060 = vmatprep.subr.bf16.mxu0 %v1692_v42  ;;  %1103 = vmatprep.subr.bf16.mxu1 %v1694_v43 }
  0x76   :  { %1061 = vmatpush1.bf16.msra.mxu0 %v1691_v48  ;;  %1104 = vmatpush1.bf16.msra.mxu1 %v1693_v49 }
  0x77   :  { %1062 = vmatprep.subr.bf16.mxu0 %v1708_v50  ;;  %1105 = vmatprep.subr.bf16.mxu1 %v1710_v51 }
  0x7a   :  { %1063 = vmatpush1.bf16.msra.mxu0 %v1707_v56  ;;  %1106 = vmatpush1.bf16.msra.mxu1 %v1709_v57 }
  0x7b   :  { %1064 = vmatprep.subr.bf16.mxu0 %v1724_v58  ;;  %1107 = vmatprep.subr.bf16.mxu1 %v1726_v59 }
  0x7e   :  { %1065 = vmatpush1.bf16.msra.mxu0 %v1723_v0  ;;  %1108 = vmatpush1.bf16.msra.mxu1 %v1725_v1 }
  0x7f   :  { %1066 = vmatprep.subr.bf16.mxu0 %v1740_v2  ;;  %1109 = vmatprep.subr.bf16.mxu1 %v1742_v4 }
  0x82   :  { %1067 = vmatpush1.bf16.msra.mxu0 %v1739_v5  ;;  %1110 = vmatpush1.bf16.msra.mxu1 %v1741_v6 }
  0x85   :  { %1085 = vmatmul.mubr.bf16.vlgmr.msra.gmra.mrb[12].mxu0 %v1930_v10  ;;  %1128 = vmatmul.mubr.bf16.vlgmr.msra.gmra.mrb[12].mxu1 %v1930_v10 }
  0xf8   :  { %v2222_v9 = vpop.f32.mrb[0].mxu0  ;;  %v2228_v13 = vpop.f32.mrb[0].mxu1 }
  0xf9   :  { %v1174_v11 = vmul.f32 %v2222_v9, %v2222_v9  ;;  %v2226_v12 = vpop.f32.mrb[1].mxu0  ;;  %v1176_v16 = vmul.f32 %v2228_v13, %v2228_v13  ;;  %v2238_v17 = vpop.f32.mrb[1].mxu1 }
  0xfa   :  { %v1138_v10 = vadd.f32 %v2226_v12, %v2222_v9  ;;  %v1175_v14 = vmul.f32 %v2226_v12, %v2226_v12  ;;  %v2234_v15 = vpop.f32.mrb[2].mxu0  ;;  %v1177_v20 = vmul.f32 %v2238_v17, %v2238_v17  ;;  %v2246_v21 = vpop.f32.mrb[2].mxu1 }
  0xfb   :  { %v1190_v18 = vmul.f32 %v2234_v15, %v2234_v15  ;;  %v2242_v19 = vpop.f32.mrb[3].mxu0  ;;  %v2253_v26 = vpop.f32.mrb[3].mxu1  ;;  %v1192_v27 = vmul.f32 %v2246_v21, %v2246_v21 }
  0xfc   :  { %v1206_v22 = vadd.f32 %v1175_v14, %v1174_v11  ;;  %v1139_v23 = vadd.f32 %v1138_v10, %v2228_v13  ;;  %v1155_v24 = vadd.f32 %v2242_v19, %v2234_v15  ;;  %v1191_v25 = vmul.f32 %v2242_v19, %v2242_v19 }
  0xfd   :  { %v1193_v35 = vmul.f32 %v2253_v26, %v2253_v26 }
  0xfe   :  { %v1207_v28 = vadd.f32 %v1206_v22, %v1176_v16  ;;  %v1223_v29 = vadd.f32 %v1191_v25, %v1190_v18  ;;  %v1140_v30 = vadd.f32 %v1139_v23, %v2238_v17  ;;  %v1156_v31 = vadd.f32 %v1155_v24, %v2246_v21 }
 0x100   :  { %v1208_v32 = vadd.f32 %v1207_v28, %v1177_v20  ;;  %v1224_v33 = vadd.f32 %v1223_v29, %v1192_v27  ;;  %v1157_v34 = vadd.f32 %v1156_v31, %v2253_v26 }
 0x102   :  { %v1225_v36 = vadd.f32 %v1224_v33, %v1193_v35 }
 0x118   :  { %v2262_v37 = vpop.f32.mrb[4].mxu0  ;;  %v2269_v40 = vpop.f32.mrb[4].mxu1 }
 0x119   :  { %v1141_v38 = vadd.f32 %v1140_v30, %v2262_v37  ;;  %v1178_v3 = vmul.f32 %v2262_v37, %v2262_v37  ;;  %v2267_v39 = vpop.f32.mrb[5].mxu0  ;;  %v1180_v43 = vmul.f32 %v2269_v40, %v2269_v40  ;;  %v2277_v44 = vpop.f32.mrb[5].mxu1 }
 0x11a   :  { %v1179_v41 = vmul.f32 %v2267_v39, %v2267_v39  ;;  %v2273_v42 = vpop.f32.mrb[6].mxu0  ;;  %v2285_v50 = vpop.f32.mrb[6].mxu1  ;;  %v1181_v52 = vmul.f32 %v2277_v44, %v2277_v44 }
 0x11b   :  { %v1209_v45 = vadd.f32 %v1208_v32, %v1178_v3  ;;  %v1142_v46 = vadd.f32 %v1141_v38, %v2267_v39  ;;  %v1158_v47 = vadd.f32 %v1157_v34, %v2273_v42  ;;  %v1194_v48 = vmul.f32 %v2273_v42, %v2273_v42  ;;  %v2283_v49 = vpop.f32.mrb[7].mxu0  ;;  %v2293_v54 = vpop.f32.mrb[7].mxu1 }
 0x11c   :  { %v1195_v51 = vmul.f32 %v2283_v49, %v2283_v49  ;;  %v1196_v53 = vmul.f32 %v2285_v50, %v2285_v50  ;;  %v1197_v2 = vmul.f32 %v2293_v54, %v2293_v54 }
 0x11d   :  { %v1210_v55 = vadd.f32 %v1209_v45, %v1179_v41  ;;  %v1226_v56 = vadd.f32 %v1225_v36, %v1194_v48  ;;  %v1143_v57 = vadd.f32 %v1142_v46, %v2269_v40  ;;  %v1159_v58 = vadd.f32 %v1158_v47, %v2283_v49 }
 0x11f   :  { %v1211_v59 = vadd.f32 %v1210_v55, %v1180_v43  ;;  %v1227_v60 = vadd.f32 %v1226_v56, %v1195_v51  ;;  %v1144_v61 = vadd.f32 %v1143_v57, %v2277_v44  ;;  %v1160_v62 = vadd.f32 %v1159_v58, %v2285_v50 }
 0x121   :  { %v1212_v63 = vadd.f32 %v1211_v59, %v1181_v52  ;;  %v1228_v0 = vadd.f32 %v1227_v60, %v1196_v53  ;;  %v1161_v1 = vadd.f32 %v1160_v62, %v2293_v54 }
 0x123   :  { %v1229_v4 = vadd.f32 %v1228_v0, %v1197_v2 }
 0x138   :  { %v2302_v5 = vpop.f32.mrb[8].mxu0  ;;  %v2309_v11 = vpop.f32.mrb[8].mxu1 }
 0x139   :  { %v1145_v6 = vadd.f32 %v1144_v61, %v2302_v5  ;;  %v1182_v7 = vmul.f32 %v2302_v5, %v2302_v5  ;;  %v2307_v8 = vpop.f32.mrb[9].mxu0  ;;  %v1184_v16 = vmul.f32 %v2309_v11, %v2309_v11  ;;  %v2317_v18 = vpop.f32.mrb[9].mxu1 }
 0x13a   :  { %v1183_v10 = vmul.f32 %v2307_v8, %v2307_v8  ;;  %v2313_v14 = vpop.f32.mrb[10].mxu0  ;;  %v2325_v27 = vpop.f32.mrb[10].mxu1  ;;  %v1185_v29 = vmul.f32 %v2317_v18, %v2317_v18 }
 0x13b   :  { %v1213_v20 = vadd.f32 %v1212_v63, %v1182_v7  ;;  %v1146_v22 = vadd.f32 %v1145_v6, %v2307_v8  ;;  %v1162_v23 = vadd.f32 %v1161_v1, %v2313_v14  ;;  %v1198_v24 = vmul.f32 %v2313_v14, %v2313_v14  ;;  %v2323_v25 = vpop.f32.mrb[11].mxu0  ;;  %v2333_v31 = vpop.f32.mrb[11].mxu1 }
 0x13c   :  { %v1199_v28 = vmul.f32 %v2323_v25, %v2323_v25  ;;  %v1200_v30 = vmul.f32 %v2325_v27, %v2325_v27  ;;  %v1201_v47 = vmul.f32 %v2333_v31, %v2333_v31 }
 0x13d   :  { %v1214_v32 = vadd.f32 %v1213_v20, %v1183_v10  ;;  %v1230_v33 = vadd.f32 %v1229_v4, %v1198_v24  ;;  %v1147_v34 = vadd.f32 %v1146_v22, %v2309_v11  ;;  %v1163_v35 = vadd.f32 %v1162_v23, %v2323_v25 }
 0x13f   :  { %v1215_v36 = vadd.f32 %v1214_v32, %v1184_v16  ;;  %v1231_v38 = vadd.f32 %v1230_v33, %v1199_v28  ;;  %v1148_v3 = vadd.f32 %v1147_v34, %v2317_v18  ;;  %v1164_v41 = vadd.f32 %v1163_v35, %v2325_v27 }
 0x141   :  { %v1216_v43 = vadd.f32 %v1215_v36, %v1185_v29  ;;  %v1232_v45 = vadd.f32 %v1231_v38, %v1200_v30  ;;  %v1165_v46 = vadd.f32 %v1164_v41, %v2333_v31  ;;  %v1359_v38 = vld [vmem:[%s2645_s3 + $0x8] sm:$0xff]  ;;  %v2388_v41 = vpop.permute.xlu1 %1323 }
 0x143   :  { %v1233_v48 = vadd.f32 %v1232_v45, %v1201_v47 }
 0x158   :  { %v2342_v51 = vpop.f32.mrb[12].mxu0  ;;  %v2349_v56 = vpop.f32.mrb[12].mxu1 }
 0x159   :  { %v1149_v52 = vadd.f32 %v1148_v3, %v2342_v51  ;;  %v1186_v53 = vmul.f32 %v2342_v51, %v2342_v51  ;;  %v2347_v55 = vpop.f32.mrb[13].mxu0  ;;  %v2355_v59 = vpop.f32.mrb[13].mxu1  ;;  %v1188_v2 = vmul.f32 %v2349_v56, %v2349_v56  ;;  %v1314_v3 = vld [vmem:[%s2644_s2] sm:$0xff] }
 0x15a   :  { %v1187_v57 = vmul.f32 %v2347_v55, %v2347_v55  ;;  %v2353_v58 = vpop.f32.mrb[14].mxu0  ;;  %v2363_v1 = vpop.f32.mrb[14].mxu1  ;;  %v1189_v29 = vmul.f32 %v2355_v59, %v2355_v59 }
 0x15b   :  { %v1217_v60 = vadd.f32 %v1216_v43, %v1186_v53  ;;  %v1150_v61 = vadd.f32 %v1149_v52, %v2347_v55  ;;  %v1166_v62 = vadd.f32 %v1165_v46, %v2353_v58  ;;  %v1202_v63 = vmul.f32 %v2353_v58, %v2353_v58  ;;  %v2361_v0 = vpop.f32.mrb[15].mxu0  ;;  %v2369_v6 = vpop.f32.mrb[15].mxu1 }
 0x15c   :  { %v1203_v4 = vmul.f32 %v2361_v0, %v2361_v0  ;;  %v1204_v23 = vmul.f32 %v2363_v1, %v2363_v1  ;;  %v1205_v32 = vmul.f32 %v2369_v6, %v2369_v6  ;;  %v2390_v43 = vpop.permute.xlu1 %1362 }
 0x15d   :  { %v1234_v7 = vadd.f32 %v1233_v48, %v1202_v63  ;;  %v1167_v10 = vadd.f32 %v1166_v62, %v2361_v0  ;;  %v1151_v16 = vadd.f32 %v1150_v61, %v2349_v56  ;;  %v1218_v20 = vadd.f32 %v1217_v60, %v1187_v57 }
 0x15f   :  { %v1235_v22 = vadd.f32 %v1234_v7, %v1203_v4  ;;  %v1152_v24 = vadd.f32 %v1151_v16, %v2355_v59  ;;  %v1168_v28 = vadd.f32 %v1167_v10, %v2363_v1  ;;  %v1219_v30 = vadd.f32 %v1218_v20, %v1188_v2 }
 0x161   :  { %1153 = vadd.xlane.f32.xlu0 %v1152_v24  ;;  %v1169_v33 = vadd.f32 %v1168_v28, %v2369_v6  ;;  %v1236_v34 = vadd.f32 %v1235_v22, %v1204_v23  ;;  %v1220_v35 = vadd.f32 %v1219_v30, %v1189_v29 }
 0x163   :  { %v1237_v36 = vadd.f32 %v1236_v34, %v1205_v32  ;;  %1221 = vadd.xlane.f32.xlu1 %v1220_v35 }
 0x165   :  { %1170 = vadd.xlane.f32.xlu0 %v1169_v33 }
 0x167   :  { %1238 = vadd.xlane.f32.xlu1 %v1237_v36 }
 0x178   :  { %1367 = vperm.xlu1 %1777, %v1359_v38  }
 0x17b   :  { %1318 = vperm.xlu0 %1776, %v1314_v3  }
 0x1ee   :  { %v1154_v45 = vpop.xlane.xlu0 %1153 }
 0x1ef   :  { %v2392_v46 = vmul.f32 0.00048828125, %v1154_v45 }
 0x1f0   :  { %v1222_v47 = vpop.xlane.xlu1 %1221 }
 0x1f1   :  { %v1242_v48 = vmul.f32 %v2392_v46, %v2392_v46  ;;  %v1240_v52 = vmul.f32 0.00048828125, %v1222_v47  ;;  %v1246_v10 = vsub.f32 %v2222_v9, %v2392_v46  ;;  %v1247_v16 = vsub.f32 %v2226_v12, %v2392_v46 }
 0x1f2   :  { %v1171_v53 = vpop.xlane.xlu0 %1170  ;;  %v1248_v20 = vsub.f32 %v2228_v13, %v2392_v46  ;;  %v1249_v22 = vsub.f32 %v2238_v17, %v2392_v46  ;;  %v1250_v23 = vsub.f32 %v2262_v37, %v2392_v46  ;;  %v1251_v24 = vsub.f32 %v2267_v39, %v2392_v46 }
 0x1f3   :  { %v2396_v57 = vmul.f32 0.00048828125, %v1171_v53  ;;  %v1244_v60 = vsub.f32 %v1240_v52, %v1242_v48  ;;  %v1252_v28 = vsub.f32 %v2269_v40, %v2392_v46  ;;  %v1253_v9 = vsub.f32 %v2277_v44, %v2392_v46 }
 0x1f4   :  { %v1239_v61 = vpop.xlane.xlu1 %1238  ;;  %v1254_v12 = vsub.f32 %v2302_v5, %v2392_v46  ;;  %v1255_v13 = vsub.f32 %v2307_v8, %v2392_v46  ;;  %v1256_v17 = vsub.f32 %v2309_v11, %v2392_v46  ;;  %v1257_v37 = vsub.f32 %v2317_v18, %v2392_v46 }
 0x1f5   :  { %v1243_v62 = vmul.f32 %v2396_v57, %v2396_v57  ;;  %v1278_v63 = vadd.f32 1e-05, %v1244_v60  ;;  %v1241_v2 = vmul.f32 0.00048828125, %v1239_v61  ;;  %v1262_v39 = vsub.f32 %v2234_v15, %v2396_v57 }
 0x1f6   :  { %v1263_v40 = vsub.f32 %v2242_v19, %v2396_v57  ;;  %v1264_v44 = vsub.f32 %v2246_v21, %v2396_v57  ;;  %v1265_v5 = vsub.f32 %v2253_v26, %v2396_v57  ;;  %v1266_v8 = vsub.f32 %v2273_v42, %v2396_v57 }
 0x1f7   :  { %1779 = vrsqrt.f32 %v1278_v63  ;;  %v1245_v4 = vsub.f32 %v1241_v2, %v1243_v62  ;;  %v1267_v11 = vsub.f32 %v2283_v49, %v2396_v57  ;;  %v1268_v18 = vsub.f32 %v2285_v50, %v2396_v57 }
 0x1f8   :  { %v1269_v15 = vsub.f32 %v2293_v54, %v2396_v57  ;;  %v1270_v19 = vsub.f32 %v2313_v14, %v2396_v57  ;;  %v1271_v21 = vsub.f32 %v2323_v25, %v2396_v57  ;;  %v1272_v26 = vsub.f32 %v2325_v27, %v2396_v57 }
 0x1f9   :  { %v1279_v7 = vadd.f32 1e-05, %v1245_v4  ;;  %v1273_v42 = vsub.f32 %v2333_v31, %v2396_v57  ;;  %v1274_v49 = vsub.f32 %v2353_v58, %v2396_v57  ;;  %v1275_v50 = vsub.f32 %v2361_v0, %v2396_v57 }
 0x1fa   :  { %v1276_v54 = vsub.f32 %v2363_v1, %v2396_v57  ;;  %v1277_v14 = vsub.f32 %v2369_v6, %v2396_v57  ;;  %v1258_v25 = vsub.f32 %v2342_v51, %v2392_v46  ;;  %v1259_v27 = vsub.f32 %v2347_v55, %v2392_v46 }
 0x1fb   :  { %1781 = vrsqrt.f32 %v1279_v7  ;;  %v1260_v31 = vsub.f32 %v2349_v56, %v2392_v46  ;;  %v1261_v58 = vsub.f32 %v2355_v59, %v2392_v46 }
 0x201   :  { %v1780_v29 = vpop.eup %1779 }
 0x202   :  { %v2464_v0 = vmul.f32 %v1780_v29, %v1246_v10  ;;  %v2466_v30 = vmul.f32 %v1780_v29, %v1247_v16  ;;  %v2468_v1 = vmul.f32 %v1780_v29, %v1248_v20  ;;  %v2470_v6 = vmul.f32 %v1780_v29, %v1249_v22 }
 0x203   :  { %v2472_v32 = vmul.f32 %v1780_v29, %v1250_v23  ;;  %v2474_v51 = vmul.f32 %v1780_v29, %v1251_v24  ;;  %v2476_v33 = vmul.f32 %v1780_v29, %v1252_v28  ;;  %v2478_v55 = vmul.f32 %v1780_v29, %v1253_v9 }
 0x204   :  { %v2480_v56 = vmul.f32 %v1780_v29, %v1254_v12  ;;  %v2482_v34 = vmul.f32 %v1780_v29, %v1255_v13  ;;  %v2484_v59 = vmul.f32 %v1780_v29, %v1256_v17  ;;  %v2486_v35 = vmul.f32 %v1780_v29, %v1257_v37 }
 0x205   :  { %v1782_v36 = vpop.eup %1781  ;;  %v2488_v38 = vmul.f32 %v1780_v29, %v1258_v25  ;;  %v2490_v3 = vmul.f32 %v1780_v29, %v1259_v27  ;;  %v2492_v45 = vmul.f32 %v1780_v29, %v1260_v31  ;;  %v2494_v46 = vmul.f32 %v1780_v29, %v1261_v58 }
 0x206   :  { %v1298_v47 = vmul.f32 %v1782_v36, %v1262_v39  ;;  %v1299_v48 = vmul.f32 %v1782_v36, %v1263_v40  ;;  %v1300_v52 = vmul.f32 %v1782_v36, %v1264_v44  ;;  %v1301_v53 = vmul.f32 %v1782_v36, %v1265_v5 }
 0x207   :  { %v1302_v57 = vmul.f32 %v1782_v36, %v1266_v8  ;;  %v1303_v60 = vmul.f32 %v1782_v36, %v1267_v11  ;;  %v1304_v61 = vmul.f32 %v1782_v36, %v1268_v18  ;;  %v1305_v62 = vmul.f32 %v1782_v36, %v1269_v15  ;;  %v1368_v8 = vpop.permute.xlu1 %1367 }
 0x208   :  { %v1306_v63 = vmul.f32 %v1782_v36, %v1270_v19  ;;  %v1307_v2 = vmul.f32 %v1782_v36, %v1271_v21  ;;  %v1308_v4 = vmul.f32 %v1782_v36, %v1272_v26  ;;  %v1309_v7 = vmul.f32 %v1782_v36, %v1273_v42 }
 0x209   :  { %v1310_v10 = vmul.f32 %v1782_v36, %v1274_v49  ;;  %v1311_v16 = vmul.f32 %v1782_v36, %v1275_v50  ;;  %v1312_v20 = vmul.f32 %v1782_v36, %v1276_v54  ;;  %v1313_v22 = vmul.f32 %v1782_v36, %v1277_v14 }
 0x20a   :  { %v1342_v23 = vmul.f32 %v2388_v41, %v1298_v47  ;;  %v1343_v24 = vmul.f32 %v2388_v41, %v1299_v48  ;;  %v1344_v28 = vmul.f32 %v2388_v41, %v1300_v52  ;;  %v1345_v9 = vmul.f32 %v2388_v41, %v1301_v53 }
 0x20b   :  { %v1346_v12 = vmul.f32 %v2388_v41, %v1302_v57  ;;  %v1347_v13 = vmul.f32 %v2388_v41, %v1303_v60  ;;  %v1348_v17 = vmul.f32 %v2388_v41, %v1304_v61  ;;  %v1349_v37 = vmul.f32 %v2388_v41, %v1305_v62 }
 0x20c   :  { %v1350_v39 = vmul.f32 %v2388_v41, %v1306_v63  ;;  %v1351_v40 = vmul.f32 %v2388_v41, %v1307_v2  ;;  %v1352_v44 = vmul.f32 %v2388_v41, %v1308_v4  ;;  %v1353_v5 = vmul.f32 %v2388_v41, %v1309_v7 }
 0x20d   :  { %v1354_v11 = vmul.f32 %v2388_v41, %v1310_v10  ;;  %v1355_v18 = vmul.f32 %v2388_v41, %v1311_v16  ;;  %v1356_v15 = vmul.f32 %v2388_v41, %v1312_v20  ;;  %v1357_v19 = vmul.f32 %v2388_v41, %v1313_v22  ;;  %v2512_v41 = vpop.permute.xlu0 %1318 }
 0x20e   :  { %v1386_v21 = vadd.f32 %v1368_v8, %v1342_v23  ;;  %v1387_v26 = vadd.f32 %v1368_v8, %v1343_v24  ;;  %v1388_v42 = vadd.f32 %v1368_v8, %v1344_v28  ;;  %v1389_v49 = vadd.f32 %v1368_v8, %v1345_v9 }
 0x20f   :  { %v1390_v50 = vadd.f32 %v1368_v8, %v1346_v12  ;;  %v1391_v54 = vadd.f32 %v1368_v8, %v1347_v13  ;;  %v1392_v14 = vadd.f32 %v1368_v8, %v1348_v17  ;;  %v1393_v29 = vadd.f32 %v1368_v8, %v1349_v37 }
 0x210   :  { %v1394_v25 = vadd.f32 %v1368_v8, %v1350_v39  ;;  %v1395_v27 = vadd.f32 %v1368_v8, %v1351_v40  ;;  %v1396_v31 = vadd.f32 %v1368_v8, %v1352_v44  ;;  %v1397_v58 = vadd.f32 %v1368_v8, %v1353_v5 }
 0x211   :  { %v1398_v36 = vadd.f32 %v1368_v8, %v1354_v11  ;;  %v1399_v47 = vadd.f32 %v1368_v8, %v1355_v18  ;;  %v1400_v48 = vadd.f32 %v1368_v8, %v1356_v15  ;;  %v1401_v52 = vadd.f32 %v1368_v8, %v1357_v19 }
 0x212   :  { %vm1418_vm0 = vcmp.gt.f32.partialorder %v1386_v21, 0.0  ;;  %vm1419_vm1 = vcmp.gt.f32.partialorder %v1387_v26, 0.0  ;;  %vm1420_vm2 = vcmp.gt.f32.partialorder %v1388_v42, 0.0  ;;  %vm1421_vm3 = vcmp.gt.f32.partialorder %v1389_v49, 0.0 }
 0x213   :  { %vm1422_vm4 = vcmp.gt.f32.partialorder %v1390_v50, 0.0  ;;  %vm1423_vm5 = vcmp.gt.f32.partialorder %v1391_v54, 0.0  ;;  %vm1424_vm6 = vcmp.gt.f32.partialorder %v1392_v14, 0.0  ;;  %vm1425_vm7 = vcmp.gt.f32.partialorder %v1393_v29, 0.0 }
 0x214   :  { %vm1426_vm8 = vcmp.gt.f32.partialorder %v1394_v25, 0.0  ;;  %vm1427_vm9 = vcmp.gt.f32.partialorder %v1395_v27, 0.0  ;;  %vm1428_vm10 = vcmp.gt.f32.partialorder %v1396_v31, 0.0  ;;  %vm1429_vm11 = vcmp.gt.f32.partialorder %v1397_v58, 0.0 }
 0x215   :  { %vm1430_vm12 = vcmp.gt.f32.partialorder %v1398_v36, 0.0  ;;  %vm1431_vm13 = vcmp.gt.f32.partialorder %v1399_v47, 0.0  ;;  %vm1432_vm14 = vcmp.gt.f32.partialorder %v1400_v48, 0.0  ;;  %vm1433_vm15 = vcmp.gt.f32.partialorder %v1401_v52, 0.0 }
 0x216   :  { %v1450_v53 = vmul.f32 0.2, %v1386_v21  ;;  %v1451_v57 = vmul.f32 0.2, %v1387_v26  ;;  %v1452_v60 = vmul.f32 0.2, %v1388_v42  ;;  %v1326_v61 = vmul.f32 %v2512_v41, %v2464_v0 }
 0x217   :  { %v1453_v62 = vmul.f32 0.2, %v1389_v49  ;;  %v1454_v63 = vmul.f32 0.2, %v1390_v50  ;;  %v1455_v2 = vmul.f32 0.2, %v1391_v54  ;;  %v1327_v4 = vmul.f32 %v2512_v41, %v2466_v30 }
 0x218   :  { %v1456_v7 = vmul.f32 0.2, %v1392_v14  ;;  %v1457_v10 = vmul.f32 0.2, %v1393_v29  ;;  %v1458_v16 = vmul.f32 0.2, %v1394_v25  ;;  %v1482_v20 = vsel %vm1418_vm0, %v1386_v21, %v1450_v53 }
 0x219   :  { %v1459_v22 = vmul.f32 0.2, %v1395_v27  ;;  %v1460_v23 = vmul.f32 0.2, %v1396_v31  ;;  %v1461_v24 = vmul.f32 0.2, %v1397_v58  ;;  %v1483_v28 = vsel %vm1419_vm1, %v1387_v26, %v1451_v57 }
 0x21a   :  { %v1462_v9 = vmul.f32 0.2, %v1398_v36  ;;  %v1463_v12 = vmul.f32 0.2, %v1399_v47  ;;  %v1464_v13 = vmul.f32 0.2, %v1400_v48  ;;  %v1484_v0 = vsel %vm1420_vm2, %v1388_v42, %v1452_v60 }
 0x21b   :  { %v1465_v17 = vmul.f32 0.2, %v1401_v52  ;;  %v1485_v37 = vsel %vm1421_vm3, %v1389_v49, %v1453_v62  ;;  %v1486_v30 = vsel %vm1422_vm4, %v1390_v50, %v1454_v63  ;;  %v1487_v39 = vsel %vm1423_vm5, %v1391_v54, %v1455_v2 }
 0x21c   :  { %v1488_v40 = vsel %vm1424_vm6, %v1392_v14, %v1456_v7  ;;  %v1489_v44 = vsel %vm1425_vm7, %v1393_v29, %v1457_v10  ;;  %v1490_v5 = vsel %vm1426_vm8, %v1394_v25, %v1458_v16  ;;  %v1491_v8 = vsel %vm1427_vm9, %v1395_v27, %v1459_v22 }
 0x21d   :  { %v1492_v11 = vsel %vm1428_vm10, %v1396_v31, %v1460_v23  ;;  %v1493_v18 = vsel %vm1429_vm11, %v1397_v58, %v1461_v24  ;;  %v1494_v15 = vsel %vm1430_vm12, %v1398_v36, %v1462_v9  ;;  %v1495_v19 = vsel %vm1431_vm13, %v1399_v47, %v1463_v12 }
 0x21e   :  { %v1496_v21 = vsel %vm1432_vm14, %v1400_v48, %v1464_v13  ;;  %v1497_v26 = vsel %vm1433_vm15, %v1401_v52, %v1465_v17  ;;  %v1767_v42 = vpack.c.bf16 %v1483_v28, %v1482_v20  ;;  %v1768_v49 = vpack.c.bf16 %v1485_v37, %v1484_v0 }
 0x21f   :  { %v1769_v50 = vpack.c.bf16 %v1487_v39, %v1486_v30  ;;  %v1770_v54 = vpack.c.bf16 %v1489_v44, %v1488_v40  ;;  %v1771_v14 = vpack.c.bf16 %v1491_v8, %v1490_v5  ;;  %v1772_v29 = vpack.c.bf16 %v1493_v18, %v1492_v11 }
 0x220   :  { %v1773_v25 = vpack.c.bf16 %v1495_v19, %v1494_v15  ;;  %v1774_v27 = vpack.c.bf16 %v1497_v26, %v1496_v21  ;;  %1602 = vst [vmem:[%s2646_s4 + $0x40] sm:$0xff] %v1767_v42  ;;  %1603 = vst [vmem:[%s2646_s4 + $0x48] sm:$0xff] %v1768_v49  ;;  %v1328_v31 = vmul.f32 %v2512_v41, %v2468_v1 }
 0x221   :  { %v1329_v58 = vmul.f32 %v2512_v41, %v2470_v6  ;;  %1604 = vst [vmem:[%s2646_s4 + $0x50] sm:$0xff] %v1769_v50  ;;  %1605 = vst [vmem:[%s2646_s4 + $0x58] sm:$0xff] %v1770_v54  ;;  %v1330_v1 = vmul.f32 %v2512_v41, %v2472_v32  ;;  %v1331_v6 = vmul.f32 %v2512_v41, %v2474_v51 }
 0x222   :  { %1606 = vst [vmem:[%s2646_s4 + $0x60] sm:$0xff] %v1771_v14  ;;  %1607 = vst [vmem:[%s2646_s4 + $0x68] sm:$0xff] %v1772_v29  ;;  %v1332_v36 = vmul.f32 %v2512_v41, %v2476_v33  ;;  %v1333_v47 = vmul.f32 %v2512_v41, %v2478_v55  ;;  %v1334_v32 = vmul.f32 %v2512_v41, %v2480_v56 }
 0x223   :  { %1608 = vst [vmem:[%s2646_s4 + $0x70] sm:$0xff] %v1773_v25  ;;  %1609 = vst [vmem:[%s2646_s4 + $0x78] sm:$0xff] %v1774_v27  ;;  %v1335_v51 = vmul.f32 %v2512_v41, %v2482_v34  ;;  %v1336_v33 = vmul.f32 %v2512_v41, %v2484_v59  ;;  %v1337_v55 = vmul.f32 %v2512_v41, %v2486_v35 }
 0x224   :  { %v1338_v48 = vmul.f32 %v2512_v41, %v2488_v38  ;;  %v1339_v52 = vmul.f32 %v2512_v41, %v2490_v3  ;;  %v1340_v53 = vmul.f32 %v2512_v41, %v2492_v45  ;;  %v1341_v56 = vmul.f32 %v2512_v41, %v2494_v46 }
 0x225   :  { %v1370_v34 = vadd.f32 %v2390_v43, %v1326_v61  ;;  %v1371_v57 = vadd.f32 %v2390_v43, %v1327_v4  ;;  %v1372_v59 = vadd.f32 %v2390_v43, %v1328_v31  ;;  %v1373_v35 = vadd.f32 %v2390_v43, %v1329_v58 }
 0x226   :  { %v1374_v60 = vadd.f32 %v2390_v43, %v1330_v1  ;;  %v1375_v38 = vadd.f32 %v2390_v43, %v1331_v6  ;;  %v1376_v3 = vadd.f32 %v2390_v43, %v1332_v36  ;;  %v1377_v62 = vadd.f32 %v2390_v43, %v1333_v47 }
 0x227   :  { %v1378_v45 = vadd.f32 %v2390_v43, %v1334_v32  ;;  %v1379_v46 = vadd.f32 %v2390_v43, %v1335_v51  ;;  %v1380_v41 = vadd.f32 %v2390_v43, %v1336_v33  ;;  %v1381_v61 = vadd.f32 %v2390_v43, %v1337_v55 }
 0x228   :  { %v1382_v63 = vadd.f32 %v2390_v43, %v1338_v48  ;;  %v1383_v2 = vadd.f32 %v2390_v43, %v1339_v52  ;;  %v1384_v4 = vadd.f32 %v2390_v43, %v1340_v53  ;;  %v1385_v7 = vadd.f32 %v2390_v43, %v1341_v56 }
 0x229   :  { %vm1402_vm0 = vcmp.gt.f32.partialorder %v1370_v34, 0.0  ;;  %vm1403_vm1 = vcmp.gt.f32.partialorder %v1371_v57, 0.0  ;;  %vm1404_vm2 = vcmp.gt.f32.partialorder %v1372_v59, 0.0  ;;  %vm1405_vm3 = vcmp.gt.f32.partialorder %v1373_v35, 0.0 }
 0x22a   :  { %vm1406_vm4 = vcmp.gt.f32.partialorder %v1374_v60, 0.0  ;;  %vm1407_vm5 = vcmp.gt.f32.partialorder %v1375_v38, 0.0  ;;  %vm1408_vm6 = vcmp.gt.f32.partialorder %v1376_v3, 0.0  ;;  %vm1409_vm7 = vcmp.gt.f32.partialorder %v1377_v62, 0.0 }
 0x22b   :  { %vm1410_vm8 = vcmp.gt.f32.partialorder %v1378_v45, 0.0  ;;  %vm1411_vm9 = vcmp.gt.f32.partialorder %v1379_v46, 0.0  ;;  %vm1412_vm10 = vcmp.gt.f32.partialorder %v1380_v41, 0.0  ;;  %vm1413_vm11 = vcmp.gt.f32.partialorder %v1381_v61, 0.0 }
 0x22c   :  { %vm1414_vm12 = vcmp.gt.f32.partialorder %v1382_v63, 0.0  ;;  %vm1415_vm13 = vcmp.gt.f32.partialorder %v1383_v2, 0.0  ;;  %vm1416_vm14 = vcmp.gt.f32.partialorder %v1384_v4, 0.0  ;;  %vm1417_vm15 = vcmp.gt.f32.partialorder %v1385_v7, 0.0 }
 0x22d   :  { %v1434_v10 = vmul.f32 0.2, %v1370_v34  ;;  %v1435_v16 = vmul.f32 0.2, %v1371_v57  ;;  %v1436_v20 = vmul.f32 0.2, %v1372_v59 }
 0x22e   :  { %v1437_v43 = vmul.f32 0.2, %v1373_v35  ;;  %v1438_v22 = vmul.f32 0.2, %v1374_v60  ;;  %v1439_v23 = vmul.f32 0.2, %v1375_v38 }
 0x22f   :  { %v1440_v24 = vmul.f32 0.2, %v1376_v3  ;;  %v1441_v28 = vmul.f32 0.2, %v1377_v62  ;;  %v1442_v9 = vmul.f32 0.2, %v1378_v45  ;;  %v1466_v12 = vsel %vm1402_vm0, %v1370_v34, %v1434_v10 }
 0x230   :  { %v1443_v13 = vmul.f32 0.2, %v1379_v46  ;;  %v1444_v0 = vmul.f32 0.2, %v1380_v41  ;;  %v1445_v17 = vmul.f32 0.2, %v1381_v61  ;;  %v1467_v37 = vsel %vm1403_vm1, %v1371_v57, %v1435_v16 }
 0x231   :  { %v1446_v30 = vmul.f32 0.2, %v1382_v63  ;;  %v1447_v39 = vmul.f32 0.2, %v1383_v2  ;;  %v1448_v40 = vmul.f32 0.2, %v1384_v4  ;;  %v1468_v44 = vsel %vm1404_vm2, %v1372_v59, %v1436_v20 }
 0x232   :  { %v1449_v5 = vmul.f32 0.2, %v1385_v7  ;;  %v1469_v8 = vsel %vm1405_vm3, %v1373_v35, %v1437_v43  ;;  %v1470_v11 = vsel %vm1406_vm4, %v1374_v60, %v1438_v22  ;;  %v1471_v18 = vsel %vm1407_vm5, %v1375_v38, %v1439_v23 }
 0x233   :  { %v1472_v15 = vsel %vm1408_vm6, %v1376_v3, %v1440_v24  ;;  %v1473_v19 = vsel %vm1409_vm7, %v1377_v62, %v1441_v28  ;;  %v1474_v21 = vsel %vm1410_vm8, %v1378_v45, %v1442_v9  ;;  %v1475_v26 = vsel %vm1411_vm9, %v1379_v46, %v1443_v13 }
 0x234   :  { %v1476_v42 = vsel %vm1412_vm10, %v1380_v41, %v1444_v0  ;;  %v1477_v49 = vsel %vm1413_vm11, %v1381_v61, %v1445_v17  ;;  %v1478_v50 = vsel %vm1414_vm12, %v1382_v63, %v1446_v30  ;;  %v1479_v54 = vsel %vm1415_vm13, %v1383_v2, %v1447_v39 }
 0x235   :  { %v1480_v14 = vsel %vm1416_vm14, %v1384_v4, %v1448_v40  ;;  %v1481_v29 = vsel %vm1417_vm15, %v1385_v7, %v1449_v5  ;;  %v1759_v25 = vpack.c.bf16 %v1467_v37, %v1466_v12  ;;  %v1760_v27 = vpack.c.bf16 %v1469_v8, %v1468_v44 }
 0x236   :  { %v1761_v31 = vpack.c.bf16 %v1471_v18, %v1470_v11  ;;  %v1762_v58 = vpack.c.bf16 %v1473_v19, %v1472_v15  ;;  %v1763_v1 = vpack.c.bf16 %v1475_v26, %v1474_v21  ;;  %v1764_v6 = vpack.c.bf16 %v1477_v49, %v1476_v42 }
 0x237   :  { %v1765_v36 = vpack.c.bf16 %v1479_v54, %v1478_v50  ;;  %v1766_v47 = vpack.c.bf16 %v1481_v29, %v1480_v14  ;;  %1594 = vst [vmem:[%s2646_s4] sm:$0xff] %v1759_v25  ;;  %1595 = vst [vmem:[%s2646_s4 + $0x8] sm:$0xff] %v1760_v27 }
 0x238   :  { %1596 = vst [vmem:[%s2646_s4 + $0x10] sm:$0xff] %v1761_v31  ;;  %1597 = vst [vmem:[%s2646_s4 + $0x18] sm:$0xff] %v1762_v58 }
 0x239   :  { %1598 = vst [vmem:[%s2646_s4 + $0x20] sm:$0xff] %v1763_v1  ;;  %1599 = vst [vmem:[%s2646_s4 + $0x28] sm:$0xff] %v1764_v6 }
 0x23a   :  { %1600 = vst [vmem:[%s2646_s4 + $0x30] sm:$0xff] %v1765_v36  ;;  %1601 = vst [vmem:[%s2646_s4 + $0x38] sm:$0xff] %v1766_v47 }

// kernel: discriminator_forward.7
= control target key start
LH: loop header
LB: loop body
LE: loop exit
PB: predicated region body
PF: predicated region fallthrough
CT: control target
= control target key end

     0   :  { %s1430_s1 = inlined_call_operand.vmem [shape: bf16[256,512], index: 1, kind: input, shape index: {}]   ;;  %s1431_s0 = inlined_call_operand.vmem [shape: bf16[32,256], index: 0, kind: input, shape index: {}]   ;;  %s1432_s2 = inlined_call_operand.vmem [shape: f32[32,1], index: 2, kind: input, shape index: {}]   ;;  %s1433_s3 = inlined_call_operand.vmem [shape: f32[32,1], index: 3, kind: input, shape index: {}]   ;;  %s1434_s4 = inlined_call_operand.vmem [shape: bf16[32,512], index: 4, kind: output, shape index: {}]  }
   0x1   :  { %v918_v0 = vld [vmem:[%s1430_s1 + $0x4] ss:$16 sps:$4 sm:$0xff]   ;;  %v920_v1 = vld [vmem:[%s1430_s1 + $0xc] ss:$16 sps:$4 sm:$0xff]   ;;  %v922_v2 = vld [vmem:[%s1430_s1] ss:$16 sps:$4 sm:$0xff]  }
   0x2   :  { %425 = vmatprep.subr.bf16.mxu0 %v918_v0  ;;  %v923_v3 = vld [vmem:[%s1430_s1 + $0x8] ss:$16 sps:$4 sm:$0xff]   ;;  %478 = vmatprep.subr.bf16.mxu1 %v920_v1  ;;  %v924_v4 = vld [vmem:[%s1430_s1 + $0x24] ss:$16 sps:$4 sm:$0xff]   ;;  %v926_v5 = vld [vmem:[%s1430_s1 + $0x2c] ss:$16 sps:$4 sm:$0xff]  }
   0x3   :  { %426 = vmatpush1.bf16.msra.mxu0 %v922_v2  ;;  %479 = vmatpush1.bf16.msra.mxu1 %v923_v3  ;;  %v928_v6 = vld [vmem:[%s1430_s1 + $0x20] ss:$16 sps:$4 sm:$0xff]   ;;  %v929_v7 = vld [vmem:[%s1430_s1 + $0x28] ss:$16 sps:$4 sm:$0xff]   ;;  %v930_v8 = vld [vmem:[%s1430_s1 + $0x44] ss:$16 sps:$4 sm:$0xff]  }
   0x4   :  { %427 = vmatprep.subr.bf16.mxu0 %v924_v4  ;;  %480 = vmatprep.subr.bf16.mxu1 %v926_v5  ;;  %v932_v9 = vld [vmem:[%s1430_s1 + $0x4c] ss:$16 sps:$4 sm:$0xff]   ;;  %v934_v10 = vld [vmem:[%s1430_s1 + $0x40] ss:$16 sps:$4 sm:$0xff]   ;;  %v935_v11 = vld [vmem:[%s1430_s1 + $0x48] ss:$16 sps:$4 sm:$0xff]  }
   0x5   :  { %v936_v12 = vld [vmem:[%s1430_s1 + $0x64] ss:$16 sps:$4 sm:$0xff]   ;;  %v938_v13 = vld [vmem:[%s1430_s1 + $0x6c] ss:$16 sps:$4 sm:$0xff]   ;;  %v940_v14 = vld [vmem:[%s1430_s1 + $0x60] ss:$16 sps:$4 sm:$0xff]  }
   0x6   :  { %v941_v15 = vld [vmem:[%s1430_s1 + $0x68] ss:$16 sps:$4 sm:$0xff]   ;;  %v942_v16 = vld [vmem:[%s1430_s1 + $0x84] ss:$16 sps:$4 sm:$0xff]   ;;  %v944_v17 = vld [vmem:[%s1430_s1 + $0x8c] ss:$16 sps:$4 sm:$0xff]  }
   0x7   :  { %428 = vmatpush1.bf16.msra.mxu0 %v928_v6  ;;  %481 = vmatpush1.bf16.msra.mxu1 %v929_v7  ;;  %v946_v18 = vld [vmem:[%s1430_s1 + $0x80] ss:$16 sps:$4 sm:$0xff]   ;;  %v947_v19 = vld [vmem:[%s1430_s1 + $0x88] ss:$16 sps:$4 sm:$0xff]   ;;  %v948_v20 = vld [vmem:[%s1430_s1 + $0xa4] ss:$16 sps:$4 sm:$0xff]  }
   0x8   :  { %429 = vmatprep.subr.bf16.mxu0 %v930_v8  ;;  %482 = vmatprep.subr.bf16.mxu1 %v932_v9  ;;  %v950_v21 = vld [vmem:[%s1430_s1 + $0xac] ss:$16 sps:$4 sm:$0xff]   ;;  %v952_v22 = vld [vmem:[%s1430_s1 + $0xa0] ss:$16 sps:$4 sm:$0xff]   ;;  %v953_v23 = vld [vmem:[%s1430_s1 + $0xa8] ss:$16 sps:$4 sm:$0xff]  }
   0x9   :  { %v954_v24 = vld [vmem:[%s1430_s1 + $0xc4] ss:$16 sps:$4 sm:$0xff]   ;;  %v956_v25 = vld [vmem:[%s1430_s1 + $0xcc] ss:$16 sps:$4 sm:$0xff]   ;;  %v958_v26 = vld [vmem:[%s1430_s1 + $0xc0] ss:$16 sps:$4 sm:$0xff]  }
   0xa   :  { %v959_v27 = vld [vmem:[%s1430_s1 + $0xc8] ss:$16 sps:$4 sm:$0xff]   ;;  %v960_v28 = vld [vmem:[%s1430_s1 + $0xe4] ss:$16 sps:$4 sm:$0xff]   ;;  %v962_v29 = vld [vmem:[%s1430_s1 + $0xec] ss:$16 sps:$4 sm:$0xff]  }
   0xb   :  { %430 = vmatpush1.bf16.msra.mxu0 %v934_v10  ;;  %483 = vmatpush1.bf16.msra.mxu1 %v935_v11  ;;  %v964_v30 = vld [vmem:[%s1430_s1 + $0xe0] ss:$16 sps:$4 sm:$0xff]   ;;  %v965_v31 = vld [vmem:[%s1430_s1 + $0xe8] ss:$16 sps:$4 sm:$0xff]   ;;  %v966_v32 = vld [vmem:[%s1430_s1 + $0x104] ss:$16 sps:$4 sm:$0xff]  }
   0xc   :  { %431 = vmatprep.subr.bf16.mxu0 %v936_v12  ;;  %484 = vmatprep.subr.bf16.mxu1 %v938_v13  ;;  %v968_v33 = vld [vmem:[%s1430_s1 + $0x10c] ss:$16 sps:$4 sm:$0xff]   ;;  %v970_v34 = vld [vmem:[%s1430_s1 + $0x100] ss:$16 sps:$4 sm:$0xff]   ;;  %v971_v35 = vld [vmem:[%s1430_s1 + $0x108] ss:$16 sps:$4 sm:$0xff]  }
   0xd   :  { %v972_v36 = vld [vmem:[%s1430_s1 + $0x124] ss:$16 sps:$4 sm:$0xff]   ;;  %v974_v37 = vld [vmem:[%s1430_s1 + $0x12c] ss:$16 sps:$4 sm:$0xff]   ;;  %v976_v38 = vld [vmem:[%s1430_s1 + $0x120] ss:$16 sps:$4 sm:$0xff]  }
   0xe   :  { %v977_v39 = vld [vmem:[%s1430_s1 + $0x128] ss:$16 sps:$4 sm:$0xff]   ;;  %v978_v40 = vld [vmem:[%s1430_s1 + $0x144] ss:$16 sps:$4 sm:$0xff]   ;;  %v980_v41 = vld [vmem:[%s1430_s1 + $0x14c] ss:$16 sps:$4 sm:$0xff]  }
   0xf   :  { %432 = vmatpush1.bf16.msra.mxu0 %v940_v14  ;;  %485 = vmatpush1.bf16.msra.mxu1 %v941_v15  ;;  %v982_v42 = vld [vmem:[%s1430_s1 + $0x140] ss:$16 sps:$4 sm:$0xff]   ;;  %v983_v43 = vld [vmem:[%s1430_s1 + $0x148] ss:$16 sps:$4 sm:$0xff]   ;;  %v984_v44 = vld [vmem:[%s1430_s1 + $0x164] ss:$16 sps:$4 sm:$0xff]  }
  0x10   :  { %433 = vmatprep.subr.bf16.mxu0 %v942_v16  ;;  %486 = vmatprep.subr.bf16.mxu1 %v944_v17  ;;  %v986_v45 = vld [vmem:[%s1430_s1 + $0x16c] ss:$16 sps:$4 sm:$0xff]   ;;  %v988_v46 = vld [vmem:[%s1430_s1 + $0x160] ss:$16 sps:$4 sm:$0xff]   ;;  %v989_v48 = vld [vmem:[%s1430_s1 + $0x168] ss:$16 sps:$4 sm:$0xff]  }
  0x11   :  { %v1016_v47 = vld [vmem:[%s1431_s0 + $0x4] ss:$8 sps:$4 sm:$0xff]   ;;  %v994_v51 = vld [vmem:[%s1430_s1 + $0x180] ss:$16 sps:$4 sm:$0xff]   ;;  %v995_v52 = vld [vmem:[%s1430_s1 + $0x188] ss:$16 sps:$4 sm:$0xff]  }
  0x12   :  { %v990_v49 = vld [vmem:[%s1430_s1 + $0x184] ss:$16 sps:$4 sm:$0xff]   ;;  %v992_v50 = vld [vmem:[%s1430_s1 + $0x18c] ss:$16 sps:$4 sm:$0xff]   ;;  %457 = vmatprep.mubr.bf16.mxu0 %v1016_v47  ;;  %510 = vmatprep.mubr.bf16.mxu1 %v1016_v47  ;;  %v1000_v55 = vld [vmem:[%s1430_s1 + $0x1a0] ss:$16 sps:$4 sm:$0xff]  }
  0x13   :  { %434 = vmatpush1.bf16.msra.mxu0 %v946_v18  ;;  %487 = vmatpush1.bf16.msra.mxu1 %v947_v19  ;;  %v996_v53 = vld [vmem:[%s1430_s1 + $0x1a4] ss:$16 sps:$4 sm:$0xff]   ;;  %v998_v54 = vld [vmem:[%s1430_s1 + $0x1ac] ss:$16 sps:$4 sm:$0xff]   ;;  %v1001_v56 = vld [vmem:[%s1430_s1 + $0x1a8] ss:$16 sps:$4 sm:$0xff]  }
  0x14   :  { %435 = vmatprep.subr.bf16.mxu0 %v948_v20  ;;  %488 = vmatprep.subr.bf16.mxu1 %v950_v21  ;;  %v1002_v57 = vld [vmem:[%s1430_s1 + $0x1c4] ss:$16 sps:$4 sm:$0xff]   ;;  %v1004_v58 = vld [vmem:[%s1430_s1 + $0x1cc] ss:$16 sps:$4 sm:$0xff]   ;;  %v1006_v59 = vld [vmem:[%s1430_s1 + $0x1c0] ss:$16 sps:$4 sm:$0xff]  }
  0x15   :  { %v1007_v60 = vld [vmem:[%s1430_s1 + $0x1c8] ss:$16 sps:$4 sm:$0xff]   ;;  %v1008_v61 = vld [vmem:[%s1430_s1 + $0x1e4] ss:$16 sps:$4 sm:$0xff]   ;;  %v1010_v62 = vld [vmem:[%s1430_s1 + $0x1ec] ss:$16 sps:$4 sm:$0xff]  }
  0x16   :  { %v1012_v63 = vld [vmem:[%s1430_s1 + $0x1e0] ss:$16 sps:$4 sm:$0xff]   ;;  %v1013_v0 = vld [vmem:[%s1430_s1 + $0x1e8] ss:$16 sps:$4 sm:$0xff]   ;;  %v1017_v2 = vld [vmem:[%s1431_s0 + $0x14] ss:$8 sps:$4 sm:$0xff]  }
  0x17   :  { %436 = vmatpush1.bf16.msra.mxu0 %v952_v22  ;;  %489 = vmatpush1.bf16.msra.mxu1 %v953_v23  ;;  %v1014_v1 = vld [vmem:[%s1431_s0] ss:$8 sps:$4 sm:$0xff]   ;;  %v1019_v3 = vld [vmem:[%s1431_s0 + $0x10] ss:$8 sps:$4 sm:$0xff]   ;;  %v1028_v4 = vmov 0  }
  0x18   :  { %437 = vmatprep.subr.bf16.mxu0 %v954_v24  ;;  %490 = vmatprep.subr.bf16.mxu1 %v956_v25 }
  0x19   :  { %917 = vset.pattern.permute.xlu1 %v1028_v4  ;;  %916 = vset.pattern.permute.xlu0 %v1028_v4  ;;  %v686_v4 = vld [vmem:[%s1433_s3 + $0x18] sm:$0xff] }
  0x1b   :  { %438 = vmatpush1.bf16.msra.mxu0 %v958_v26  ;;  %491 = vmatpush1.bf16.msra.mxu1 %v959_v27 }
  0x1c   :  { %439 = vmatprep.subr.bf16.mxu0 %v960_v28  ;;  %492 = vmatprep.subr.bf16.mxu1 %v962_v29 }
  0x1f   :  { %440 = vmatpush1.bf16.msra.mxu0 %v964_v30  ;;  %493 = vmatpush1.bf16.msra.mxu1 %v965_v31 }
  0x20   :  { %441 = vmatprep.subr.bf16.mxu0 %v966_v32  ;;  %494 = vmatprep.subr.bf16.mxu1 %v968_v33 }
  0x23   :  { %442 = vmatpush1.bf16.msra.mxu0 %v970_v34  ;;  %495 = vmatpush1.bf16.msra.mxu1 %v971_v35 }
  0x24   :  { %443 = vmatprep.subr.bf16.mxu0 %v972_v36  ;;  %496 = vmatprep.subr.bf16.mxu1 %v974_v37 }
  0x27   :  { %444 = vmatpush1.bf16.msra.mxu0 %v976_v38  ;;  %497 = vmatpush1.bf16.msra.mxu1 %v977_v39 }
  0x28   :  { %445 = vmatprep.subr.bf16.mxu0 %v978_v40  ;;  %498 = vmatprep.subr.bf16.mxu1 %v980_v41 }
  0x2b   :  { %446 = vmatpush1.bf16.msra.mxu0 %v982_v42  ;;  %499 = vmatpush1.bf16.msra.mxu1 %v983_v43 }
  0x2c   :  { %447 = vmatprep.subr.bf16.mxu0 %v984_v44  ;;  %500 = vmatprep.subr.bf16.mxu1 %v986_v45 }
  0x2f   :  { %448 = vmatpush1.bf16.msra.mxu0 %v988_v46  ;;  %501 = vmatpush1.bf16.msra.mxu1 %v989_v48 }
  0x30   :  { %449 = vmatprep.subr.bf16.mxu0 %v990_v49  ;;  %502 = vmatprep.subr.bf16.mxu1 %v992_v50 }
  0x33   :  { %450 = vmatpush1.bf16.msra.mxu0 %v994_v51  ;;  %503 = vmatpush1.bf16.msra.mxu1 %v995_v52 }
  0x34   :  { %451 = vmatprep.subr.bf16.mxu0 %v996_v53  ;;  %504 = vmatprep.subr.bf16.mxu1 %v998_v54 }
  0x37   :  { %452 = vmatpush1.bf16.msra.mxu0 %v1000_v55  ;;  %505 = vmatpush1.bf16.msra.mxu1 %v1001_v56 }
  0x38   :  { %453 = vmatprep.subr.bf16.mxu0 %v1002_v57  ;;  %506 = vmatprep.subr.bf16.mxu1 %v1004_v58 }
  0x3b   :  { %454 = vmatpush1.bf16.msra.mxu0 %v1006_v59  ;;  %507 = vmatpush1.bf16.msra.mxu1 %v1007_v60 }
  0x3c   :  { %455 = vmatprep.subr.bf16.mxu0 %v1008_v61  ;;  %508 = vmatprep.subr.bf16.mxu1 %v1010_v62  ;;  %v644_v61 = vld [vmem:[%s1432_s2 + $0x8] sm:$0xff]  ;;  %v645_v62 = vld [vmem:[%s1432_s2 + $0x10] sm:$0xff] }
  0x3f   :  { %456 = vmatpush1.bf16.msra.mxu0 %v1012_v63  ;;  %509 = vmatpush1.bf16.msra.mxu1 %v1013_v0  ;;  %v643_v63 = vld [vmem:[%s1432_s2] sm:$0xff]  ;;  %v646_v0 = vld [vmem:[%s1432_s2 + $0x18] sm:$0xff] }
  0x42   :  { %458 = vmatmul.mubr.bf16.vlgmr.msra.gmra.mrb[0].mxu0 %v1014_v1  ;;  %511 = vmatmul.mubr.bf16.vlgmr.msra.gmra.mrb[0].mxu1 %v1014_v1  ;;  %v683_v1 = vld [vmem:[%s1433_s3] sm:$0xff] }
  0x43   :  { %467 = vmatprep.mubr.bf16.mxu0 %v1017_v2  ;;  %520 = vmatprep.mubr.bf16.mxu1 %v1017_v2  ;;  %v684_v2 = vld [vmem:[%s1433_s3 + $0x8] sm:$0xff] }
  0x4a   :  { %468 = vmatmul.mubr.bf16.gmra.mrb[4].mxu0 %v1019_v3  ;;  %521 = vmatmul.mubr.bf16.gmra.mrb[4].mxu1 %v1019_v3  ;;  %v685_v3 = vld [vmem:[%s1433_s3 + $0x10] sm:$0xff] }
 0x115   :  { %v1258_v5 = vpop.f32.mrb[0].mxu0  ;;  %v1260_v6 = vpop.f32.mrb[0].mxu1 }
 0x116   :  { %v555_v7 = vmul.f32 %v1258_v5, %v1258_v5  ;;  %v1264_v8 = vpop.f32.mrb[1].mxu0  ;;  %v1266_v9 = vpop.f32.mrb[1].mxu1  ;;  %v557_v14 = vmul.f32 %v1260_v6, %v1260_v6 }
 0x117   :  { %v531_v10 = vadd.f32 %v1264_v8, %v1258_v5  ;;  %v556_v11 = vmul.f32 %v1264_v8, %v1264_v8  ;;  %v1272_v12 = vpop.f32.mrb[2].mxu0  ;;  %v1274_v13 = vpop.f32.mrb[2].mxu1  ;;  %v558_v26 = vmul.f32 %v1266_v9, %v1266_v9 }
 0x118   :  { %v559_v15 = vmul.f32 %v1272_v12, %v1272_v12  ;;  %v1280_v16 = vpop.f32.mrb[3].mxu0  ;;  %v1282_v17 = vpop.f32.mrb[3].mxu1  ;;  %v561_v22 = vmul.f32 %v1274_v13, %v1274_v13 }
 0x119   :  { %v536_v18 = vadd.f32 %v1280_v16, %v1272_v12  ;;  %v560_v19 = vmul.f32 %v1280_v16, %v1280_v16  ;;  %v532_v20 = vadd.f32 %v531_v10, %v1260_v6  ;;  %v571_v21 = vadd.f32 %v556_v11, %v555_v7 }
 0x11a   :  { %v562_v30 = vmul.f32 %v1282_v17, %v1282_v17 }
 0x11b   :  { %v533_v23 = vadd.f32 %v532_v20, %v1266_v9  ;;  %v576_v24 = vadd.f32 %v560_v19, %v559_v15  ;;  %v537_v25 = vadd.f32 %v536_v18, %v1274_v13  ;;  %v572_v27 = vadd.f32 %v571_v21, %v557_v14 }
 0x11d   :  { %v1295_v28 = vpop.f32.mrb[4].mxu1  ;;  %534 = vadd.xlane.f32.xlu0 %v533_v23  ;;  %v1297_v29 = vpop.f32.mrb[4].mxu0  ;;  %v577_v31 = vadd.f32 %v576_v24, %v561_v22  ;;  %v538_v32 = vadd.f32 %v537_v25, %v1282_v17  ;;  %v573_v36 = vadd.f32 %v572_v27, %v558_v26 }
 0x11e   :  { %v563_v33 = vmul.f32 %v1297_v29, %v1297_v29  ;;  %v1304_v34 = vpop.f32.mrb[5].mxu0  ;;  %v1306_v35 = vpop.f32.mrb[5].mxu1  ;;  %v565_v42 = vmul.f32 %v1295_v28, %v1295_v28 }
 0x11f   :  { %v541_v37 = vadd.f32 %v1304_v34, %v1297_v29  ;;  %v564_v38 = vmul.f32 %v1304_v34, %v1304_v34  ;;  %v1312_v39 = vpop.f32.mrb[6].mxu0  ;;  %v1314_v40 = vpop.f32.mrb[6].mxu1  ;;  %v578_v41 = vadd.f32 %v577_v31, %v562_v30  ;;  %v566_v54 = vmul.f32 %v1306_v35, %v1306_v35 }
 0x120   :  { %v567_v43 = vmul.f32 %v1312_v39, %v1312_v39  ;;  %v1320_v44 = vpop.f32.mrb[7].mxu0  ;;  %v1322_v45 = vpop.f32.mrb[7].mxu1  ;;  %v569_v50 = vmul.f32 %v1314_v40, %v1314_v40 }
 0x121   :  { %v546_v46 = vadd.f32 %v1320_v44, %v1312_v39  ;;  %v568_v47 = vmul.f32 %v1320_v44, %v1320_v44  ;;  %579 = vadd.xlane.f32.xlu1 %v578_v41  ;;  %539 = vadd.xlane.f32.xlu0 %v538_v32  ;;  %v542_v48 = vadd.f32 %v541_v37, %v1295_v28 }
 0x122   :  { %v581_v49 = vadd.f32 %v564_v38, %v563_v33  ;;  %v570_v56 = vmul.f32 %v1322_v45, %v1322_v45 }
 0x123   :  { %v586_v51 = vadd.f32 %v568_v47, %v567_v43  ;;  %v547_v52 = vadd.f32 %v546_v46, %v1314_v40  ;;  %v543_v53 = vadd.f32 %v542_v48, %v1306_v35 }
 0x124   :  { %v582_v55 = vadd.f32 %v581_v49, %v565_v42 }
 0x125   :  { %574 = vadd.xlane.f32.xlu0 %v573_v36  ;;  %v548_v57 = vadd.f32 %v547_v52, %v1322_v45  ;;  %v587_v58 = vadd.f32 %v586_v51, %v569_v50  ;;  %544 = vadd.xlane.f32.xlu1 %v543_v53 }
 0x126   :  { %v583_v59 = vadd.f32 %v582_v55, %v566_v54 }
 0x127   :  { %v588_v60 = vadd.f32 %v587_v58, %v570_v56 }
 0x129   :  { %584 = vadd.xlane.f32.xlu0 %v583_v59  ;;  %549 = vadd.xlane.f32.xlu1 %v548_v57 }
 0x13a   :  { %654 = vperm.xlu1 %917, %v644_v61  }
 0x13e   :  { %659 = vperm.xlu1 %917, %v645_v62  }
 0x13f   :  { %649 = vperm.xlu0 %916, %v643_v63  }
 0x142   :  { %664 = vperm.xlu1 %917, %v646_v0  }
 0x146   :  { %689 = vperm.xlu1 %917, %v683_v1  }
 0x14a   :  { %694 = vperm.xlu1 %917, %v684_v2  }
 0x14e   :  { %699 = vperm.xlu1 %917, %v685_v3  }
 0x172   :  { %589 = vadd.xlane.f32.xlu1 %v588_v60 }
 0x183   :  { %704 = vperm.xlu1 %917, %v686_v4  }
 0x1aa   :  { %v535_v7 = vpop.xlane.xlu0 %534 }
 0x1ab   :  { %v551_v14 = vmul.f32 0.001953125, %v535_v7 }
 0x1ad   :  { %v595_v22 = vmul.f32 %v551_v14, %v551_v14  ;;  %v603_v61 = vsub.f32 %v1258_v5, %v551_v14  ;;  %v604_v62 = vsub.f32 %v1264_v8, %v551_v14 }
 0x1ae   :  { %v580_v10 = vpop.xlane.xlu1 %579  ;;  %v540_v11 = vpop.xlane.xlu0 %539 }
 0x1af   :  { %v552_v15 = vmul.f32 0.001953125, %v540_v11  ;;  %v592_v18 = vmul.f32 0.001953125, %v580_v10 }
 0x1b1   :  { %v596_v19 = vmul.f32 %v552_v15, %v552_v15  ;;  %v607_v50 = vsub.f32 %v1272_v12, %v552_v15  ;;  %v608_v51 = vsub.f32 %v1280_v16, %v552_v15  ;;  %v609_v52 = vsub.f32 %v1274_v13, %v552_v15 }
 0x1b2   :  { %v575_v20 = vpop.xlane.xlu0 %574  ;;  %v545_v24 = vpop.xlane.xlu1 %544  ;;  %v610_v53 = vsub.f32 %v1282_v17, %v552_v15  ;;  %v605_v12 = vsub.f32 %v1260_v6, %v551_v14  ;;  %v606_v16 = vsub.f32 %v1266_v9, %v551_v14 }
 0x1b3   :  { %v600_v21 = vsub.f32 %v592_v18, %v596_v19  ;;  %v591_v23 = vmul.f32 0.001953125, %v575_v20  ;;  %v553_v25 = vmul.f32 0.001953125, %v545_v24 }
 0x1b5   :  { %v620_v26 = vadd.f32 1e-05, %v600_v21  ;;  %v599_v27 = vsub.f32 %v591_v23, %v595_v22  ;;  %v597_v33 = vmul.f32 %v553_v25, %v553_v25  ;;  %v611_v13 = vsub.f32 %v1297_v29, %v553_v25 }
 0x1b6   :  { %v585_v30 = vpop.xlane.xlu0 %584  ;;  %v550_v36 = vpop.xlane.xlu1 %549  ;;  %v612_v17 = vsub.f32 %v1304_v34, %v553_v25  ;;  %v613_v63 = vsub.f32 %v1295_v28, %v553_v25  ;;  %v614_v0 = vsub.f32 %v1306_v35, %v553_v25 }
 0x1b7   :  { %1020 = vrsqrt.f32 %v620_v26  ;;  %v619_v31 = vadd.f32 1e-05, %v599_v27  ;;  %v593_v32 = vmul.f32 0.001953125, %v585_v30  ;;  %v1362_v37 = vmul.f32 0.001953125, %v550_v36 }
 0x1b9   :  { %1022 = vrsqrt.f32 %v619_v31  ;;  %v601_v38 = vsub.f32 %v593_v32, %v597_v33  ;;  %v615_v41 = vsub.f32 %v1312_v39, %v1362_v37  ;;  %v616_v42 = vsub.f32 %v1320_v44, %v1362_v37 }
 0x1ba   :  { %v617_v43 = vsub.f32 %v1314_v40, %v1362_v37  ;;  %v655_v47 = vpop.permute.xlu1 %654  ;;  %v618_v48 = vsub.f32 %v1322_v45, %v1362_v37 }
 0x1bb   :  { %v621_v46 = vadd.f32 1e-05, %v601_v38 }
 0x1bd   :  { %1024 = vrsqrt.f32 %v621_v46 }
 0x1be   :  { %v660_v49 = vpop.permute.xlu1 %659  ;;  %v650_v1 = vpop.permute.xlu0 %649 }
 0x1c1   :  { %v1021_v54 = vpop.eup %1020 }
 0x1c2   :  { %v631_v55 = vmul.f32 %v1021_v54, %v607_v50  ;;  %v632_v56 = vmul.f32 %v1021_v54, %v608_v51  ;;  %v633_v57 = vmul.f32 %v1021_v54, %v609_v52  ;;  %v634_v58 = vmul.f32 %v1021_v54, %v610_v53  ;;  %v1376_v60 = vpop.permute.xlu1 %664 }
 0x1c3   :  { %v1023_v59 = vpop.eup %1022 }
 0x1c4   :  { %v627_v2 = vmul.f32 %v1023_v59, %v603_v61  ;;  %v628_v3 = vmul.f32 %v1023_v59, %v604_v62  ;;  %v629_v4 = vmul.f32 %v1023_v59, %v605_v12  ;;  %v630_v7 = vmul.f32 %v1023_v59, %v606_v16 }
 0x1c5   :  { %v671_v5 = vmul.f32 %v655_v47, %v631_v55  ;;  %v672_v10 = vmul.f32 %v655_v47, %v632_v56  ;;  %v673_v8 = vmul.f32 %v655_v47, %v633_v57  ;;  %v674_v11 = vmul.f32 %v655_v47, %v634_v58 }
 0x1c6   :  { %v667_v15 = vmul.f32 %v650_v1, %v627_v2  ;;  %v668_v9 = vmul.f32 %v650_v1, %v628_v3  ;;  %v669_v14 = vmul.f32 %v650_v1, %v629_v4  ;;  %v670_v29 = vmul.f32 %v650_v1, %v630_v7  ;;  %v690_v18 = vpop.permute.xlu1 %689 }
 0x1c7   :  { %v1025_v6 = vpop.eup %1024 }
 0x1c8   :  { %v635_v34 = vmul.f32 %v1025_v6, %v611_v13  ;;  %v636_v19 = vmul.f32 %v1025_v6, %v612_v17  ;;  %v637_v28 = vmul.f32 %v1025_v6, %v613_v63  ;;  %v638_v20 = vmul.f32 %v1025_v6, %v614_v0 }
 0x1c9   :  { %v707_v35 = vadd.f32 %v690_v18, %v667_v15  ;;  %v708_v21 = vadd.f32 %v690_v18, %v668_v9  ;;  %v709_v22 = vadd.f32 %v690_v18, %v669_v14  ;;  %v710_v23 = vadd.f32 %v690_v18, %v670_v29 }
 0x1ca   :  { %v675_v24 = vmul.f32 %v660_v49, %v635_v34  ;;  %v676_v25 = vmul.f32 %v660_v49, %v636_v19  ;;  %v677_v26 = vmul.f32 %v660_v49, %v637_v28  ;;  %v678_v27 = vmul.f32 %v660_v49, %v638_v20  ;;  %v695_v30 = vpop.permute.xlu1 %694 }
 0x1cb   :  { %vm723_vm0 = vcmp.gt.f32.partialorder %v707_v35, 0.0  ;;  %vm724_vm1 = vcmp.gt.f32.partialorder %v708_v21, 0.0  ;;  %vm725_vm2 = vcmp.gt.f32.partialorder %v709_v22, 0.0  ;;  %vm726_vm3 = vcmp.gt.f32.partialorder %v710_v23, 0.0 }
 0x1cc   :  { %v739_v31 = vmul.f32 0.2, %v707_v35  ;;  %v740_v32 = vmul.f32 0.2, %v708_v21  ;;  %v741_v33 = vmul.f32 0.2, %v709_v22  ;;  %v711_v36 = vadd.f32 %v695_v30, %v671_v5 }
 0x1cd   :  { %v742_v38 = vmul.f32 0.2, %v710_v23  ;;  %v712_v46 = vadd.f32 %v695_v30, %v672_v10  ;;  %v713_v47 = vadd.f32 %v695_v30, %v673_v8  ;;  %v714_v50 = vadd.f32 %v695_v30, %v674_v11 }
 0x1ce   :  { %v755_v51 = vsel %vm723_vm0, %v707_v35, %v739_v31  ;;  %v756_v52 = vsel %vm724_vm1, %v708_v21, %v740_v32  ;;  %v757_v53 = vsel %vm725_vm2, %v709_v22, %v741_v33  ;;  %vm727_vm4 = vcmp.gt.f32.partialorder %v711_v36, 0.0  ;;  %v700_v49 = vpop.permute.xlu1 %699 }
 0x1cf   :  { %v758_v54 = vsel %vm726_vm3, %v710_v23, %v742_v38  ;;  %v907_v55 = vpack.c.bf16 %v756_v52, %v755_v51  ;;  %vm728_vm5 = vcmp.gt.f32.partialorder %v712_v46, 0.0  ;;  %vm729_vm6 = vcmp.gt.f32.partialorder %v713_v47, 0.0 }
 0x1d0   :  { %v908_v56 = vpack.c.bf16 %v758_v54, %v757_v53  ;;  %vm730_vm7 = vcmp.gt.f32.partialorder %v714_v50, 0.0  ;;  %v743_v57 = vmul.f32 0.2, %v711_v36  ;;  %v744_v58 = vmul.f32 0.2, %v712_v46 }
 0x1d1   :  { %819 = vst [vmem:[%s1434_s4] sm:$0xff] %v907_v55  ;;  %v745_v59 = vmul.f32 0.2, %v713_v47  ;;  %v746_v61 = vmul.f32 0.2, %v714_v50  ;;  %v715_v62 = vadd.f32 %v700_v49, %v675_v24  ;;  %v716_v12 = vadd.f32 %v700_v49, %v676_v25 }
 0x1d2   :  { %820 = vst [vmem:[%s1434_s4 + $0x8] sm:$0xff] %v908_v56  ;;  %v759_v16 = vsel %vm727_vm4, %v711_v36, %v743_v57  ;;  %v760_v13 = vsel %vm728_vm5, %v712_v46, %v744_v58  ;;  %v717_v17 = vadd.f32 %v700_v49, %v677_v26  ;;  %v718_v63 = vadd.f32 %v700_v49, %v678_v27 }
 0x1d3   :  { %v761_v0 = vsel %vm729_vm6, %v713_v47, %v745_v59  ;;  %v762_v1 = vsel %vm730_vm7, %v714_v50, %v746_v61  ;;  %v909_v2 = vpack.c.bf16 %v760_v13, %v759_v16  ;;  %vm731_vm8 = vcmp.gt.f32.partialorder %v715_v62, 0.0 }
 0x1d4   :  { %v910_v3 = vpack.c.bf16 %v762_v1, %v761_v0  ;;  %vm732_vm9 = vcmp.gt.f32.partialorder %v716_v12, 0.0  ;;  %vm733_vm10 = vcmp.gt.f32.partialorder %v717_v17, 0.0  ;;  %vm734_vm11 = vcmp.gt.f32.partialorder %v718_v63, 0.0 }
 0x1d5   :  { %821 = vst [vmem:[%s1434_s4 + $0x10] sm:$0xff] %v909_v2  ;;  %v747_v4 = vmul.f32 0.2, %v715_v62  ;;  %v748_v7 = vmul.f32 0.2, %v716_v12  ;;  %v598_v18 = vmul.f32 %v1362_v37, %v1362_v37 }
 0x1d6   :  { %v749_v5 = vmul.f32 0.2, %v717_v17  ;;  %822 = vst [vmem:[%s1434_s4 + $0x18] sm:$0xff] %v910_v3  ;;  %v750_v10 = vmul.f32 0.2, %v718_v63 }
 0x1d7   :  { %v763_v8 = vsel %vm731_vm8, %v715_v62, %v747_v4  ;;  %v764_v11 = vsel %vm732_vm9, %v716_v12, %v748_v7 }
 0x1d8   :  { %v765_v6 = vsel %vm733_vm10, %v717_v17, %v749_v5  ;;  %v766_v15 = vsel %vm734_vm11, %v718_v63, %v750_v10  ;;  %v911_v9 = vpack.c.bf16 %v764_v11, %v763_v8 }
 0x1d9   :  { %v912_v14 = vpack.c.bf16 %v766_v15, %v765_v6 }
 0x1da   :  { %823 = vst [vmem:[%s1434_s4 + $0x20] sm:$0xff] %v911_v9 }
 0x1db   :  { %824 = vst [vmem:[%s1434_s4 + $0x28] sm:$0xff] %v912_v14 }
 0x1ff   :  { %v590_v29 = vpop.xlane.xlu1 %589 }
 0x200   :  { %v594_v34 = vmul.f32 0.001953125, %v590_v29 }
 0x202   :  { %v602_v19 = vsub.f32 %v594_v34, %v598_v18 }
 0x204   :  { %v622_v28 = vadd.f32 1e-05, %v602_v19 }
 0x206   :  { %1026 = vrsqrt.f32 %v622_v28 }
 0x210   :  { %v1027_v20 = vpop.eup %1026 }
 0x211   :  { %v639_v35 = vmul.f32 %v1027_v20, %v615_v41  ;;  %v640_v21 = vmul.f32 %v1027_v20, %v616_v42  ;;  %v641_v22 = vmul.f32 %v1027_v20, %v617_v43  ;;  %v642_v23 = vmul.f32 %v1027_v20, %v618_v48  ;;  %v705_v41 = vpop.permute.xlu1 %704 }
 0x213   :  { %v679_v24 = vmul.f32 %v1376_v60, %v639_v35  ;;  %v680_v25 = vmul.f32 %v1376_v60, %v640_v21  ;;  %v681_v26 = vmul.f32 %v1376_v60, %v641_v22  ;;  %v682_v39 = vmul.f32 %v1376_v60, %v642_v23 }
 0x215   :  { %v719_v27 = vadd.f32 %v705_v41, %v679_v24  ;;  %v720_v44 = vadd.f32 %v705_v41, %v680_v25  ;;  %v721_v42 = vadd.f32 %v705_v41, %v681_v26  ;;  %v722_v30 = vadd.f32 %v705_v41, %v682_v39 }
 0x217   :  { %vm735_vm12 = vcmp.gt.f32.partialorder %v719_v27, 0.0  ;;  %vm736_vm13 = vcmp.gt.f32.partialorder %v720_v44, 0.0  ;;  %vm737_vm14 = vcmp.gt.f32.partialorder %v721_v42, 0.0  ;;  %vm738_vm15 = vcmp.gt.f32.partialorder %v722_v30, 0.0 }
 0x218   :  { %v751_v40 = vmul.f32 0.2, %v719_v27  ;;  %v752_v45 = vmul.f32 0.2, %v720_v44  ;;  %v753_v37 = vmul.f32 0.2, %v721_v42 }
 0x219   :  { %v754_v43 = vmul.f32 0.2, %v722_v30 }
 0x21a   :  { %v767_v48 = vsel %vm735_vm12, %v719_v27, %v751_v40  ;;  %v768_v31 = vsel %vm736_vm13, %v720_v44, %v752_v45  ;;  %v769_v32 = vsel %vm737_vm14, %v721_v42, %v753_v37 }
 0x21b   :  { %v770_v33 = vsel %vm738_vm15, %v722_v30, %v754_v43  ;;  %v913_v36 = vpack.c.bf16 %v768_v31, %v767_v48 }
 0x21c   :  { %v914_v38 = vpack.c.bf16 %v770_v33, %v769_v32 }
 0x21d   :  { %825 = vst [vmem:[%s1434_s4 + $0x30] sm:$0xff] %v913_v36 }
 0x21e   :  { %826 = vst [vmem:[%s1434_s4 + $0x38] sm:$0xff] %v914_v38 }

// kernel: discriminator_forward.8
= control target key start
LH: loop header
LB: loop body
LE: loop exit
PB: predicated region body
PF: predicated region fallthrough
CT: control target
= control target key end

     0   :  { %v1026_v1 = vmov 0   ;;  %s1363_s1 = inlined_call_operand.vmem [shape: bf16[512,128], index: 1, kind: input, shape index: {}]   ;;  %s1364_s0 = inlined_call_operand.vmem [shape: bf16[64,512], index: 0, kind: input, shape index: {}]   ;;  %s1365_s2 = inlined_call_operand.vmem [shape: f32[64,1], index: 2, kind: input, shape index: {}]   ;;  %s1366_s3 = inlined_call_operand.vmem [shape: f32[64,1], index: 3, kind: input, shape index: {}]   ;;  %s1367_s4 = inlined_call_operand.vmem [shape: bf16[64,128], index: 4, kind: output, shape index: {}]  }
   0x1   :  { %v954_v0 = vld [vmem:[%s1363_s1 + $0x40] sm:$0xff]   ;;  %953 = vset.pattern.permute.xlu1 %v1026_v1  ;;  %952 = vset.pattern.permute.xlu0 %v1026_v1  ;;  %v958_v5 = vld [vmem:[%s1363_s1 + $0x48] sm:$0xff]   ;;  %v962_v9 = vld [vmem:[%s1363_s1 + $0x50] sm:$0xff]  }
   0x2   :  { %v955_v2 = vld [vmem:[%s1363_s1 + $0xc0] sm:$0xff]   ;;  %871 = vmatprep.subr.bf16.mxu0 %v954_v0  ;;  %v959_v6 = vld [vmem:[%s1363_s1 + $0xc8] sm:$0xff]   ;;  %v963_v10 = vld [vmem:[%s1363_s1 + $0xd0] sm:$0xff]  }
   0x3   :  { %v956_v3 = vld [vmem:[%s1363_s1] sm:$0xff]   ;;  %911 = vmatprep.subr.bf16.mxu1 %v955_v2  ;;  %v960_v7 = vld [vmem:[%s1363_s1 + $0x8] sm:$0xff]   ;;  %v964_v11 = vld [vmem:[%s1363_s1 + $0x10] sm:$0xff]  }
   0x4   :  { %v957_v4 = vld [vmem:[%s1363_s1 + $0x80] sm:$0xff]   ;;  %872 = vmatpush3.bf16.msra.mxu0 %v956_v3  ;;  %v961_v8 = vld [vmem:[%s1363_s1 + $0x88] sm:$0xff]   ;;  %v965_v12 = vld [vmem:[%s1363_s1 + $0x90] sm:$0xff]  }
   0x5   :  { %912 = vmatpush3.bf16.msra.mxu1 %v957_v4  ;;  %873 = vmatprep.subr.bf16.mxu0 %v958_v5  ;;  %v966_v13 = vld [vmem:[%s1363_s1 + $0x58] sm:$0xff]   ;;  %v970_v17 = vld [vmem:[%s1363_s1 + $0x60] sm:$0xff]   ;;  %v974_v21 = vld [vmem:[%s1363_s1 + $0x68] sm:$0xff]  }
   0x6   :  { %913 = vmatprep.subr.bf16.mxu1 %v959_v6  ;;  %v967_v14 = vld [vmem:[%s1363_s1 + $0xd8] sm:$0xff]   ;;  %v971_v18 = vld [vmem:[%s1363_s1 + $0xe0] sm:$0xff]   ;;  %v975_v22 = vld [vmem:[%s1363_s1 + $0xe8] sm:$0xff]  }
   0x7   :  { %v968_v15 = vld [vmem:[%s1363_s1 + $0x18] sm:$0xff]   ;;  %v972_v19 = vld [vmem:[%s1363_s1 + $0x20] sm:$0xff]   ;;  %v976_v23 = vld [vmem:[%s1363_s1 + $0x28] sm:$0xff]  }
   0x8   :  { %874 = vmatpush3.bf16.msra.mxu0 %v960_v7  ;;  %v969_v16 = vld [vmem:[%s1363_s1 + $0x98] sm:$0xff]   ;;  %v973_v20 = vld [vmem:[%s1363_s1 + $0xa0] sm:$0xff]   ;;  %v977_v24 = vld [vmem:[%s1363_s1 + $0xa8] sm:$0xff]  }
   0x9   :  { %914 = vmatpush3.bf16.msra.mxu1 %v961_v8  ;;  %875 = vmatprep.subr.bf16.mxu0 %v962_v9  ;;  %v978_v25 = vld [vmem:[%s1363_s1 + $0x70] sm:$0xff]   ;;  %v982_v29 = vld [vmem:[%s1363_s1 + $0x78] sm:$0xff]   ;;  %v605_v43 = vld [vmem:[%s1365_s2 + $0x8] sm:$0xff] }
   0xa   :  { %915 = vmatprep.subr.bf16.mxu1 %v963_v10  ;;  %v979_v26 = vld [vmem:[%s1363_s1 + $0xf0] sm:$0xff]   ;;  %v983_v30 = vld [vmem:[%s1363_s1 + $0xf8] sm:$0xff]   ;;  %619 = vperm.xlu1 %953, %v605_v43   ;;  %v604_v45 = vld [vmem:[%s1365_s2] sm:$0xff] }
   0xb   :  { %v980_v27 = vld [vmem:[%s1363_s1 + $0x30] sm:$0xff]   ;;  %v984_v31 = vld [vmem:[%s1363_s1 + $0x38] sm:$0xff]   ;;  %614 = vperm.xlu0 %952, %v604_v45   ;;  %v661_v48 = vld [vmem:[%s1366_s3 + $0x8] sm:$0xff] }
   0xc   :  { %876 = vmatpush3.bf16.msra.mxu0 %v964_v11  ;;  %v981_v28 = vld [vmem:[%s1363_s1 + $0xb0] sm:$0xff]   ;;  %v985_v32 = vld [vmem:[%s1363_s1 + $0xb8] sm:$0xff]   ;;  %v608_v52 = vld [vmem:[%s1365_s2 + $0x20] sm:$0xff] }
   0xd   :  { %916 = vmatpush3.bf16.msra.mxu1 %v965_v12  ;;  %877 = vmatprep.subr.bf16.mxu0 %v966_v13  ;;  %v986_v33 = vld [vmem:[%s1364_s0] ss:$16 sps:$4 sm:$0xff]   ;;  %v988_v34 = vld [vmem:[%s1364_s0 + $0x4] ss:$16 sps:$4 sm:$0xff]   ;;  %v989_v35 = vld [vmem:[%s1364_s0 + $0x8] ss:$16 sps:$4 sm:$0xff]  }
   0xe   :  { %917 = vmatprep.subr.bf16.mxu1 %v967_v14  ;;  %v991_v36 = vld [vmem:[%s1364_s0 + $0xc] ss:$16 sps:$4 sm:$0xff]   ;;  %402 = vmatprep.mubr.bf16.mxu0 %v988_v34  ;;  %v992_v37 = vld [vmem:[%s1364_s0 + $0x24] ss:$16 sps:$4 sm:$0xff]   ;;  %v996_v39 = vld [vmem:[%s1364_s0 + $0x20] ss:$16 sps:$4 sm:$0xff]  }
   0xf   :  { %467 = vmatprep.mubr.bf16.mxu1 %v991_v36  ;;  %v994_v38 = vld [vmem:[%s1364_s0 + $0x2c] ss:$16 sps:$4 sm:$0xff]   ;;  %v997_v40 = vld [vmem:[%s1364_s0 + $0x28] ss:$16 sps:$4 sm:$0xff]   ;;  %v998_v41 = vld [vmem:[%s1364_s0 + $0x44] ss:$16 sps:$4 sm:$0xff]   ;;  %675 = vperm.xlu0 %952, %v661_v48  }
  0x10   :  { %878 = vmatpush3.bf16.msra.mxu0 %v968_v15  ;;  %v1000_v42 = vld [vmem:[%s1364_s0 + $0x4c] ss:$16 sps:$4 sm:$0xff]   ;;  %v606_v44 = vld [vmem:[%s1365_s2 + $0x10] sm:$0xff]  ;;  %v1003_v49 = vld [vmem:[%s1364_s0 + $0x48] ss:$16 sps:$4 sm:$0xff]  }
  0x11   :  { %918 = vmatpush3.bf16.msra.mxu1 %v969_v16  ;;  %879 = vmatprep.subr.bf16.mxu0 %v970_v17  ;;  %v1002_v46 = vld [vmem:[%s1364_s0 + $0x40] ss:$16 sps:$4 sm:$0xff]   ;;  %v607_v47 = vld [vmem:[%s1365_s2 + $0x18] sm:$0xff]  ;;  %v1004_v50 = vld [vmem:[%s1364_s0 + $0x64] ss:$16 sps:$4 sm:$0xff]  }
  0x12   :  { %919 = vmatprep.subr.bf16.mxu1 %v971_v18  ;;  %624 = vperm.xlu1 %953, %v606_v44   ;;  %v1006_v51 = vld [vmem:[%s1364_s0 + $0x6c] ss:$16 sps:$4 sm:$0xff]   ;;  %v1008_v54 = vld [vmem:[%s1364_s0 + $0x60] ss:$16 sps:$4 sm:$0xff]   ;;  %v1009_v57 = vld [vmem:[%s1364_s0 + $0x68] ss:$16 sps:$4 sm:$0xff]  }
  0x13   :  { %v663_v53 = vld [vmem:[%s1366_s3 + $0x18] sm:$0xff]  ;;  %v609_v55 = vld [vmem:[%s1365_s2 + $0x28] sm:$0xff]  ;;  %v610_v58 = vld [vmem:[%s1365_s2 + $0x30] sm:$0xff] }
  0x14   :  { %880 = vmatpush3.bf16.msra.mxu0 %v972_v19  ;;  %685 = vperm.xlu0 %952, %v663_v53   ;;  %v665_v56 = vld [vmem:[%s1366_s3 + $0x28] sm:$0xff]  ;;  %v611_v59 = vld [vmem:[%s1365_s2 + $0x38] sm:$0xff]  ;;  %v660_v60 = vld [vmem:[%s1366_s3] sm:$0xff] }
  0x15   :  { %920 = vmatpush3.bf16.msra.mxu1 %v973_v20  ;;  %881 = vmatprep.subr.bf16.mxu0 %v974_v21  ;;  %v662_v61 = vld [vmem:[%s1366_s3 + $0x10] sm:$0xff]  ;;  %v664_v62 = vld [vmem:[%s1366_s3 + $0x20] sm:$0xff] }
  0x16   :  { %921 = vmatprep.subr.bf16.mxu1 %v975_v22  ;;  %629 = vperm.xlu1 %953, %v607_v47  }
  0x18   :  { %882 = vmatpush3.bf16.msra.mxu0 %v976_v23  ;;  %695 = vperm.xlu0 %952, %v665_v56  }
  0x19   :  { %922 = vmatpush3.bf16.msra.mxu1 %v977_v24  ;;  %883 = vmatprep.subr.bf16.mxu0 %v978_v25 }
  0x1a   :  { %923 = vmatprep.subr.bf16.mxu1 %v979_v26  ;;  %634 = vperm.xlu1 %953, %v608_v52  }
  0x1c   :  { %884 = vmatpush3.bf16.msra.mxu0 %v980_v27 }
  0x1d   :  { %924 = vmatpush3.bf16.msra.mxu1 %v981_v28  ;;  %885 = vmatprep.subr.bf16.mxu0 %v982_v29 }
  0x1e   :  { %925 = vmatprep.subr.bf16.mxu1 %v983_v30  ;;  %639 = vperm.xlu1 %953, %v609_v55  }
  0x20   :  { %886 = vmatpush3.bf16.msra.mxu0 %v984_v31 }
  0x21   :  { %926 = vmatpush3.bf16.msra.mxu1 %v985_v32 }
  0x22   :  { %644 = vperm.xlu1 %953, %v610_v58  }
  0x23   :  { %403 = vmatmul.mubr.bf16.vlgmr.msra.gmra.mrb[0].mxu0 %v986_v33 }
  0x24   :  { %468 = vmatmul.mubr.bf16.vlgmr.msra.gmra.mrb[0].mxu1 %v989_v35  ;;  %410 = vmatprep.mubr.bf16.mxu0 %v992_v37 }
  0x25   :  { %475 = vmatprep.mubr.bf16.mxu1 %v994_v38 }
  0x26   :  { %649 = vperm.xlu1 %953, %v611_v59  }
  0x2a   :  { %670 = vperm.xlu1 %953, %v660_v60  }
  0x2b   :  { %411 = vmatmul.mubr.bf16.gmra.mrb[4].mxu0 %v996_v39 }
  0x2c   :  { %476 = vmatmul.mubr.bf16.gmra.mrb[4].mxu1 %v997_v40  ;;  %418 = vmatprep.mubr.bf16.mxu0 %v998_v41 }
  0x2d   :  { %483 = vmatprep.mubr.bf16.mxu1 %v1000_v42 }
  0x2e   :  { %680 = vperm.xlu1 %953, %v662_v61  }
  0x32   :  { %690 = vperm.xlu1 %953, %v664_v62  }
  0x33   :  { %419 = vmatmul.mubr.bf16.gmra.mrb[8].mxu0 %v1002_v46 }
  0x34   :  { %484 = vmatmul.mubr.bf16.gmra.mrb[8].mxu1 %v1003_v49  ;;  %426 = vmatprep.mubr.bf16.mxu0 %v1004_v50 }
  0x35   :  { %491 = vmatprep.mubr.bf16.mxu1 %v1006_v51 }
  0x3b   :  { %427 = vmatmul.mubr.bf16.gmra.mrb[12].mxu0 %v1008_v54 }
  0x3c   :  { %492 = vmatmul.mubr.bf16.gmra.mrb[12].mxu1 %v1009_v57 }
  0xf6   :  { %v887_v63 = vpop.f32.mrb[0].mxu0 }
  0xf7   :  { %v927_v0 = vpop.f32.mrb[0].mxu1  ;;  %v888_v1 = vpop.f32.mrb[1].mxu0 }
  0xf8   :  { %v889_v2 = vadd.f32 %v888_v1, %v887_v63  ;;  %v928_v3 = vpop.f32.mrb[1].mxu1  ;;  %v890_v4 = vpop.f32.mrb[2].mxu0  ;;  %v666_v63 = vld [vmem:[%s1366_s3 + $0x30] sm:$0xff] }
  0xf9   :  { %v929_v5 = vadd.f32 %v928_v3, %v927_v0  ;;  %v930_v6 = vpop.f32.mrb[2].mxu1  ;;  %v891_v7 = vpop.f32.mrb[3].mxu0  ;;  %v667_v0 = vld [vmem:[%s1366_s3 + $0x38] sm:$0xff] }
  0xfa   :  { %v892_v8 = vadd.f32 %v891_v7, %v890_v4  ;;  %v931_v9 = vpop.f32.mrb[3].mxu1  ;;  %v1284_v1 = vpop.permute.xlu1 %619 }
  0xfb   :  { %v1238_v10 = vadd.f32 %v929_v5, %v889_v2  ;;  %v932_v11 = vadd.f32 %v931_v9, %v930_v6  ;;  %v1296_v7 = vpop.permute.xlu0 %614 }
  0xfd   :  { %v1240_v12 = vadd.f32 %v932_v11, %v892_v8  ;;  %500 = vadd.xlane.f32.xlu0 %v1238_v10  ;;  %v524_v27 = vmul.f32 %v1238_v10, %v1238_v10 }
  0xfe   :  { %v893_v13 = vpop.f32.mrb[4].mxu0  ;;  %v1286_v2 = vpop.permute.xlu1 %624 }
  0xff   :  { %v933_v14 = vpop.f32.mrb[4].mxu1  ;;  %v894_v15 = vpop.f32.mrb[5].mxu0  ;;  %v525_v16 = vmul.f32 %v1240_v12, %v1240_v12 }
 0x100   :  { %v895_v17 = vadd.f32 %v894_v15, %v893_v13  ;;  %v934_v18 = vpop.f32.mrb[5].mxu1  ;;  %v896_v19 = vpop.f32.mrb[6].mxu0 }
 0x101   :  { %v935_v20 = vadd.f32 %v934_v18, %v933_v14  ;;  %v936_v21 = vpop.f32.mrb[6].mxu1  ;;  %534 = vadd.xlane.f32.xlu1 %v525_v16  ;;  %502 = vadd.xlane.f32.xlu0 %v1240_v12  ;;  %v897_v22 = vpop.f32.mrb[7].mxu0 }
 0x102   :  { %v898_v23 = vadd.f32 %v897_v22, %v896_v19  ;;  %v937_v24 = vpop.f32.mrb[7].mxu1  ;;  %v1288_v3 = vpop.permute.xlu1 %629 }
 0x103   :  { %v1246_v25 = vadd.f32 %v935_v20, %v895_v17  ;;  %v938_v26 = vadd.f32 %v937_v24, %v936_v21  ;;  %v676_v9 = vpop.permute.xlu0 %675 }
 0x105   :  { %v1250_v28 = vadd.f32 %v938_v26, %v898_v23  ;;  %504 = vadd.xlane.f32.xlu1 %v1246_v25  ;;  %532 = vadd.xlane.f32.xlu0 %v524_v27  ;;  %v526_v32 = vmul.f32 %v1246_v25, %v1246_v25 }
 0x106   :  { %v899_v29 = vpop.f32.mrb[8].mxu0  ;;  %v1290_v4 = vpop.permute.xlu1 %634 }
 0x107   :  { %v939_v30 = vpop.f32.mrb[8].mxu1  ;;  %v900_v31 = vpop.f32.mrb[9].mxu0  ;;  %v527_v43 = vmul.f32 %v1250_v28, %v1250_v28 }
 0x108   :  { %v901_v33 = vadd.f32 %v900_v31, %v899_v29  ;;  %v940_v34 = vpop.f32.mrb[9].mxu1  ;;  %v902_v35 = vpop.f32.mrb[10].mxu0 }
 0x109   :  { %v941_v36 = vadd.f32 %v940_v34, %v939_v30  ;;  %v942_v37 = vpop.f32.mrb[10].mxu1  ;;  %506 = vadd.xlane.f32.xlu1 %v1250_v28  ;;  %536 = vadd.xlane.f32.xlu0 %v526_v32  ;;  %v903_v38 = vpop.f32.mrb[11].mxu0 }
 0x10a   :  { %v904_v39 = vadd.f32 %v903_v38, %v902_v35  ;;  %v943_v40 = vpop.f32.mrb[11].mxu1  ;;  %v1292_v5 = vpop.permute.xlu1 %639 }
 0x10b   :  { %v1256_v41 = vadd.f32 %v941_v36, %v901_v33  ;;  %v944_v42 = vadd.f32 %v943_v40, %v942_v37  ;;  %v1302_v13 = vpop.permute.xlu0 %685 }
 0x10d   :  { %v1260_v44 = vadd.f32 %v944_v42, %v904_v39  ;;  %538 = vadd.xlane.f32.xlu1 %v527_v43  ;;  %508 = vadd.xlane.f32.xlu0 %v1256_v41  ;;  %v528_v45 = vmul.f32 %v1256_v41, %v1256_v41 }
 0x10e   :  { %v905_v46 = vpop.f32.mrb[12].mxu0  ;;  %v1294_v6 = vpop.permute.xlu1 %644 }
 0x10f   :  { %v945_v47 = vpop.f32.mrb[12].mxu1  ;;  %v906_v48 = vpop.f32.mrb[13].mxu0  ;;  %v529_v59 = vmul.f32 %v1260_v44, %v1260_v44 }
 0x110   :  { %v907_v49 = vadd.f32 %v906_v48, %v905_v46  ;;  %v946_v50 = vpop.f32.mrb[13].mxu1  ;;  %v908_v51 = vpop.f32.mrb[14].mxu0 }
 0x111   :  { %v947_v52 = vadd.f32 %v946_v50, %v945_v47  ;;  %v948_v53 = vpop.f32.mrb[14].mxu1  ;;  %510 = vadd.xlane.f32.xlu1 %v1260_v44  ;;  %540 = vadd.xlane.f32.xlu0 %v528_v45  ;;  %v909_v54 = vpop.f32.mrb[15].mxu0 }
 0x112   :  { %v910_v55 = vadd.f32 %v909_v54, %v908_v51  ;;  %v949_v56 = vpop.f32.mrb[15].mxu1  ;;  %v1298_v8 = vpop.permute.xlu1 %649 }
 0x113   :  { %v1266_v57 = vadd.f32 %v947_v52, %v907_v49  ;;  %v950_v58 = vadd.f32 %v949_v56, %v948_v53  ;;  %v1306_v15 = vpop.permute.xlu0 %695 }
 0x115   :  { %v1270_v60 = vadd.f32 %v950_v58, %v910_v55  ;;  %542 = vadd.xlane.f32.xlu1 %v529_v59  ;;  %512 = vadd.xlane.f32.xlu0 %v1266_v57  ;;  %v530_v61 = vmul.f32 %v1266_v57, %v1266_v57 }
 0x116   :  { %v1300_v11 = vpop.permute.xlu1 %670 }
 0x117   :  { %v531_v62 = vmul.f32 %v1270_v60, %v1270_v60 }
 0x119   :  { %514 = vadd.xlane.f32.xlu1 %v1270_v60  ;;  %544 = vadd.xlane.f32.xlu0 %v530_v61 }
 0x11a   :  { %v1304_v14 = vpop.permute.xlu1 %680 }
 0x11d   :  { %546 = vadd.xlane.f32.xlu1 %v531_v62 }
 0x11e   :  { %v1308_v16 = vpop.permute.xlu1 %690 }
 0x12e   :  { %700 = vperm.xlu1 %953, %v666_v63  }
 0x12f   :  { %705 = vperm.xlu0 %952, %v667_v0  }
 0x18a   :  { %v501_v17 = vpop.xlane.xlu0 %500 }
 0x18b   :  { %v516_v20 = vmul.f32 0.0078125, %v501_v17 }
 0x18d   :  { %v556_v27 = vmul.f32 %v516_v20, %v516_v20  ;;  %v572_v61 = vsub.f32 %v1238_v10, %v516_v20 }
 0x18e   :  { %v535_v18 = vpop.xlane.xlu1 %534  ;;  %v503_v19 = vpop.xlane.xlu0 %502 }
 0x18f   :  { %v517_v21 = vmul.f32 0.0078125, %v503_v19  ;;  %v549_v22 = vmul.f32 0.0078125, %v535_v18 }
 0x191   :  { %v557_v23 = vmul.f32 %v517_v21, %v517_v21  ;;  %v573_v56 = vsub.f32 %v1240_v12, %v517_v21 }
 0x192   :  { %v505_v24 = vpop.xlane.xlu1 %504  ;;  %v533_v26 = vpop.xlane.xlu0 %532 }
 0x193   :  { %v565_v29 = vsub.f32 %v549_v22, %v557_v23  ;;  %v518_v30 = vmul.f32 0.0078125, %v505_v24  ;;  %v548_v31 = vmul.f32 0.0078125, %v533_v26 }
 0x195   :  { %v581_v32 = vadd.f32 1e-05, %v565_v29  ;;  %v564_v33 = vsub.f32 %v548_v31, %v556_v27  ;;  %v558_v34 = vmul.f32 %v518_v30, %v518_v30  ;;  %v574_v20 = vsub.f32 %v1246_v25, %v518_v30 }
 0x196   :  { %v507_v35 = vpop.xlane.xlu1 %506  ;;  %v537_v36 = vpop.xlane.xlu0 %536 }
 0x197   :  { %1010 = vrsqrt.f32 %v581_v32  ;;  %v580_v37 = vadd.f32 1e-05, %v564_v33  ;;  %v1310_v38 = vmul.f32 0.0078125, %v507_v35  ;;  %v550_v39 = vmul.f32 0.0078125, %v537_v36 }
 0x199   :  { %1012 = vrsqrt.f32 %v580_v37  ;;  %v566_v40 = vsub.f32 %v550_v39, %v558_v34  ;;  %v559_v45 = vmul.f32 %v1310_v38, %v1310_v38 }
 0x19a   :  { %v539_v42 = vpop.xlane.xlu1 %538  ;;  %v509_v43 = vpop.xlane.xlu0 %508 }
 0x19b   :  { %v582_v46 = vadd.f32 1e-05, %v566_v40  ;;  %v551_v47 = vmul.f32 0.0078125, %v539_v42  ;;  %v1314_v48 = vmul.f32 0.0078125, %v509_v43 }
 0x19d   :  { %1014 = vrsqrt.f32 %v582_v46  ;;  %v567_v49 = vsub.f32 %v551_v47, %v559_v45  ;;  %v560_v50 = vmul.f32 %v1314_v48, %v1314_v48 }
 0x19e   :  { %v511_v51 = vpop.xlane.xlu1 %510  ;;  %v541_v52 = vpop.xlane.xlu0 %540 }
 0x19f   :  { %v583_v53 = vadd.f32 1e-05, %v567_v49  ;;  %v1318_v54 = vmul.f32 0.0078125, %v511_v51  ;;  %v552_v55 = vmul.f32 0.0078125, %v541_v52 }
 0x1a1   :  { %v1011_v58 = vpop.eup %1010  ;;  %1016 = vrsqrt.f32 %v583_v53  ;;  %v568_v59 = vsub.f32 %v552_v55, %v560_v50  ;;  %v561_v18 = vmul.f32 %v1318_v54, %v1318_v54 }
 0x1a2   :  { %v597_v62 = vmul.f32 %v1011_v58, %v573_v56  ;;  %v543_v63 = vpop.xlane.xlu1 %542  ;;  %v513_v0 = vpop.xlane.xlu0 %512  ;;  %v577_v58 = vsub.f32 %v1260_v44, %v1318_v54 }
 0x1a3   :  { %v1013_v17 = vpop.eup %1012  ;;  %v584_v19 = vadd.f32 1e-05, %v568_v59  ;;  %v553_v22 = vmul.f32 0.0078125, %v543_v63  ;;  %v1324_v23 = vmul.f32 0.0078125, %v513_v0 }
 0x1a4   :  { %v653_v24 = vmul.f32 %v1284_v1, %v597_v62  ;;  %v596_v26 = vmul.f32 %v1013_v17, %v572_v61 }
 0x1a5   :  { %1018 = vrsqrt.f32 %v584_v19  ;;  %v569_v12 = vsub.f32 %v553_v22, %v561_v18  ;;  %v562_v21 = vmul.f32 %v1324_v23, %v1324_v23 }
 0x1a6   :  { %v709_v10 = vadd.f32 %v676_v9, %v653_v24  ;;  %v652_v27 = vmul.f32 %v1296_v7, %v596_v26  ;;  %v515_v29 = vpop.xlane.xlu1 %514  ;;  %v545_v31 = vpop.xlane.xlu0 %544  ;;  %v575_v9 = vsub.f32 %v1250_v28, %v1310_v38  ;;  %v576_v28 = vsub.f32 %v1256_v41, %v1314_v48 }
 0x1a7   :  { %v1015_v32 = vpop.eup %1014  ;;  %v585_v33 = vadd.f32 1e-05, %v569_v12  ;;  %v523_v34 = vmul.f32 0.0078125, %v515_v29  ;;  %v554_v35 = vmul.f32 0.0078125, %v545_v31 }
 0x1a8   :  { %v725_v36 = vmul.f32 0.2, %v709_v10  ;;  %v708_v1 = vadd.f32 %v1300_v11, %v652_v27  ;;  %v598_v37 = vmul.f32 %v1015_v32, %v574_v20  ;;  %vm717_vm0 = vcmp.gt.f32.partialorder %v709_v10, 0.0 }
 0x1a9   :  { %1020 = vrsqrt.f32 %v585_v33  ;;  %v570_v39 = vsub.f32 %v554_v35, %v562_v21  ;;  %v563_v42 = vmul.f32 %v523_v34, %v523_v34  ;;  %v579_v18 = vsub.f32 %v1270_v60, %v523_v34 }
 0x1aa   :  { %v724_v40 = vmul.f32 0.2, %v708_v1  ;;  %v654_v25 = vmul.f32 %v1286_v2, %v598_v37  ;;  %v547_v7 = vpop.xlane.xlu1 %546  ;;  %vm716_vm1 = vcmp.gt.f32.partialorder %v708_v1, 0.0  ;;  %v733_v46 = vsel %vm717_vm0, %v709_v10, %v725_v36 }
 0x1ab   :  { %v1017_v30 = vpop.eup %1016  ;;  %v586_v43 = vadd.f32 1e-05, %v570_v39  ;;  %v555_v45 = vmul.f32 0.0078125, %v547_v7 }
 0x1ac   :  { %v710_v47 = vadd.f32 %v1304_v14, %v654_v25  ;;  %v599_v11 = vmul.f32 %v1017_v30, %v575_v9  ;;  %v732_v49 = vsel %vm716_vm1, %v708_v1, %v724_v40 }
 0x1ad   :  { %1022 = vrsqrt.f32 %v586_v43  ;;  %v571_v50 = vsub.f32 %v555_v45, %v563_v42  ;;  %v851_v51 = vpack.c.bf16 %v733_v46, %v732_v49 }
 0x1ae   :  { %v655_v52 = vmul.f32 %v1288_v3, %v599_v11  ;;  %v726_v53 = vmul.f32 0.2, %v710_v47  ;;  %vm718_vm2 = vcmp.gt.f32.partialorder %v710_v47, 0.0  ;;  %v701_v22 = vpop.permute.xlu1 %700 }
 0x1af   :  { %v1019_v2 = vpop.eup %1018  ;;  %v587_v38 = vadd.f32 1e-05, %v571_v50  ;;  %852 = vst [vmem:[%s1367_s4] sm:$0xff] %v851_v51  }
 0x1b0   :  { %v711_v55 = vadd.f32 %v1302_v13, %v655_v52  ;;  %v600_v14 = vmul.f32 %v1019_v2, %v576_v28  ;;  %v734_v61 = vsel %vm718_vm2, %v710_v47, %v726_v53  ;;  %v578_v13 = vsub.f32 %v1266_v57, %v1324_v23 }
 0x1b1   :  { %1024 = vrsqrt.f32 %v587_v38 }
 0x1b2   :  { %v727_v56 = vmul.f32 0.2, %v711_v55  ;;  %v656_v3 = vmul.f32 %v1290_v4, %v600_v14  ;;  %vm719_vm3 = vcmp.gt.f32.partialorder %v711_v55, 0.0 }
 0x1b3   :  { %v1021_v41 = vpop.eup %1020 }
 0x1b4   :  { %v712_v48 = vadd.f32 %v1308_v16, %v656_v3  ;;  %v601_v59 = vmul.f32 %v1021_v41, %v577_v58  ;;  %v735_v62 = vsel %vm719_vm3, %v711_v55, %v727_v56 }
 0x1b5   :  { %v856_v63 = vpack.c.bf16 %v735_v62, %v734_v61 }
 0x1b6   :  { %v657_v0 = vmul.f32 %v1292_v5, %v601_v59  ;;  %v728_v44 = vmul.f32 0.2, %v712_v48  ;;  %vm720_vm4 = vcmp.gt.f32.partialorder %v712_v48, 0.0 }
 0x1b7   :  { %v1023_v17 = vpop.eup %1022  ;;  %868 = vst [vmem:[%s1367_s4 + $0x8] sm:$0xff] %v856_v63  }
 0x1b8   :  { %v713_v4 = vadd.f32 %v1306_v15, %v657_v0  ;;  %v602_v54 = vmul.f32 %v1023_v17, %v578_v13  ;;  %v736_v23 = vsel %vm720_vm4, %v712_v48, %v728_v44  ;;  %v706_v15 = vpop.permute.xlu0 %705 }
 0x1ba   :  { %v729_v16 = vmul.f32 0.2, %v713_v4  ;;  %v658_v19 = vmul.f32 %v1294_v6, %v602_v54  ;;  %vm721_vm5 = vcmp.gt.f32.partialorder %v713_v4, 0.0 }
 0x1bb   :  { %v1025_v5 = vpop.eup %1024 }
 0x1bc   :  { %v714_v24 = vadd.f32 %v701_v22, %v658_v19  ;;  %v603_v57 = vmul.f32 %v1025_v5, %v579_v18  ;;  %v737_v26 = vsel %vm721_vm5, %v713_v4, %v729_v16 }
 0x1bd   :  { %v861_v12 = vpack.c.bf16 %v737_v26, %v736_v23 }
 0x1be   :  { %v659_v21 = vmul.f32 %v1298_v8, %v603_v57  ;;  %v730_v10 = vmul.f32 0.2, %v714_v24  ;;  %vm722_vm6 = vcmp.gt.f32.partialorder %v714_v24, 0.0 }
 0x1bf   :  { %869 = vst [vmem:[%s1367_s4 + $0x10] sm:$0xff] %v861_v12  }
 0x1c0   :  { %v715_v20 = vadd.f32 %v706_v15, %v659_v21  ;;  %v738_v6 = vsel %vm722_vm6, %v714_v24, %v730_v10 }
 0x1c2   :  { %vm723_vm7 = vcmp.gt.f32.partialorder %v715_v20, 0.0  ;;  %v731_v60 = vmul.f32 0.2, %v715_v20 }
 0x1c4   :  { %v739_v27 = vsel %vm723_vm7, %v715_v20, %v731_v60 }
 0x1c5   :  { %v866_v29 = vpack.c.bf16 %v739_v27, %v738_v6 }
 0x1c7   :  { %870 = vst [vmem:[%s1367_s4 + $0x18] sm:$0xff] %v866_v29  }

// kernel: discriminator_forward.9
= control target key start
LH: loop header
LB: loop body
LE: loop exit
PB: predicated region body
PF: predicated region fallthrough
CT: control target
= control target key end

     0   :  { %v2703_v31 = vmov 0   ;;  %s3656_s0 = inlined_call_operand.vmem [shape: bf16[128,1024], index: 0, kind: input, shape index: {}]   ;;  %s3657_s1 = inlined_call_operand.vmem [shape: bf16[1024,32], index: 1, kind: input, shape index: {}]   ;;  %s3658_s2 = inlined_call_operand.vmem [shape: f32[128,1], index: 2, kind: input, shape index: {}]   ;;  %s3659_s3 = inlined_call_operand.vmem [shape: f32[128,1], index: 3, kind: input, shape index: {}]   ;;  %s3660_s4 = inlined_call_operand.vmem [shape: f32[128,32], index: 4, kind: input, shape index: {}]   ;;  %s3661_s5 = inlined_call_operand.vmem [shape: f32[32,2], index: 5, kind: input, shape index: {}]   ;;  %s3662_s6 = inlined_call_operand.hbm [shape: f32[1,2], index: 6, kind: output, shape index: {}]  }
   0x1   :  { %v2579_v0 = vld [vmem:[%s3657_s1 + $0x40] sm:$0xff]   ;;  %v2583_v4 = vld [vmem:[%s3657_s1 + $0x48] sm:$0xff]   ;;  %v2587_v8 = vld [vmem:[%s3657_s1 + $0x50] sm:$0xff]   ;;  %2578 = vset.pattern.permute.xlu0 %v2703_v31  ;;  %2577 = vset.pattern.permute.xlu1 %v2703_v31 }
   0x2   :  { %v2580_v1 = vld [vmem:[%s3657_s1 + $0xc0] sm:$0xff]   ;;  %2255 = vmatprep.subr.bf16.mxu0 %v2579_v0  ;;  %v2584_v5 = vld [vmem:[%s3657_s1 + $0xc8] sm:$0xff]   ;;  %v2588_v9 = vld [vmem:[%s3657_s1 + $0xd0] sm:$0xff]  }
   0x3   :  { %v2581_v2 = vld [vmem:[%s3657_s1] sm:$0xff]   ;;  %2319 = vmatprep.subr.bf16.mxu1 %v2580_v1  ;;  %v2585_v6 = vld [vmem:[%s3657_s1 + $0x8] sm:$0xff]   ;;  %v2589_v10 = vld [vmem:[%s3657_s1 + $0x10] sm:$0xff]  }
   0x4   :  { %v2582_v3 = vld [vmem:[%s3657_s1 + $0x80] sm:$0xff]   ;;  %2256 = vmatpush3.bf16.msra.mxu0 %v2581_v2  ;;  %v2586_v7 = vld [vmem:[%s3657_s1 + $0x88] sm:$0xff]   ;;  %v2590_v11 = vld [vmem:[%s3657_s1 + $0x90] sm:$0xff]  }
   0x5   :  { %2320 = vmatpush3.bf16.msra.mxu1 %v2582_v3  ;;  %2257 = vmatprep.subr.bf16.mxu0 %v2583_v4  ;;  %v2591_v12 = vld [vmem:[%s3657_s1 + $0x58] sm:$0xff]   ;;  %v2595_v16 = vld [vmem:[%s3657_s1 + $0x60] sm:$0xff]   ;;  %v2599_v20 = vld [vmem:[%s3657_s1 + $0x68] sm:$0xff]  }
   0x6   :  { %2321 = vmatprep.subr.bf16.mxu1 %v2584_v5  ;;  %v2592_v13 = vld [vmem:[%s3657_s1 + $0xd8] sm:$0xff]   ;;  %v2596_v17 = vld [vmem:[%s3657_s1 + $0xe0] sm:$0xff]   ;;  %v2600_v21 = vld [vmem:[%s3657_s1 + $0xe8] sm:$0xff]  }
   0x7   :  { %v2593_v14 = vld [vmem:[%s3657_s1 + $0x18] sm:$0xff]   ;;  %v2597_v18 = vld [vmem:[%s3657_s1 + $0x20] sm:$0xff]   ;;  %v2601_v22 = vld [vmem:[%s3657_s1 + $0x28] sm:$0xff]  }
   0x8   :  { %2258 = vmatpush3.bf16.msra.mxu0 %v2585_v6  ;;  %v2594_v15 = vld [vmem:[%s3657_s1 + $0x98] sm:$0xff]   ;;  %v2598_v19 = vld [vmem:[%s3657_s1 + $0xa0] sm:$0xff]   ;;  %v2602_v23 = vld [vmem:[%s3657_s1 + $0xa8] sm:$0xff]  }
   0x9   :  { %2322 = vmatpush3.bf16.msra.mxu1 %v2586_v7  ;;  %2259 = vmatprep.subr.bf16.mxu0 %v2587_v8  ;;  %v2603_v24 = vld [vmem:[%s3657_s1 + $0x70] sm:$0xff]   ;;  %v2607_v28 = vld [vmem:[%s3657_s1 + $0x78] sm:$0xff]   ;;  %v25_v33 = vld [vmem:[%s3656_s0] sm:$0xff] }
   0xa   :  { %2323 = vmatprep.subr.bf16.mxu1 %v2588_v9  ;;  %v2604_v25 = vld [vmem:[%s3657_s1 + $0xf0] sm:$0xff]   ;;  %v2608_v29 = vld [vmem:[%s3657_s1 + $0xf8] sm:$0xff]   ;;  %v29_v34 = vld [vmem:[%s3656_s0 + $0x20] sm:$0xff] }
   0xb   :  { %v2605_v26 = vld [vmem:[%s3657_s1 + $0x30] sm:$0xff]   ;;  %v2609_v30 = vld [vmem:[%s3657_s1 + $0x38] sm:$0xff]   ;;  %v26_v35 = vld [vmem:[%s3656_s0 + $0x8] sm:$0xff]  ;;  %v2111_v36 = vcombine.low %v25_v33, %v29_v34  ;;  %v2112_v37 = vcombine.high %v25_v33, %v29_v34 }
   0xc   :  { %2260 = vmatpush3.bf16.msra.mxu0 %v2589_v10  ;;  %v2606_v27 = vld [vmem:[%s3657_s1 + $0xb0] sm:$0xff]   ;;  %v2610_v32 = vld [vmem:[%s3657_s1 + $0xb8] sm:$0xff]   ;;  %v30_v38 = vld [vmem:[%s3656_s0 + $0x28] sm:$0xff] }
   0xd   :  { %2324 = vmatpush3.bf16.msra.mxu1 %v2590_v11  ;;  %2261 = vmatprep.subr.bf16.mxu0 %v2591_v12  ;;  %v2113_v39 = vcombine.low %v26_v35, %v30_v38  ;;  %v2114_v40 = vcombine.high %v26_v35, %v30_v38  ;;  %v2611_v41 = vld [vmem:[%s3657_s1 + $0x140] sm:$0xff]   ;;  %v34_v48 = vld [vmem:[%s3656_s0 + $0x48] sm:$0xff]  ;;  %v2619_v63 = vld [vmem:[%s3657_s1 + $0x150] sm:$0xff]  }
   0xe   :  { %2325 = vmatprep.subr.bf16.mxu1 %v2592_v13  ;;  %953 = vmatprep.mubr.bf16.mxu0 %v2112_v37  ;;  %v2612_v42 = vld [vmem:[%s3657_s1 + $0x100] sm:$0xff]   ;;  %v38_v49 = vld [vmem:[%s3656_s0 + $0x68] sm:$0xff]  ;;  %v2620_v0 = vld [vmem:[%s3657_s1 + $0x110] sm:$0xff]  }
   0xf   :  { %1050 = vmatprep.mubr.bf16.mxu1 %v2114_v40  ;;  %v2613_v43 = vld [vmem:[%s3657_s1 + $0x1c0] sm:$0xff]   ;;  %v2122_v50 = vcombine.high %v34_v48, %v38_v49  ;;  %v2615_v51 = vld [vmem:[%s3657_s1 + $0x148] sm:$0xff]   ;;  %v2121_v54 = vcombine.low %v34_v48, %v38_v49  ;;  %v2621_v1 = vld [vmem:[%s3657_s1 + $0x1d0] sm:$0xff]  }
  0x10   :  { %2262 = vmatpush3.bf16.msra.mxu0 %v2593_v14  ;;  %v2614_v44 = vld [vmem:[%s3657_s1 + $0x180] sm:$0xff]   ;;  %v2616_v53 = vld [vmem:[%s3657_s1 + $0x108] sm:$0xff]   ;;  %v2622_v2 = vld [vmem:[%s3657_s1 + $0x190] sm:$0xff]  }
  0x11   :  { %2326 = vmatpush3.bf16.msra.mxu1 %v2594_v15  ;;  %2263 = vmatprep.subr.bf16.mxu0 %v2595_v16  ;;  %v33_v45 = vld [vmem:[%s3656_s0 + $0x40] sm:$0xff]  ;;  %v2617_v55 = vld [vmem:[%s3657_s1 + $0x1c8] sm:$0xff]   ;;  %v2623_v11 = vld [vmem:[%s3657_s1 + $0x158] sm:$0xff]  }
  0x12   :  { %2327 = vmatprep.subr.bf16.mxu1 %v2596_v17  ;;  %v37_v46 = vld [vmem:[%s3656_s0 + $0x60] sm:$0xff]  ;;  %v2618_v56 = vld [vmem:[%s3657_s1 + $0x188] sm:$0xff]   ;;  %v2624_v12 = vld [vmem:[%s3657_s1 + $0x118] sm:$0xff]  }
  0x13   :  { %v2120_v47 = vcombine.high %v33_v45, %v37_v46  ;;  %v2119_v52 = vcombine.low %v33_v45, %v37_v46  ;;  %v41_v57 = vld [vmem:[%s3656_s0 + $0x80] sm:$0xff]  ;;  %v42_v59 = vld [vmem:[%s3656_s0 + $0x88] sm:$0xff]  ;;  %v2625_v13 = vld [vmem:[%s3657_s1 + $0x1d8] sm:$0xff]  }
  0x14   :  { %2264 = vmatpush3.bf16.msra.mxu0 %v2597_v18  ;;  %v45_v58 = vld [vmem:[%s3656_s0 + $0xa0] sm:$0xff]  ;;  %v46_v60 = vld [vmem:[%s3656_s0 + $0xa8] sm:$0xff]  ;;  %v2626_v14 = vld [vmem:[%s3657_s1 + $0x198] sm:$0xff]  }
  0x15   :  { %2328 = vmatpush3.bf16.msra.mxu1 %v2598_v19  ;;  %2265 = vmatprep.subr.bf16.mxu0 %v2599_v20  ;;  %v2128_v61 = vcombine.high %v41_v57, %v45_v58  ;;  %v2130_v62 = vcombine.high %v42_v59, %v46_v60  ;;  %v2127_v3 = vcombine.low %v41_v57, %v45_v58  ;;  %v49_v4 = vld [vmem:[%s3656_s0 + $0xc0] sm:$0xff]  ;;  %v50_v6 = vld [vmem:[%s3656_s0 + $0xc8] sm:$0xff]  ;;  %v2636_v40 = vld [vmem:[%s3657_s1 + $0x130] sm:$0xff]  }
  0x16   :  { %2329 = vmatprep.subr.bf16.mxu1 %v2600_v21  ;;  %v53_v5 = vld [vmem:[%s3656_s0 + $0xe0] sm:$0xff]  ;;  %v2129_v7 = vcombine.low %v42_v59, %v46_v60  ;;  %v54_v9 = vld [vmem:[%s3656_s0 + $0xe8] sm:$0xff]  ;;  %v2640_v49 = vld [vmem:[%s3657_s1 + $0x138] sm:$0xff]  }
  0x17   :  { %v2136_v8 = vcombine.high %v49_v4, %v53_v5  ;;  %v2138_v10 = vcombine.high %v50_v6, %v54_v9  ;;  %v57_v15 = vld [vmem:[%s3656_s0 + $0x100] sm:$0xff]  ;;  %v58_v17 = vld [vmem:[%s3656_s0 + $0x108] sm:$0xff]  ;;  %v2135_v20 = vcombine.low %v49_v4, %v53_v5 }
  0x18   :  { %2266 = vmatpush3.bf16.msra.mxu0 %v2601_v22  ;;  %v61_v16 = vld [vmem:[%s3656_s0 + $0x120] sm:$0xff]  ;;  %v62_v18 = vld [vmem:[%s3656_s0 + $0x128] sm:$0xff]  ;;  %v2137_v22 = vcombine.low %v50_v6, %v54_v9 }
  0x19   :  { %2330 = vmatpush3.bf16.msra.mxu1 %v2602_v23  ;;  %2267 = vmatprep.subr.bf16.mxu0 %v2603_v24  ;;  %v2627_v19 = vld [vmem:[%s3657_s1 + $0x160] sm:$0xff]   ;;  %v2144_v23 = vcombine.high %v57_v15, %v61_v16  ;;  %v70_v31 = vld [vmem:[%s3656_s0 + $0x168] sm:$0xff]  ;;  %v2143_v35 = vcombine.low %v57_v15, %v61_v16  ;;  %v40_v15 = vld [vmem:[%s3656_s0 + $0x78] sm:$0xff] }
  0x1a   :  { %2331 = vmatprep.subr.bf16.mxu1 %v2604_v25  ;;  %v2628_v21 = vld [vmem:[%s3657_s1 + $0x120] sm:$0xff]   ;;  %v2146_v25 = vcombine.high %v58_v17, %v62_v18  ;;  %v2633_v33 = vld [vmem:[%s3657_s1 + $0x1e8] sm:$0xff]   ;;  %v1553_v16 = vld [vmem:[%s3658_s2 + $0x18] sm:$0xff] }
  0x1b   :  { %v2629_v24 = vld [vmem:[%s3657_s1 + $0x1e0] sm:$0xff]   ;;  %v2634_v34 = vld [vmem:[%s3657_s1 + $0x1a8] sm:$0xff]  }
  0x1c   :  { %2268 = vmatpush3.bf16.msra.mxu0 %v2605_v26  ;;  %v2630_v26 = vld [vmem:[%s3657_s1 + $0x1a0] sm:$0xff]   ;;  %v74_v45 = vld [vmem:[%s3656_s0 + $0x188] sm:$0xff] }
  0x1d   :  { %2332 = vmatpush3.bf16.msra.mxu1 %v2606_v27  ;;  %2269 = vmatprep.subr.bf16.mxu0 %v2607_v28  ;;  %v65_v27 = vld [vmem:[%s3656_s0 + $0x140] sm:$0xff]  ;;  %v78_v46 = vld [vmem:[%s3656_s0 + $0x1a8] sm:$0xff] }
  0x1e   :  { %2333 = vmatprep.subr.bf16.mxu1 %v2608_v29  ;;  %v69_v28 = vld [vmem:[%s3656_s0 + $0x160] sm:$0xff]  ;;  %v2631_v29 = vld [vmem:[%s3657_s1 + $0x168] sm:$0xff]   ;;  %v2161_v60 = vcombine.low %v74_v45, %v78_v46 }
  0x1f   :  { %v2152_v37 = vcombine.high %v65_v27, %v69_v28  ;;  %v2151_v48 = vcombine.low %v65_v27, %v69_v28  ;;  %v82_v57 = vld [vmem:[%s3656_s0 + $0x1c8] sm:$0xff]  ;;  %v1662_v4 = vld [vmem:[%s3659_s3] sm:$0xff] }
  0x20   :  { %2270 = vmatpush3.bf16.msra.mxu0 %v2609_v30  ;;  %v66_v30 = vld [vmem:[%s3656_s0 + $0x148] sm:$0xff]  ;;  %v1550_v6 = vld [vmem:[%s3658_s2] sm:$0xff] }
  0x21   :  { %2334 = vmatpush3.bf16.msra.mxu1 %v2610_v32  ;;  %2383 = vmatprep.subr.bf16.mxu0 %v2611_v41  ;;  %v2632_v32 = vld [vmem:[%s3657_s1 + $0x128] sm:$0xff]   ;;  %v2154_v38 = vcombine.high %v66_v30, %v70_v31  ;;  %v2637_v41 = vld [vmem:[%s3657_s1 + $0x1f0] sm:$0xff]  }
  0x22   :  { %2447 = vmatprep.subr.bf16.mxu1 %v2613_v43  ;;  %v77_v43 = vld [vmem:[%s3656_s0 + $0x1a0] sm:$0xff]  ;;  %v86_v58 = vld [vmem:[%s3656_s0 + $0x1e8] sm:$0xff]  ;;  %1568 = vperm.xlu1 %2577, %v1550_v6  }
  0x23   :  { %954 = vmatmul.mubr.bf16.vlgmr.msra.gmra.mrb[0].mxu0 %v2111_v36  ;;  %v2145_v36 = vcombine.low %v58_v17, %v62_v18 }
  0x24   :  { %1051 = vmatmul.mubr.bf16.vlgmr.msra.gmra.mrb[0].mxu1 %v2113_v39  ;;  %2384 = vmatpush3.bf16.msra.mxu0 %v2612_v42  ;;  %v2635_v39 = vld [vmem:[%s3657_s1 + $0x170] sm:$0xff]   ;;  %v73_v42 = vld [vmem:[%s3656_s0 + $0x180] sm:$0xff] }
  0x25   :  { %2448 = vmatpush3.bf16.msra.mxu1 %v2614_v44  ;;  %961 = vmatprep.mubr.bf16.mxu0 %v2120_v47  ;;  %v2638_v44 = vld [vmem:[%s3657_s1 + $0x1b0] sm:$0xff]   ;;  %v2639_v47 = vld [vmem:[%s3657_s1 + $0x178] sm:$0xff]   ;;  %v2159_v59 = vcombine.low %v73_v42, %v77_v43 }
  0x26   :  { %1058 = vmatprep.mubr.bf16.mxu1 %v2122_v50  ;;  %2385 = vmatprep.subr.bf16.mxu0 %v2615_v51  ;;  %v2153_v50 = vcombine.low %v66_v30, %v70_v31  ;;  %v2160_v51 = vcombine.high %v73_v42, %v77_v43 }
  0x27   :  { %2449 = vmatprep.subr.bf16.mxu1 %v2617_v55  ;;  %v81_v55 = vld [vmem:[%s3656_s0 + $0x1c0] sm:$0xff] }
  0x28   :  { %2386 = vmatpush3.bf16.msra.mxu0 %v2616_v53  ;;  %v2162_v53 = vcombine.high %v74_v45, %v78_v46 }
  0x29   :  { %2450 = vmatpush3.bf16.msra.mxu1 %v2618_v56  ;;  %2387 = vmatprep.subr.bf16.mxu0 %v2619_v63  ;;  %v85_v56 = vld [vmem:[%s3656_s0 + $0x1e0] sm:$0xff]  ;;  %v1551_v63 = vld [vmem:[%s3658_s2 + $0x8] sm:$0xff] }
  0x2a   :  { %2451 = vmatprep.subr.bf16.mxu1 %v2621_v1  ;;  %v31_v1 = vld [vmem:[%s3656_s0 + $0x30] sm:$0xff]  ;;  %1573 = vperm.xlu0 %2578, %v1551_v63   ;;  %v2167_v5 = vcombine.low %v81_v55, %v85_v56 }
  0x2b   :  { %962 = vmatmul.mubr.bf16.gmra.mrb[4].mxu0 %v2119_v52  ;;  %v2641_v52 = vld [vmem:[%s3657_s1 + $0x1f8] sm:$0xff]  }
  0x2c   :  { %1059 = vmatmul.mubr.bf16.gmra.mrb[4].mxu1 %v2121_v54  ;;  %969 = vmatprep.mubr.bf16.mxu0 %v2128_v61  ;;  %v2642_v54 = vld [vmem:[%s3657_s1 + $0x1b8] sm:$0xff]   ;;  %v2168_v61 = vcombine.high %v81_v55, %v85_v56 }
  0x2d   :  { %1066 = vmatprep.mubr.bf16.mxu1 %v2130_v62  ;;  %2388 = vmatpush3.bf16.msra.mxu0 %v2620_v0  ;;  %v2170_v62 = vcombine.high %v82_v57, %v86_v58  ;;  %v27_v0 = vld [vmem:[%s3656_s0 + $0x10] sm:$0xff] }
  0x2e   :  { %2452 = vmatpush3.bf16.msra.mxu1 %v2622_v2  ;;  %2389 = vmatprep.subr.bf16.mxu0 %v2623_v11  ;;  %v28_v2 = vld [vmem:[%s3656_s0 + $0x18] sm:$0xff]  ;;  %v1552_v11 = vld [vmem:[%s3658_s2 + $0x10] sm:$0xff] }
  0x2f   :  { %2453 = vmatprep.subr.bf16.mxu1 %v2625_v13  ;;  %1680 = vperm.xlu0 %2578, %v1662_v4   ;;  %v39_v13 = vld [vmem:[%s3656_s0 + $0x70] sm:$0xff] }
  0x30   :  { %1578 = vperm.xlu1 %2577, %v1552_v11  }
  0x31   :  { %2390 = vmatpush3.bf16.msra.mxu0 %v2624_v12  ;;  %v35_v12 = vld [vmem:[%s3656_s0 + $0x50] sm:$0xff] }
  0x32   :  { %2454 = vmatpush3.bf16.msra.mxu1 %v2626_v14  ;;  %2391 = vmatprep.subr.bf16.mxu0 %v2627_v19  ;;  %v36_v14 = vld [vmem:[%s3656_s0 + $0x58] sm:$0xff] }
  0x33   :  { %970 = vmatmul.mubr.bf16.gmra.mrb[8].mxu0 %v2127_v3  ;;  %2455 = vmatprep.subr.bf16.mxu1 %v2629_v24  ;;  %v32_v3 = vld [vmem:[%s3656_s0 + $0x38] sm:$0xff] }
  0x34   :  { %1067 = vmatmul.mubr.bf16.gmra.mrb[8].mxu1 %v2129_v7  ;;  %977 = vmatprep.mubr.bf16.mxu0 %v2136_v8  ;;  %v2169_v7 = vcombine.low %v82_v57, %v86_v58  ;;  %v2116_v8 = vcombine.high %v27_v0, %v31_v1  ;;  %v2118_v9 = vcombine.high %v28_v2, %v32_v3 }
  0x35   :  { %1074 = vmatprep.mubr.bf16.mxu1 %v2138_v10  ;;  %2392 = vmatpush3.bf16.msra.mxu0 %v2628_v21  ;;  %v1663_v10 = vld [vmem:[%s3659_s3 + $0x8] sm:$0xff] }
  0x36   :  { %2456 = vmatpush3.bf16.msra.mxu1 %v2630_v26  ;;  %2393 = vmatprep.subr.bf16.mxu0 %v2631_v29 }
  0x37   :  { %2457 = vmatprep.subr.bf16.mxu1 %v2633_v33  ;;  %1685 = vperm.xlu0 %2578, %v1663_v10  }
  0x39   :  { %2394 = vmatpush3.bf16.msra.mxu0 %v2632_v32 }
  0x3a   :  { %2458 = vmatpush3.bf16.msra.mxu1 %v2634_v34  ;;  %2395 = vmatprep.subr.bf16.mxu0 %v2635_v39 }
  0x3b   :  { %978 = vmatmul.mubr.bf16.gmra.mrb[12].mxu0 %v2135_v20  ;;  %2459 = vmatprep.subr.bf16.mxu1 %v2637_v41 }
  0x3c   :  { %1075 = vmatmul.mubr.bf16.gmra.mrb[12].mxu1 %v2137_v22  ;;  %985 = vmatprep.mubr.bf16.mxu0 %v2144_v23 }
  0x3d   :  { %1082 = vmatprep.mubr.bf16.mxu1 %v2146_v25  ;;  %2396 = vmatpush3.bf16.msra.mxu0 %v2636_v40 }
  0x3e   :  { %2460 = vmatpush3.bf16.msra.mxu1 %v2638_v44  ;;  %2397 = vmatprep.subr.bf16.mxu0 %v2639_v47 }
  0x3f   :  { %2461 = vmatprep.subr.bf16.mxu1 %v2641_v52 }
  0x41   :  { %2398 = vmatpush3.bf16.msra.mxu0 %v2640_v49 }
  0x42   :  { %2462 = vmatpush3.bf16.msra.mxu1 %v2642_v54 }
  0x43   :  { %986 = vmatmul.mubr.bf16.gmra.mrb[16].mxu0 %v2143_v35 }
  0x44   :  { %1083 = vmatmul.mubr.bf16.gmra.mrb[16].mxu1 %v2145_v36  ;;  %993 = vmatprep.mubr.bf16.mxu0 %v2152_v37 }
  0x45   :  { %1090 = vmatprep.mubr.bf16.mxu1 %v2154_v38 }
  0x4b   :  { %994 = vmatmul.mubr.bf16.gmra.mrb[20].mxu0 %v2151_v48 }
  0x4c   :  { %1091 = vmatmul.mubr.bf16.gmra.mrb[20].mxu1 %v2153_v50  ;;  %1001 = vmatprep.mubr.bf16.mxu0 %v2160_v51 }
  0x4d   :  { %1098 = vmatprep.mubr.bf16.mxu1 %v2162_v53 }
  0x53   :  { %1002 = vmatmul.mubr.bf16.gmra.mrb[24].mxu0 %v2159_v59 }
  0x54   :  { %1099 = vmatmul.mubr.bf16.gmra.mrb[24].mxu1 %v2161_v60  ;;  %1009 = vmatprep.mubr.bf16.mxu0 %v2168_v61 }
  0x55   :  { %1106 = vmatprep.mubr.bf16.mxu1 %v2170_v62 }
  0x5b   :  { %1010 = vmatmul.mubr.bf16.gmra.mrb[28].mxu0 %v2167_v5 }
  0x5c   :  { %1107 = vmatmul.mubr.bf16.gmra.mrb[28].mxu1 %v2169_v7  ;;  %1147 = vmatprep.mubr.bf16.mxu0 %v2116_v8 }
  0x5d   :  { %1244 = vmatprep.mubr.bf16.mxu1 %v2118_v9 }
  0x5e   :  { %11 = vsyncpa [#allocation3], 0  ;;  %v2115_v17 = vcombine.low %v27_v0, %v31_v1  ;;  %v1555_v18 = vld [vmem:[%s3658_s2 + $0x28] sm:$0xff]  ;;  %v2117_v19 = vcombine.low %v28_v2, %v32_v3  ;;  %v2124_v20 = vcombine.high %v35_v12, %v39_v13  ;;  %v2126_v21 = vcombine.high %v36_v14, %v40_v15  ;;  %1583 = vperm.xlu0 %2578, %v1553_v16   ;;  %v1664_v22 = vld [vmem:[%s3659_s3 + $0x10] sm:$0xff] }
  0x5f   :  { %1593 = vperm.xlu1 %2577, %v1555_v18   ;;  %v1667_v23 = vld [vmem:[%s3659_s3 + $0x28] sm:$0xff]  ;;  %v43_v24 = vld [vmem:[%s3656_s0 + $0x90] sm:$0xff]  ;;  %v44_v26 = vld [vmem:[%s3656_s0 + $0x98] sm:$0xff]  ;;  %v2123_v29 = vcombine.low %v35_v12, %v39_v13  ;;  %v2125_v31 = vcombine.low %v36_v14, %v40_v15  ;;  %vm1309_vm0 = vcmask 261120  }
  0x60   :  { %v47_v25 = vld [vmem:[%s3656_s0 + $0xb0] sm:$0xff]  ;;  %v48_v27 = vld [vmem:[%s3656_s0 + $0xb8] sm:$0xff]  ;;  %v1554_v34 = vld [vmem:[%s3658_s2 + $0x20] sm:$0xff] }
  0x61   :  { %v1665_v28 = vld [vmem:[%s3659_s3 + $0x18] sm:$0xff]  ;;  %v2132_v32 = vcombine.high %v43_v24, %v47_v25  ;;  %v2134_v33 = vcombine.high %v44_v26, %v48_v27  ;;  %v51_v36 = vld [vmem:[%s3656_s0 + $0xd0] sm:$0xff]  ;;  %v1666_v40 = vld [vmem:[%s3659_s3 + $0x20] sm:$0xff]  ;;  %v2131_v41 = vcombine.low %v43_v24, %v47_v25  ;;  %v2133_v43 = vcombine.low %v44_v26, %v48_v27 }
  0x62   :  { %1690 = vperm.xlu0 %2578, %v1664_v22   ;;  %v1557_v30 = vld [vmem:[%s3658_s2 + $0x38] sm:$0xff]  ;;  %v55_v37 = vld [vmem:[%s3656_s0 + $0xf0] sm:$0xff]  ;;  %v1559_v42 = vld [vmem:[%s3658_s2 + $0x48] sm:$0xff] }
  0x63   :  { %1148 = vmatmul.mubr.bf16.vlgmr.msra.gmra.mrb[32].mxu0 %v2115_v17  ;;  %1705 = vperm.xlu1 %2577, %v1667_v23   ;;  %v1669_v35 = vld [vmem:[%s3659_s3 + $0x38] sm:$0xff]  ;;  %v2140_v44 = vcombine.high %v51_v36, %v55_v37  ;;  %v1556_v46 = vld [vmem:[%s3658_s2 + $0x30] sm:$0xff]  ;;  %v1671_v47 = vld [vmem:[%s3659_s3 + $0x48] sm:$0xff]  ;;  %v2139_v53 = vcombine.low %v51_v36, %v55_v37 }
  0x64   :  { %1245 = vmatmul.mubr.bf16.vlgmr.msra.gmra.mrb[32].mxu1 %v2117_v19  ;;  %1155 = vmatprep.mubr.bf16.mxu0 %v2124_v20  ;;  %v52_v38 = vld [vmem:[%s3656_s0 + $0xd8] sm:$0xff]  ;;  %v59_v48 = vld [vmem:[%s3656_s0 + $0x110] sm:$0xff]  ;;  %v1558_v58 = vld [vmem:[%s3658_s2 + $0x40] sm:$0xff] }
  0x65   :  { %1252 = vmatprep.mubr.bf16.mxu1 %v2126_v21  ;;  %v56_v39 = vld [vmem:[%s3656_s0 + $0xf8] sm:$0xff]  ;;  %v63_v49 = vld [vmem:[%s3656_s0 + $0x130] sm:$0xff]  ;;  %v1670_v0 = vld [vmem:[%s3659_s3 + $0x40] sm:$0xff] }
  0x66   :  { %1695 = vperm.xlu0 %2578, %v1665_v28   ;;  %v2142_v45 = vcombine.high %v52_v38, %v56_v39  ;;  %v60_v50 = vld [vmem:[%s3656_s0 + $0x118] sm:$0xff]  ;;  %v1668_v52 = vld [vmem:[%s3659_s3 + $0x30] sm:$0xff]  ;;  %v2141_v55 = vcombine.low %v52_v38, %v56_v39  ;;  %v2148_v56 = vcombine.high %v59_v48, %v63_v49  ;;  %v2147_v1 = vcombine.low %v59_v48, %v63_v49  ;;  %v1563_v2 = vld [vmem:[%s3658_s2 + $0x68] sm:$0xff] }
  0x67   :  { %1603 = vperm.xlu1 %2577, %v1557_v30   ;;  %v64_v51 = vld [vmem:[%s3656_s0 + $0x138] sm:$0xff]  ;;  %v67_v60 = vld [vmem:[%s3656_s0 + $0x150] sm:$0xff]  ;;  %v1675_v7 = vld [vmem:[%s3659_s3 + $0x68] sm:$0xff] }
  0x68   :  { %v1561_v54 = vld [vmem:[%s3658_s2 + $0x58] sm:$0xff]  ;;  %v2150_v57 = vcombine.high %v60_v50, %v64_v51  ;;  %v71_v61 = vld [vmem:[%s3656_s0 + $0x170] sm:$0xff]  ;;  %v2149_v3 = vcombine.low %v60_v50, %v64_v51  ;;  %v1562_v18 = vld [vmem:[%s3658_s2 + $0x60] sm:$0xff] }
  0x69   :  { %v1673_v59 = vld [vmem:[%s3659_s3 + $0x58] sm:$0xff]  ;;  %v2156_v4 = vcombine.high %v67_v60, %v71_v61  ;;  %v1560_v6 = vld [vmem:[%s3658_s2 + $0x50] sm:$0xff]  ;;  %v2155_v13 = vcombine.low %v67_v60, %v71_v61  ;;  %v1674_v23 = vld [vmem:[%s3659_s3 + $0x60] sm:$0xff] }
  0x6a   :  { %1588 = vperm.xlu0 %2578, %v1554_v34   ;;  %v68_v62 = vld [vmem:[%s3656_s0 + $0x158] sm:$0xff]  ;;  %v75_v8 = vld [vmem:[%s3656_s0 + $0x190] sm:$0xff] }
  0x6b   :  { %1156 = vmatmul.mubr.bf16.gmra.mrb[36].mxu0 %v2123_v29  ;;  %1715 = vperm.xlu1 %2577, %v1669_v35   ;;  %v72_v63 = vld [vmem:[%s3656_s0 + $0x178] sm:$0xff]  ;;  %v79_v9 = vld [vmem:[%s3656_s0 + $0x1b0] sm:$0xff] }
  0x6c   :  { %1253 = vmatmul.mubr.bf16.gmra.mrb[36].mxu1 %v2125_v31  ;;  %1163 = vmatprep.mubr.bf16.mxu0 %v2132_v32  ;;  %v2158_v5 = vcombine.high %v68_v62, %v72_v63  ;;  %v76_v10 = vld [vmem:[%s3656_s0 + $0x198] sm:$0xff]  ;;  %v1672_v12 = vld [vmem:[%s3659_s3 + $0x50] sm:$0xff]  ;;  %v2157_v15 = vcombine.low %v68_v62, %v72_v63  ;;  %v2164_v16 = vcombine.high %v75_v8, %v79_v9 }
  0x6d   :  { %1260 = vmatprep.mubr.bf16.mxu1 %v2134_v33  ;;  %v80_v11 = vld [vmem:[%s3656_s0 + $0x1b8] sm:$0xff]  ;;  %v83_v19 = vld [vmem:[%s3656_s0 + $0x1d0] sm:$0xff]  ;;  %v2163_v24 = vcombine.low %v75_v8, %v79_v9 }
  0x6e   :  { %1700 = vperm.xlu0 %2578, %v1666_v40   ;;  %v1565_v14 = vld [vmem:[%s3658_s2 + $0x78] sm:$0xff]  ;;  %v2166_v17 = vcombine.high %v76_v10, %v80_v11  ;;  %v87_v20 = vld [vmem:[%s3656_s0 + $0x1f0] sm:$0xff]  ;;  %v2165_v25 = vcombine.low %v76_v10, %v80_v11 }
  0x6f   :  { %1613 = vperm.xlu1 %2577, %v1559_v42   ;;  %v84_v21 = vld [vmem:[%s3656_s0 + $0x1d8] sm:$0xff]  ;;  %v2172_v26 = vcombine.high %v83_v19, %v87_v20  ;;  %v1564_v28 = vld [vmem:[%s3658_s2 + $0x70] sm:$0xff]  ;;  %v2171_v29 = vcombine.low %v83_v19, %v87_v20  ;;  %v1855_v19 = vld [vmem:[%s3661_s5 + $0x8] sm:$0xff] }
  0x70   :  { %v88_v22 = vld [vmem:[%s3656_s0 + $0x1f8] sm:$0xff] }
  0x71   :  { %v2174_v27 = vcombine.high %v84_v21, %v88_v22  ;;  %v2173_v30 = vcombine.low %v84_v21, %v88_v22 }
  0x72   :  { %1598 = vperm.xlu0 %2578, %v1556_v46  }
  0x73   :  { %1164 = vmatmul.mubr.bf16.gmra.mrb[40].mxu0 %v2131_v41  ;;  %1725 = vperm.xlu1 %2577, %v1671_v47  }
  0x74   :  { %1261 = vmatmul.mubr.bf16.gmra.mrb[40].mxu1 %v2133_v43  ;;  %1171 = vmatprep.mubr.bf16.mxu0 %v2140_v44 }
  0x75   :  { %1268 = vmatprep.mubr.bf16.mxu1 %v2142_v45 }
  0x76   :  { %1710 = vperm.xlu0 %2578, %v1668_v52  }
  0x77   :  { %1623 = vperm.xlu1 %2577, %v1561_v54  }
  0x7a   :  { %1608 = vperm.xlu0 %2578, %v1558_v58  }
  0x7b   :  { %1172 = vmatmul.mubr.bf16.gmra.mrb[44].mxu0 %v2139_v53  ;;  %1735 = vperm.xlu1 %2577, %v1673_v59  }
  0x7c   :  { %1269 = vmatmul.mubr.bf16.gmra.mrb[44].mxu1 %v2141_v55  ;;  %1179 = vmatprep.mubr.bf16.mxu0 %v2148_v56 }
  0x7d   :  { %1276 = vmatprep.mubr.bf16.mxu1 %v2150_v57 }
  0x7e   :  { %1720 = vperm.xlu0 %2578, %v1670_v0  }
  0x7f   :  { %1633 = vperm.xlu1 %2577, %v1563_v2  }
  0x82   :  { %1618 = vperm.xlu0 %2578, %v1560_v6  }
  0x83   :  { %1180 = vmatmul.mubr.bf16.gmra.mrb[48].mxu0 %v2147_v1  ;;  %1745 = vperm.xlu1 %2577, %v1675_v7  }
  0x84   :  { %1277 = vmatmul.mubr.bf16.gmra.mrb[48].mxu1 %v2149_v3  ;;  %1187 = vmatprep.mubr.bf16.mxu0 %v2156_v4 }
  0x85   :  { %1284 = vmatprep.mubr.bf16.mxu1 %v2158_v5 }
  0x86   :  { %1730 = vperm.xlu0 %2578, %v1672_v12  }
  0x87   :  { %1643 = vperm.xlu1 %2577, %v1565_v14  }
  0x8a   :  { %1628 = vperm.xlu0 %2578, %v1562_v18   ;;  %v1854_v18 = vld [vmem:[%s3661_s5] sm:$0xff] }
  0x8b   :  { %1188 = vmatmul.mubr.bf16.gmra.mrb[52].mxu0 %v2155_v13  ;;  %v2563_v22 = vpack.c.bf16 %v1855_v19, %v1854_v18 }
  0x8c   :  { %1285 = vmatmul.mubr.bf16.gmra.mrb[52].mxu1 %v2157_v15  ;;  %1195 = vmatprep.mubr.bf16.mxu0 %v2164_v16 }
  0x8d   :  { %1292 = vmatprep.mubr.bf16.mxu1 %v2166_v17  ;;  %2564 = vmatprep.subr.bf16.mxu0 %v2563_v22 }
  0x8e   :  { %1740 = vperm.xlu0 %2578, %v1674_v23   ;;  %2571 = vmatprep.subr.bf16.mxu1 %v2563_v22 }
  0x8f   :  { %2566 = vmatpush3.bf16.msra.mxu0 %v2563_v22  ;;  %2573 = vmatpush3.bf16.msra.mxu1 %v2563_v22 }
  0x92   :  { %1638 = vperm.xlu0 %2578, %v1564_v28  }
  0x93   :  { %1196 = vmatmul.mubr.bf16.gmra.mrb[56].mxu0 %v2163_v24 }
  0x94   :  { %1293 = vmatmul.mubr.bf16.gmra.mrb[56].mxu1 %v2165_v25  ;;  %1203 = vmatprep.mubr.bf16.mxu0 %v2172_v26 }
  0x95   :  { %1300 = vmatprep.mubr.bf16.mxu1 %v2174_v27 }
  0x9b   :  { %1204 = vmatmul.mubr.bf16.gmra.mrb[60].mxu0 %v2171_v29 }
  0x9c   :  { %1301 = vmatmul.mubr.bf16.gmra.mrb[60].mxu1 %v2173_v30 }
  0xf6   :  { %v2271_v31 = vpop.f32.mrb[0].mxu0 }
  0xf7   :  { %v2335_v32 = vpop.f32.mrb[0].mxu1  ;;  %v2272_v33 = vpop.f32.mrb[1].mxu0 }
  0xf8   :  { %v2273_v34 = vadd.f32 %v2272_v33, %v2271_v31  ;;  %v2336_v35 = vpop.f32.mrb[1].mxu1  ;;  %v2274_v36 = vpop.f32.mrb[2].mxu0 }
  0xf9   :  { %v2337_v37 = vadd.f32 %v2336_v35, %v2335_v32  ;;  %v2338_v38 = vpop.f32.mrb[2].mxu1  ;;  %v2275_v39 = vpop.f32.mrb[3].mxu0 }
  0xfa   :  { %v2276_v40 = vadd.f32 %v2275_v39, %v2274_v36  ;;  %v2339_v41 = vpop.f32.mrb[3].mxu1 }
  0xfb   :  { %v3214_v42 = vadd.f32 %v2337_v37, %v2273_v34  ;;  %v2340_v43 = vadd.f32 %v2339_v41, %v2338_v38 }
  0xfd   :  { %v3216_v44 = vadd.f32 %v2340_v43, %v2276_v40 }
  0xfe   :  { %v2277_v45 = vpop.f32.mrb[4].mxu0 }
  0xff   :  { %v2341_v46 = vpop.f32.mrb[4].mxu1  ;;  %v2278_v47 = vpop.f32.mrb[5].mxu0 }
 0x100   :  { %v2279_v48 = vadd.f32 %v2278_v47, %v2277_v45  ;;  %v2342_v49 = vpop.f32.mrb[5].mxu1  ;;  %v2280_v50 = vpop.f32.mrb[6].mxu0 }
 0x101   :  { %v2343_v51 = vadd.f32 %v2342_v49, %v2341_v46  ;;  %v2344_v52 = vpop.f32.mrb[6].mxu1  ;;  %v2281_v53 = vpop.f32.mrb[7].mxu0 }
 0x102   :  { %v2282_v54 = vadd.f32 %v2281_v53, %v2280_v50  ;;  %v2345_v55 = vpop.f32.mrb[7].mxu1 }
 0x103   :  { %v3218_v56 = vadd.f32 %v2343_v51, %v2279_v48  ;;  %v2346_v57 = vadd.f32 %v2345_v55, %v2344_v52 }
 0x105   :  { %v3220_v58 = vadd.f32 %v2346_v57, %v2282_v54 }
 0x106   :  { %v2283_v59 = vpop.f32.mrb[8].mxu0 }
 0x107   :  { %v2347_v60 = vpop.f32.mrb[8].mxu1  ;;  %v2284_v61 = vpop.f32.mrb[9].mxu0 }
 0x108   :  { %v2285_v62 = vadd.f32 %v2284_v61, %v2283_v59  ;;  %v2348_v63 = vpop.f32.mrb[9].mxu1  ;;  %v2286_v0 = vpop.f32.mrb[10].mxu0 }
 0x109   :  { %v2349_v1 = vadd.f32 %v2348_v63, %v2347_v60  ;;  %v2350_v2 = vpop.f32.mrb[10].mxu1  ;;  %v2287_v3 = vpop.f32.mrb[11].mxu0 }
 0x10a   :  { %v2288_v4 = vadd.f32 %v2287_v3, %v2286_v0  ;;  %v2351_v5 = vpop.f32.mrb[11].mxu1 }
 0x10b   :  { %v3222_v6 = vadd.f32 %v2349_v1, %v2285_v62  ;;  %v2352_v7 = vadd.f32 %v2351_v5, %v2350_v2 }
 0x10d   :  { %v3224_v8 = vadd.f32 %v2352_v7, %v2288_v4 }
 0x10e   :  { %v2289_v9 = vpop.f32.mrb[12].mxu0 }
 0x10f   :  { %v2353_v10 = vpop.f32.mrb[12].mxu1  ;;  %v2290_v11 = vpop.f32.mrb[13].mxu0 }
 0x110   :  { %v2291_v12 = vadd.f32 %v2290_v11, %v2289_v9  ;;  %v2354_v13 = vpop.f32.mrb[13].mxu1  ;;  %v2292_v14 = vpop.f32.mrb[14].mxu0 }
 0x111   :  { %v2355_v15 = vadd.f32 %v2354_v13, %v2353_v10  ;;  %v2356_v16 = vpop.f32.mrb[14].mxu1  ;;  %v2293_v17 = vpop.f32.mrb[15].mxu0 }
 0x112   :  { %v2294_v20 = vadd.f32 %v2293_v17, %v2292_v14  ;;  %v2357_v21 = vpop.f32.mrb[15].mxu1 }
 0x113   :  { %v3232_v23 = vadd.f32 %v2355_v15, %v2291_v12  ;;  %v2358_v24 = vadd.f32 %v2357_v21, %v2356_v16 }
 0x115   :  { %v3234_v25 = vadd.f32 %v2358_v24, %v2294_v20 }
 0x116   :  { %v2295_v26 = vpop.f32.mrb[16].mxu0 }
 0x117   :  { %v2359_v27 = vpop.f32.mrb[16].mxu1  ;;  %v2296_v28 = vpop.f32.mrb[17].mxu0 }
 0x118   :  { %v2297_v29 = vadd.f32 %v2296_v28, %v2295_v26  ;;  %v2360_v30 = vpop.f32.mrb[17].mxu1  ;;  %v2298_v31 = vpop.f32.mrb[18].mxu0 }
 0x119   :  { %v2361_v32 = vadd.f32 %v2360_v30, %v2359_v27  ;;  %v2362_v33 = vpop.f32.mrb[18].mxu1  ;;  %v2299_v34 = vpop.f32.mrb[19].mxu0 }
 0x11a   :  { %v2300_v35 = vadd.f32 %v2299_v34, %v2298_v31  ;;  %v2363_v36 = vpop.f32.mrb[19].mxu1 }
 0x11b   :  { %v3236_v37 = vadd.f32 %v2361_v32, %v2297_v29  ;;  %v2364_v38 = vadd.f32 %v2363_v36, %v2362_v33 }
 0x11d   :  { %v3238_v39 = vadd.f32 %v2364_v38, %v2300_v35 }
 0x11e   :  { %v2301_v40 = vpop.f32.mrb[20].mxu0 }
 0x11f   :  { %v2365_v41 = vpop.f32.mrb[20].mxu1  ;;  %v2302_v43 = vpop.f32.mrb[21].mxu0 }
 0x120   :  { %v2303_v45 = vadd.f32 %v2302_v43, %v2301_v40  ;;  %v2366_v46 = vpop.f32.mrb[21].mxu1  ;;  %v2304_v47 = vpop.f32.mrb[22].mxu0 }
 0x121   :  { %v2367_v48 = vadd.f32 %v2366_v46, %v2365_v41  ;;  %v2368_v49 = vpop.f32.mrb[22].mxu1  ;;  %v2305_v50 = vpop.f32.mrb[23].mxu0 }
 0x122   :  { %v2306_v51 = vadd.f32 %v2305_v50, %v2304_v47  ;;  %v2369_v52 = vpop.f32.mrb[23].mxu1 }
 0x123   :  { %v3240_v53 = vadd.f32 %v2367_v48, %v2303_v45  ;;  %v2370_v54 = vadd.f32 %v2369_v52, %v2368_v49 }
 0x125   :  { %v3242_v55 = vadd.f32 %v2370_v54, %v2306_v51 }
 0x126   :  { %v2307_v57 = vpop.f32.mrb[24].mxu0 }
 0x127   :  { %v2371_v59 = vpop.f32.mrb[24].mxu1  ;;  %v2308_v60 = vpop.f32.mrb[25].mxu0 }
 0x128   :  { %v2309_v61 = vadd.f32 %v2308_v60, %v2307_v57  ;;  %v2372_v62 = vpop.f32.mrb[25].mxu1  ;;  %v2310_v63 = vpop.f32.mrb[26].mxu0 }
 0x129   :  { %v2373_v0 = vadd.f32 %v2372_v62, %v2371_v59  ;;  %v2374_v1 = vpop.f32.mrb[26].mxu1  ;;  %v2311_v2 = vpop.f32.mrb[27].mxu0 }
 0x12a   :  { %v2312_v3 = vadd.f32 %v2311_v2, %v2310_v63  ;;  %v2375_v4 = vpop.f32.mrb[27].mxu1 }
 0x12b   :  { %v3244_v5 = vadd.f32 %v2373_v0, %v2309_v61  ;;  %v2376_v7 = vadd.f32 %v2375_v4, %v2374_v1 }
 0x12d   :  { %v3246_v9 = vadd.f32 %v2376_v7, %v2312_v3 }
 0x12e   :  { %v2313_v10 = vpop.f32.mrb[28].mxu0 }
 0x12f   :  { %v2377_v11 = vpop.f32.mrb[28].mxu1  ;;  %v2314_v12 = vpop.f32.mrb[29].mxu0 }
 0x130   :  { %v2315_v13 = vadd.f32 %v2314_v12, %v2313_v10  ;;  %v2378_v14 = vpop.f32.mrb[29].mxu1  ;;  %v2316_v15 = vpop.f32.mrb[30].mxu0 }
 0x131   :  { %v2379_v16 = vadd.f32 %v2378_v14, %v2377_v11  ;;  %v2380_v17 = vpop.f32.mrb[30].mxu1  ;;  %v2317_v18 = vpop.f32.mrb[31].mxu0 }
 0x132   :  { %v2318_v19 = vadd.f32 %v2317_v18, %v2316_v15  ;;  %v2381_v20 = vpop.f32.mrb[31].mxu1 }
 0x133   :  { %v3248_v21 = vadd.f32 %v2379_v16, %v2315_v13  ;;  %v2382_v22 = vadd.f32 %v2381_v20, %v2380_v17 }
 0x135   :  { %v3250_v24 = vadd.f32 %v2382_v22, %v2318_v19 }
 0x136   :  { %v2399_v26 = vpop.f32.mrb[32].mxu0 }
 0x137   :  { %v2463_v27 = vpop.f32.mrb[32].mxu1  ;;  %v2400_v28 = vpop.f32.mrb[33].mxu0 }
 0x138   :  { %v2401_v29 = vadd.f32 %v2400_v28, %v2399_v26  ;;  %v2464_v30 = vpop.f32.mrb[33].mxu1  ;;  %v2402_v31 = vpop.f32.mrb[34].mxu0 }
 0x139   :  { %v2465_v32 = vadd.f32 %v2464_v30, %v2463_v27  ;;  %v2466_v33 = vpop.f32.mrb[34].mxu1  ;;  %v2403_v34 = vpop.f32.mrb[35].mxu0 }
 0x13a   :  { %v1150_v35 = vadd.f32 %v2401_v29, %v3214_v42  ;;  %v2404_v36 = vadd.f32 %v2403_v34, %v2402_v31  ;;  %v2467_v38 = vpop.f32.mrb[35].mxu1 }
 0x13b   :  { %v2468_v40 = vadd.f32 %v2467_v38, %v2466_v33 }
 0x13c   :  { %v3253_v41 = vadd.f32 %v2465_v32, %v1150_v35  ;;  %v1153_v43 = vadd.f32 %v2404_v36, %v3216_v44 }
 0x13e   :  { %v3256_v45 = vadd.f32 %v2468_v40, %v1153_v43  ;;  %v2405_v46 = vpop.f32.mrb[36].mxu0  ;;  %v1310_v47 = vsel %vm1309_vm0, %v3253_v41, 0.0  ;;  %v1374_v48 = vmul.f32 %v3253_v41, %v3253_v41 }
 0x13f   :  { %v2469_v49 = vpop.f32.mrb[36].mxu1  ;;  %v2406_v50 = vpop.f32.mrb[37].mxu0  ;;  %1311 = vadd.xlane.f32.xlu0 %v1310_v47 }
 0x140   :  { %v2407_v42 = vadd.f32 %v2406_v50, %v2405_v46  ;;  %v2470_v51 = vpop.f32.mrb[37].mxu1  ;;  %v2408_v52 = vpop.f32.mrb[38].mxu0  ;;  %v1390_v54 = vsel %vm1309_vm0, %v1374_v48, 0.0  ;;  %v1375_v44 = vmul.f32 %v3256_v45, %v3256_v45  ;;  %v1313_v0 = vsel %vm1309_vm0, %v3256_v45, 0.0 }
 0x141   :  { %v2471_v57 = vadd.f32 %v2470_v51, %v2469_v49  ;;  %v2472_v59 = vpop.f32.mrb[38].mxu1  ;;  %v2409_v60 = vpop.f32.mrb[39].mxu0  ;;  %1391 = vadd.xlane.f32.xlu1 %v1390_v54 }
 0x142   :  { %v1158_v61 = vadd.f32 %v2407_v42, %v3218_v56  ;;  %v2410_v62 = vadd.f32 %v2409_v60, %v2408_v52  ;;  %v2473_v63 = vpop.f32.mrb[39].mxu1  ;;  %v1393_v4 = vsel %vm1309_vm0, %v1375_v44, 0.0 }
 0x143   :  { %v2474_v1 = vadd.f32 %v2473_v63, %v2472_v59  ;;  %1314 = vadd.xlane.f32.xlu0 %v1313_v0 }
 0x144   :  { %v3268_v2 = vadd.f32 %v2471_v57, %v1158_v61  ;;  %v1161_v3 = vadd.f32 %v2410_v62, %v3220_v58 }
 0x145   :  { %1394 = vadd.xlane.f32.xlu1 %v1393_v4 }
 0x146   :  { %v3272_v7 = vadd.f32 %v2474_v1, %v1161_v3  ;;  %v2411_v10 = vpop.f32.mrb[40].mxu0  ;;  %v1316_v56 = vsel %vm1309_vm0, %v3268_v2, 0.0  ;;  %v1376_v11 = vmul.f32 %v3268_v2, %v3268_v2 }
 0x147   :  { %v2475_v12 = vpop.f32.mrb[40].mxu1  ;;  %v2412_v13 = vpop.f32.mrb[41].mxu0  ;;  %1317 = vadd.xlane.f32.xlu0 %v1316_v56 }
 0x148   :  { %v2413_v14 = vadd.f32 %v2412_v13, %v2411_v10  ;;  %v2476_v15 = vpop.f32.mrb[41].mxu1  ;;  %v2414_v16 = vpop.f32.mrb[42].mxu0  ;;  %v1319_v58 = vsel %vm1309_vm0, %v3272_v7, 0.0  ;;  %v1377_v17 = vmul.f32 %v3272_v7, %v3272_v7  ;;  %v1396_v28 = vsel %vm1309_vm0, %v1376_v11, 0.0 }
 0x149   :  { %v2477_v18 = vadd.f32 %v2476_v15, %v2475_v12  ;;  %v2478_v19 = vpop.f32.mrb[42].mxu1  ;;  %v2415_v20 = vpop.f32.mrb[43].mxu0  ;;  %1320 = vadd.xlane.f32.xlu1 %v1319_v58 }
 0x14a   :  { %v1166_v22 = vadd.f32 %v2413_v14, %v3222_v6  ;;  %v2416_v26 = vadd.f32 %v2415_v20, %v2414_v16  ;;  %v2479_v27 = vpop.f32.mrb[43].mxu1  ;;  %v1399_v32 = vsel %vm1309_vm0, %v1377_v17, 0.0 }
 0x14b   :  { %v2480_v29 = vadd.f32 %v2479_v27, %v2478_v19  ;;  %1397 = vadd.xlane.f32.xlu0 %v1396_v28 }
 0x14c   :  { %v3284_v30 = vadd.f32 %v2477_v18, %v1166_v22  ;;  %v1169_v31 = vadd.f32 %v2416_v26, %v3224_v8 }
 0x14d   :  { %1400 = vadd.xlane.f32.xlu1 %v1399_v32 }
 0x14e   :  { %v3288_v33 = vadd.f32 %v2480_v29, %v1169_v31  ;;  %v2417_v34 = vpop.f32.mrb[44].mxu0  ;;  %v1322_v35 = vsel %vm1309_vm0, %v3284_v30, 0.0  ;;  %v1378_v6 = vmul.f32 %v3284_v30, %v3284_v30 }
 0x14f   :  { %v2481_v36 = vpop.f32.mrb[44].mxu1  ;;  %v2418_v38 = vpop.f32.mrb[45].mxu0  ;;  %1323 = vadd.xlane.f32.xlu0 %v1322_v35 }
 0x150   :  { %v2419_v40 = vadd.f32 %v2418_v38, %v2417_v34  ;;  %v2482_v43 = vpop.f32.mrb[45].mxu1  ;;  %v2420_v46 = vpop.f32.mrb[46].mxu0  ;;  %v1325_v8 = vsel %vm1309_vm0, %v3288_v33, 0.0  ;;  %v1379_v47 = vmul.f32 %v3288_v33, %v3288_v33  ;;  %v1402_v54 = vsel %vm1309_vm0, %v1378_v6, 0.0 }
 0x151   :  { %v2483_v48 = vadd.f32 %v2482_v43, %v2481_v36  ;;  %v2484_v49 = vpop.f32.mrb[46].mxu1  ;;  %v2421_v50 = vpop.f32.mrb[47].mxu0  ;;  %1326 = vadd.xlane.f32.xlu1 %v1325_v8 }
 0x152   :  { %v1174_v42 = vadd.f32 %v2419_v40, %v3232_v23  ;;  %v2422_v51 = vadd.f32 %v2421_v50, %v2420_v46  ;;  %v2485_v52 = vpop.f32.mrb[47].mxu1  ;;  %v1405_v60 = vsel %vm1309_vm0, %v1379_v47, 0.0 }
 0x153   :  { %v2486_v44 = vadd.f32 %v2485_v52, %v2484_v49  ;;  %1403 = vadd.xlane.f32.xlu0 %v1402_v54 }
 0x154   :  { %v3300_v57 = vadd.f32 %v2483_v48, %v1174_v42  ;;  %v1177_v59 = vadd.f32 %v2422_v51, %v3234_v25  ;;  %v3336_v42 = vpop.permute.xlu0 %1573 }
 0x155   :  { %1406 = vadd.xlane.f32.xlu1 %v1405_v60 }
 0x156   :  { %v3304_v61 = vadd.f32 %v2486_v44, %v1177_v59  ;;  %v2423_v62 = vpop.f32.mrb[48].mxu0  ;;  %v1328_v63 = vsel %vm1309_vm0, %v3300_v57, 0.0  ;;  %v1380_v23 = vmul.f32 %v3300_v57, %v3300_v57 }
 0x157   :  { %v2487_v0 = vpop.f32.mrb[48].mxu1  ;;  %v2424_v1 = vpop.f32.mrb[49].mxu0  ;;  %1329 = vadd.xlane.f32.xlu0 %v1328_v63 }
 0x158   :  { %v2425_v3 = vadd.f32 %v2424_v1, %v2423_v62  ;;  %v2488_v4 = vpop.f32.mrb[49].mxu1  ;;  %v2426_v10 = vpop.f32.mrb[50].mxu0  ;;  %v1331_v25 = vsel %vm1309_vm0, %v3304_v61, 0.0  ;;  %v1381_v56 = vmul.f32 %v3304_v61, %v3304_v61  ;;  %v1408_v58 = vsel %vm1309_vm0, %v1380_v23, 0.0 }
 0x159   :  { %v2489_v11 = vadd.f32 %v2488_v4, %v2487_v0  ;;  %v2490_v12 = vpop.f32.mrb[50].mxu1  ;;  %v2427_v13 = vpop.f32.mrb[51].mxu0  ;;  %1332 = vadd.xlane.f32.xlu1 %v1331_v25  ;;  %v1856_v4 = vld [vmem:[%s3661_s5 + $0x10] sm:$0xff] }
 0x15a   :  { %v1182_v14 = vadd.f32 %v2425_v3, %v3236_v37  ;;  %v2428_v15 = vadd.f32 %v2427_v13, %v2426_v10  ;;  %v2491_v16 = vpop.f32.mrb[51].mxu1  ;;  %v1411_v20 = vsel %vm1309_vm0, %v1381_v56, 0.0  ;;  %v1857_v10 = vld [vmem:[%s3661_s5 + $0x18] sm:$0xff] }
 0x15b   :  { %v2492_v17 = vadd.f32 %v2491_v16, %v2490_v12  ;;  %1409 = vadd.xlane.f32.xlu0 %v1408_v58  ;;  %v2567_v13 = vpack.c.bf16 %v1857_v10, %v1856_v4 }
 0x15c   :  { %v3316_v18 = vadd.f32 %v2489_v11, %v1182_v14  ;;  %v1185_v19 = vadd.f32 %v2428_v15, %v3238_v39 }
 0x15d   :  { %1412 = vadd.xlane.f32.xlu1 %v1411_v20  ;;  %2568 = vmatprep.subr.bf16.mxu0 %v2567_v13 }
 0x15e   :  { %v3320_v22 = vadd.f32 %v2492_v17, %v1185_v19  ;;  %v2429_v26 = vpop.f32.mrb[52].mxu0  ;;  %v1334_v27 = vsel %vm1309_vm0, %v3316_v18, 0.0  ;;  %v1382_v37 = vmul.f32 %v3316_v18, %v3316_v18  ;;  %2572 = vmatprep.subr.bf16.mxu1 %v2567_v13  ;;  %2570 = vmatpush3.bf16.msra.mxu0 %v2567_v13  ;;  %v3360_v17 = vpop.permute.xlu0 %1680 }
 0x15f   :  { %v2493_v28 = vpop.f32.mrb[52].mxu1  ;;  %v2430_v29 = vpop.f32.mrb[53].mxu0  ;;  %1335 = vadd.xlane.f32.xlu0 %v1334_v27  ;;  %2574 = vmatpush3.bf16.msra.mxu1 %v2567_v13 }
 0x160   :  { %v2431_v31 = vadd.f32 %v2430_v29, %v2429_v26  ;;  %v2494_v32 = vpop.f32.mrb[53].mxu1  ;;  %v2432_v34 = vpop.f32.mrb[54].mxu0  ;;  %v1337_v39 = vsel %vm1309_vm0, %v3320_v22, 0.0  ;;  %v1383_v35 = vmul.f32 %v3320_v22, %v3320_v22  ;;  %v1414_v8 = vsel %vm1309_vm0, %v1382_v37, 0.0 }
 0x161   :  { %v2495_v6 = vadd.f32 %v2494_v32, %v2493_v28  ;;  %v2496_v36 = vpop.f32.mrb[54].mxu1  ;;  %v2433_v38 = vpop.f32.mrb[55].mxu0  ;;  %1338 = vadd.xlane.f32.xlu1 %v1337_v39 }
 0x162   :  { %v1190_v40 = vadd.f32 %v2431_v31, %v3240_v53  ;;  %v2434_v43 = vadd.f32 %v2433_v38, %v2432_v34  ;;  %v2497_v46 = vpop.f32.mrb[55].mxu1  ;;  %v1417_v50 = vsel %vm1309_vm0, %v1383_v35, 0.0 }
 0x163   :  { %v2498_v47 = vadd.f32 %v2497_v46, %v2496_v36  ;;  %1415 = vadd.xlane.f32.xlu0 %v1414_v8  ;;  %v3374_v46 = vpop.permute.xlu0 %1685 }
 0x164   :  { %v3332_v48 = vadd.f32 %v2495_v6, %v1190_v40  ;;  %v1193_v49 = vadd.f32 %v2434_v43, %v3242_v55 }
 0x165   :  { %1418 = vadd.xlane.f32.xlu1 %v1417_v50 }
 0x166   :  { %v3338_v51 = vadd.f32 %v2498_v47, %v1193_v49  ;;  %v2435_v52 = vpop.f32.mrb[56].mxu0  ;;  %v1340_v53 = vsel %vm1309_vm0, %v3332_v48, 0.0  ;;  %v1384_v54 = vmul.f32 %v3332_v48, %v3332_v48 }
 0x167   :  { %v2499_v44 = vpop.f32.mrb[56].mxu1  ;;  %v2436_v59 = vpop.f32.mrb[57].mxu0  ;;  %1341 = vadd.xlane.f32.xlu0 %v1340_v53 }
 0x168   :  { %v2437_v60 = vadd.f32 %v2436_v59, %v2435_v52  ;;  %v2500_v62 = vpop.f32.mrb[57].mxu1  ;;  %v2438_v55 = vpop.f32.mrb[58].mxu0  ;;  %v1343_v63 = vsel %vm1309_vm0, %v3338_v51, 0.0  ;;  %v1385_v23 = vmul.f32 %v3338_v51, %v3338_v51  ;;  %v1420_v12 = vsel %vm1309_vm0, %v1384_v54, 0.0 }
 0x169   :  { %v2501_v0 = vadd.f32 %v2500_v62, %v2499_v44  ;;  %v2502_v1 = vpop.f32.mrb[58].mxu1  ;;  %v2439_v3 = vpop.f32.mrb[59].mxu0  ;;  %1344 = vadd.xlane.f32.xlu1 %v1343_v63 }
 0x16a   :  { %v1198_v25 = vadd.f32 %v2437_v60, %v3244_v5  ;;  %v2440_v56 = vadd.f32 %v2439_v3, %v2438_v55  ;;  %v2503_v11 = vpop.f32.mrb[59].mxu1  ;;  %v1423_v58 = vsel %vm1309_vm0, %v1385_v23, 0.0  ;;  %v3389_v44 = vpop.permute.xlu0 %1583  ;;  %v1677_v23 = vld [vmem:[%s3659_s3 + $0x78] sm:$0xff]  ;;  %v1676_v3 = vld [vmem:[%s3659_s3 + $0x70] sm:$0xff] }
 0x16b   :  { %v2504_v14 = vadd.f32 %v2503_v11, %v2502_v1  ;;  %1421 = vadd.xlane.f32.xlu0 %v1420_v12  ;;  %v3396_v62 = vpop.permute.xlu1 %1568 }
 0x16c   :  { %v3356_v15 = vadd.f32 %v2501_v0, %v1198_v25  ;;  %v1201_v16 = vadd.f32 %v2440_v56, %v3246_v9 }
 0x16d   :  { %1424 = vadd.xlane.f32.xlu1 %v1423_v58 }
 0x16e   :  { %v3362_v5 = vadd.f32 %v2504_v14, %v1201_v16  ;;  %v2441_v19 = vpop.f32.mrb[60].mxu0  ;;  %v1346_v20 = vsel %vm1309_vm0, %v3356_v15, 0.0  ;;  %v1386_v26 = vmul.f32 %v3356_v15, %v3356_v15  ;;  %v3394_v60 = vpop.permute.xlu0 %1690 }
 0x16f   :  { %v2505_v27 = vpop.f32.mrb[60].mxu1  ;;  %v2442_v9 = vpop.f32.mrb[61].mxu0  ;;  %1347 = vadd.xlane.f32.xlu0 %v1346_v20 }
 0x170   :  { %v2443_v37 = vadd.f32 %v2442_v9, %v2441_v19  ;;  %v2506_v28 = vpop.f32.mrb[61].mxu1  ;;  %v2444_v29 = vpop.f32.mrb[62].mxu0  ;;  %v1349_v31 = vsel %vm1309_vm0, %v3362_v5, 0.0  ;;  %v1387_v32 = vmul.f32 %v3362_v5, %v3362_v5  ;;  %v1426_v40 = vsel %vm1309_vm0, %v1386_v26, 0.0 }
 0x171   :  { %v2507_v34 = vadd.f32 %v2506_v28, %v2505_v27  ;;  %v2508_v39 = vpop.f32.mrb[62].mxu1  ;;  %v2445_v35 = vpop.f32.mrb[63].mxu0  ;;  %1350 = vadd.xlane.f32.xlu1 %v1349_v31 }
 0x172   :  { %v1206_v6 = vadd.f32 %v2443_v37, %v3248_v21  ;;  %v2446_v36 = vadd.f32 %v2445_v35, %v2444_v29  ;;  %v2509_v38 = vpop.f32.mrb[63].mxu1  ;;  %v1429_v49 = vsel %vm1309_vm0, %v1387_v32, 0.0  ;;  %v3398_v55 = vpop.permute.xlu0 %1695 }
 0x173   :  { %v2510_v43 = vadd.f32 %v2509_v38, %v2508_v39  ;;  %1427 = vadd.xlane.f32.xlu0 %v1426_v40  ;;  %v3400_v63 = vpop.permute.xlu1 %1578 }
 0x174   :  { %v3376_v8 = vadd.f32 %v2507_v34, %v1206_v6  ;;  %v1209_v47 = vadd.f32 %v2446_v36, %v3250_v24 }
 0x175   :  { %1430 = vadd.xlane.f32.xlu1 %v1429_v49 }
 0x176   :  { %v3380_v50 = vadd.f32 %v2510_v43, %v1209_v47  ;;  %v1352_v21 = vsel %vm1309_vm0, %v3376_v8, 0.0  ;;  %v1388_v52 = vmul.f32 %v3376_v8, %v3376_v8  ;;  %v3405_v0 = vpop.permute.xlu0 %1588 }
 0x177   :  { %1353 = vadd.xlane.f32.xlu0 %v1352_v21  ;;  %v3407_v1 = vpop.permute.xlu1 %1593 }
 0x178   :  { %3664 = vst [vmem:[#allocation5_spill] sm:$0xff] %v3380_v50  ;;  %v1432_v53 = vsel %vm1309_vm0, %v1388_v52, 0.0  ;;  %v1389_v54 = vmul.f32 %v3380_v50, %v3380_v50  ;;  %v1355_v24 = vsel %vm1309_vm0, %v3380_v50, 0.0 }
 0x179   :  { %1433 = vadd.xlane.f32.xlu1 %v1432_v53 }
 0x17a   :  { %v1435_v59 = vsel %vm1309_vm0, %v1389_v54, 0.0  ;;  %v3412_v4 = vpop.permute.xlu0 %1700 }
 0x17b   :  { %1356 = vadd.xlane.f32.xlu0 %v1355_v24  ;;  %v3414_v10 = vpop.permute.xlu1 %1705 }
 0x17d   :  { %1436 = vadd.xlane.f32.xlu1 %v1435_v59 }
 0x17e   :  { %v3416_v25 = vpop.permute.xlu0 %1598 }
 0x17f   :  { %v3418_v56 = vpop.permute.xlu1 %1603 }
 0x182   :  { %v3420_v11 = vpop.permute.xlu0 %1710 }
 0x183   :  { %v3422_v12 = vpop.permute.xlu1 %1715 }
 0x186   :  { %v3424_v13 = vpop.permute.xlu0 %1608 }
 0x187   :  { %v3426_v14 = vpop.permute.xlu1 %1613 }
 0x18a   :  { %v3428_v16 = vpop.permute.xlu0 %1720 }
 0x18b   :  { %v3430_v58 = vpop.permute.xlu1 %1725 }
 0x18e   :  { %1755 = vperm.xlu1 %2577, %v1677_v23   ;;  %v3432_v19 = vpop.permute.xlu0 %1618 }
 0x18f   :  { %v3434_v20 = vpop.permute.xlu1 %1623 }
 0x191   :  { %1750 = vperm.xlu0 %2578, %v1676_v3  }
 0x192   :  { %v3436_v26 = vpop.permute.xlu0 %1730 }
 0x193   :  { %v3438_v27 = vpop.permute.xlu1 %1735 }
 0x196   :  { %v3440_v9 = vpop.permute.xlu0 %1628 }
 0x197   :  { %v3442_v37 = vpop.permute.xlu1 %1633 }
 0x19a   :  { %v3444_v28 = vpop.permute.xlu0 %1740 }
 0x19b   :  { %v3446_v29 = vpop.permute.xlu1 %1745 }
 0x19e   :  { %v3448_v31 = vpop.permute.xlu0 %1638 }
 0x19f   :  { %3665 = vst [vmem:[#allocation6_spill] sm:$0xff] %v3448_v31  ;;  %v3450_v32 = vpop.permute.xlu1 %1643 }
 0x1a0   :  { %3666 = vst [vmem:[#allocation7_spill] sm:$0xff] %v3450_v32 }
 0x1cc   :  { %v1312_v34 = vpop.xlane.xlu0 %1311 }
 0x1cd   :  { %v1358_v39 = vmul.f32 0.03125, %v1312_v34 }
 0x1ce   :  { %v1392_v35 = vpop.xlane.xlu1 %1391 }
 0x1cf   :  { %v1454_v6 = vmul.f32 %v1358_v39, %v1358_v39  ;;  %v1438_v36 = vmul.f32 0.03125, %v1392_v35 }
 0x1d0   :  { %v1315_v38 = vpop.xlane.xlu0 %1314 }
 0x1d1   :  { %v1470_v40 = vsub.f32 %v1438_v36, %v1454_v6  ;;  %v1359_v43 = vmul.f32 0.03125, %v1315_v38 }
 0x1d2   :  { %v1395_v47 = vpop.xlane.xlu1 %1394 }
 0x1d3   :  { %v1502_v49 = vadd.f32 1e-05, %v1470_v40  ;;  %v1455_v21 = vmul.f32 %v1359_v43, %v1359_v43  ;;  %v1439_v52 = vmul.f32 0.03125, %v1395_v47 }
 0x1d4   :  { %v1318_v53 = vpop.xlane.xlu0 %1317 }
 0x1d5   :  { %2643 = vrsqrt.f32 %v1502_v49  ;;  %v1471_v54 = vsub.f32 %v1439_v52, %v1455_v21  ;;  %v1360_v24 = vmul.f32 0.03125, %v1318_v53  ;;  %v1486_v21 = vsub.f32 %v3253_v41, %v1358_v39 }
 0x1d6   :  { %v1321_v59 = vpop.xlane.xlu1 %1320 }
 0x1d7   :  { %v1503_v23 = vadd.f32 1e-05, %v1471_v54  ;;  %v3452_v3 = vmul.f32 0.03125, %v1321_v59  ;;  %v1456_v34 = vmul.f32 %v1360_v24, %v1360_v24 }
 0x1d8   :  { %v1398_v32 = vpop.xlane.xlu0 %1397 }
 0x1d9   :  { %2645 = vrsqrt.f32 %v1503_v23  ;;  %v1440_v31 = vmul.f32 0.03125, %v1398_v32  ;;  %v1457_v6 = vmul.f32 %v3452_v3, %v3452_v3 }
 0x1da   :  { %v1401_v35 = vpop.xlane.xlu1 %1400 }
 0x1db   :  { %v1472_v36 = vsub.f32 %v1440_v31, %v1456_v34  ;;  %v1441_v38 = vmul.f32 0.03125, %v1401_v35  ;;  %v1487_v35 = vsub.f32 %v3256_v45, %v1359_v43 }
 0x1dc   :  { %v1324_v40 = vpop.xlane.xlu0 %1323 }
 0x1dd   :  { %v1504_v47 = vadd.f32 1e-05, %v1472_v36  ;;  %v1473_v50 = vsub.f32 %v1441_v38, %v1457_v6  ;;  %v3456_v49 = vmul.f32 0.03125, %v1324_v40 }
 0x1de   :  { %v1327_v52 = vpop.xlane.xlu1 %1326 }
 0x1df   :  { %v2644_v53 = vpop.eup %2643  ;;  %2647 = vrsqrt.f32 %v1504_v47  ;;  %v1505_v54 = vadd.f32 1e-05, %v1473_v50  ;;  %v3459_v23 = vmul.f32 0.03125, %v1327_v52  ;;  %v1458_v31 = vmul.f32 %v3456_v49, %v3456_v49 }
 0x1e0   :  { %v1534_v59 = vmul.f32 %v2644_v53, %v1486_v21  ;;  %v1404_v32 = vpop.xlane.xlu0 %1403 }
 0x1e1   :  { %2649 = vrsqrt.f32 %v1505_v54  ;;  %v1442_v34 = vmul.f32 0.03125, %v1404_v32  ;;  %v1459_v41 = vmul.f32 %v3459_v23, %v3459_v23 }
 0x1e2   :  { %v1407_v6 = vpop.xlane.xlu1 %1406  ;;  %v1646_v36 = vmul.f32 %v3396_v62, %v1534_v59  ;;  %v1822_v62 = vld [vmem:[%s3660_s4] sm:$0xff] }
 0x1e3   :  { %v2646_v38 = vpop.eup %2645  ;;  %v1474_v39 = vsub.f32 %v1442_v34, %v1458_v31  ;;  %v1443_v50 = vmul.f32 0.03125, %v1407_v6  ;;  %v1488_v34 = vsub.f32 %v3268_v2, %v1360_v24 }
 0x1e4   :  { %v1535_v40 = vmul.f32 %v2646_v38, %v1487_v35  ;;  %v1330_v47 = vpop.xlane.xlu0 %1329  ;;  %v1758_v21 = vadd.f32 %v3360_v17, %v1646_v36 }
 0x1e5   :  { %v1506_v52 = vadd.f32 1e-05, %v1474_v39  ;;  %v1475_v53 = vsub.f32 %v1443_v50, %v1459_v41  ;;  %v3468_v54 = vmul.f32 0.03125, %v1330_v47  ;;  %v1489_v39 = vsub.f32 %v3272_v7, %v3452_v3 }
 0x1e6   :  { %v1647_v32 = vmul.f32 %v3336_v42, %v1535_v40  ;;  %v1333_v45 = vpop.xlane.xlu1 %1332  ;;  %vm1774_vm1 = vcmp.gt.f32.partialorder %v1758_v21, 0.0  ;;  %v1790_v43 = vmul.f32 0.2, %v1758_v21 }
 0x1e7   :  { %2651 = vrsqrt.f32 %v1506_v52  ;;  %v1507_v59 = vadd.f32 1e-05, %v1475_v53  ;;  %v3476_v17 = vmul.f32 0.03125, %v1333_v45  ;;  %v1460_v42 = vmul.f32 %v3468_v54, %v3468_v54  ;;  %v1823_v52 = vld [vmem:[%s3660_s4 + $0x8] sm:$0xff] }
 0x1e8   :  { %v1759_v31 = vadd.f32 %v3374_v46, %v1647_v32  ;;  %v1410_v35 = vpop.xlane.xlu0 %1409  ;;  %v1806_v6 = vsel %vm1774_vm1, %v1758_v21, %v1790_v43 }
 0x1e9   :  { %v2648_v36 = vpop.eup %2647  ;;  %2653 = vrsqrt.f32 %v1507_v59  ;;  %v1444_v38 = vmul.f32 0.03125, %v1410_v35  ;;  %v1838_v41 = vmul.f32 %v1822_v62, %v1806_v6  ;;  %v1461_v2 = vmul.f32 %v3476_v17, %v3476_v17 }
 0x1ea   :  { %v1536_v50 = vmul.f32 %v2648_v36, %v1488_v34  ;;  %v1413_v40 = vpop.xlane.xlu1 %1412  ;;  %vm1775_vm2 = vcmp.gt.f32.partialorder %v1759_v31, 0.0  ;;  %v1791_v21 = vmul.f32 0.2, %v1759_v31  ;;  %v1490_v36 = vsub.f32 %v3284_v30, %v3456_v49 }
 0x1eb   :  { %v2650_v46 = vpop.eup %2649  ;;  %v1476_v24 = vsub.f32 %v1444_v38, %v1460_v42  ;;  %v1445_v47 = vmul.f32 0.03125, %v1413_v40  ;;  %2539 = vmatprep.mubr.msk.f32.mxu0 %vm1309_vm0, %v1838_v41  ;;  %v1491_v49 = vsub.f32 %v3288_v33, %v3459_v23  ;;  %v1825_v33 = vld [vmem:[%s3660_s4 + $0x18] sm:$0xff] }
 0x1ec   :  { %v1537_v53 = vmul.f32 %v2650_v46, %v1489_v39  ;;  %v1336_v32 = vpop.xlane.xlu0 %1335  ;;  %v1648_v7 = vmul.f32 %v3400_v63, %v1536_v50  ;;  %v1807_v62 = vsel %vm1775_vm2, %v1759_v31, %v1791_v21  ;;  %v1824_v31 = vld [vmem:[%s3660_s4 + $0x10] sm:$0xff]  ;;  %vm2051_vm2 = vcmask 15360  }
 0x1ed   :  { %v1508_v3 = vadd.f32 1e-05, %v1476_v24  ;;  %v1477_v45 = vsub.f32 %v1445_v47, %v1461_v2  ;;  %v3489_v43 = vmul.f32 0.03125, %v1336_v32  ;;  %v1839_v34 = vmul.f32 %v1823_v52, %v1807_v62 }
 0x1ee   :  { %v1339_v59 = vpop.xlane.xlu1 %1338  ;;  %v1760_v35 = vadd.f32 %v3394_v60, %v1648_v7  ;;  %v1649_v6 = vmul.f32 %v3389_v44, %v1537_v53 }
 0x1ef   :  { %2655 = vrsqrt.f32 %v1508_v3  ;;  %v1509_v42 = vadd.f32 1e-05, %v1477_v45  ;;  %v3495_v38 = vmul.f32 0.03125, %v1339_v59  ;;  %2540 = vmatmul.mubr.msk.f32.vlgmr.msra.gmra.mrb[64].mxu0 %vm1309_vm0, %v1839_v34  ;;  %v1462_v30 = vmul.f32 %v3489_v43, %v3489_v43 }
 0x1f0   :  { %v1416_v63 = vpop.xlane.xlu0 %1415  ;;  %vm1776_vm3 = vcmp.gt.f32.partialorder %v1760_v35, 0.0  ;;  %v1792_v41 = vmul.f32 0.2, %v1760_v35  ;;  %v1761_v60 = vadd.f32 %v3398_v55, %v1649_v6  ;;  %v1492_v6 = vsub.f32 %v3300_v57, %v3468_v54 }
 0x1f1   :  { %v2652_v39 = vpop.eup %2651  ;;  %2657 = vrsqrt.f32 %v1509_v42  ;;  %v1446_v44 = vmul.f32 0.03125, %v1416_v63  ;;  %v1463_v40 = vmul.f32 %v3495_v38, %v3495_v38  ;;  %v1493_v54 = vsub.f32 %v3304_v61, %v3476_v17 }
 0x1f2   :  { %v1538_v50 = vmul.f32 %v2652_v39, %v1490_v36  ;;  %v1419_v46 = vpop.xlane.xlu1 %1418  ;;  %v1808_v2 = vsel %vm1776_vm3, %v1760_v35, %v1792_v41  ;;  %vm1777_vm4 = vcmp.gt.f32.partialorder %v1761_v60, 0.0  ;;  %v1793_v32 = vmul.f32 0.2, %v1761_v60 }
 0x1f3   :  { %v2654_v24 = vpop.eup %2653  ;;  %v1478_v47 = vsub.f32 %v1446_v44, %v1462_v30  ;;  %v1447_v21 = vmul.f32 0.03125, %v1419_v46  ;;  %v1840_v52 = vmul.f32 %v1824_v31, %v1808_v2  ;;  %v1826_v31 = vld [vmem:[%s3660_s4 + $0x20] sm:$0xff] }
 0x1f4   :  { %v1539_v55 = vmul.f32 %v2654_v24, %v1491_v49  ;;  %v1342_v53 = vpop.xlane.xlu0 %1341  ;;  %v1650_v7 = vmul.f32 %v3405_v0, %v1538_v50  ;;  %v1809_v59 = vsel %vm1777_vm4, %v1761_v60, %v1793_v32 }
 0x1f5   :  { %v1510_v3 = vadd.f32 1e-05, %v1478_v47  ;;  %v1479_v45 = vsub.f32 %v1447_v21, %v1463_v40  ;;  %v3509_v62 = vmul.f32 0.03125, %v1342_v53  ;;  %2542 = vmatprep.mubr.msk.f32.mxu0 %vm1309_vm0, %v1840_v52  ;;  %v1841_v42 = vmul.f32 %v1825_v33, %v1809_v59 }
 0x1f6   :  { %v1345_v23 = vpop.xlane.xlu1 %1344  ;;  %v1762_v34 = vadd.f32 %v3412_v4, %v1650_v7  ;;  %v1651_v35 = vmul.f32 %v3407_v1, %v1539_v55  ;;  %v1827_v55 = vld [vmem:[%s3660_s4 + $0x28] sm:$0xff] }
 0x1f7   :  { %2659 = vrsqrt.f32 %v1510_v3  ;;  %v1511_v0 = vadd.f32 1e-05, %v1479_v45  ;;  %v3519_v36 = vmul.f32 0.03125, %v1345_v23  ;;  %v1464_v1 = vmul.f32 %v3509_v62, %v3509_v62  ;;  %2543 = vmatmul.mubr.msk.f32.gmra.mrb[66].mxu0 %vm1309_vm0, %v1841_v42 }
 0x1f8   :  { %v1422_v63 = vpop.xlane.xlu0 %1421  ;;  %vm1778_vm5 = vcmp.gt.f32.partialorder %v1762_v34, 0.0  ;;  %v1794_v41 = vmul.f32 0.2, %v1762_v34  ;;  %v1763_v57 = vadd.f32 %v3414_v10, %v1651_v35  ;;  %v1494_v45 = vsub.f32 %v3316_v18, %v3489_v43  ;;  %v1828_v35 = vld [vmem:[%s3660_s4 + $0x30] sm:$0xff] }
 0x1f9   :  { %v2656_v60 = vpop.eup %2655  ;;  %2661 = vrsqrt.f32 %v1511_v0  ;;  %v1448_v4 = vmul.f32 0.03125, %v1422_v63  ;;  %v1465_v30 = vmul.f32 %v3519_v36, %v3519_v36  ;;  %v1495_v43 = vsub.f32 %v3320_v22, %v3495_v38 }
 0x1fa   :  { %v1540_v39 = vmul.f32 %v2656_v60, %v1492_v6  ;;  %v1425_v44 = vpop.xlane.xlu1 %1424  ;;  %v1810_v49 = vsel %vm1778_vm5, %v1762_v34, %v1794_v41  ;;  %vm1779_vm6 = vcmp.gt.f32.partialorder %v1763_v57, 0.0  ;;  %v1795_v21 = vmul.f32 0.2, %v1763_v57 }
 0x1fb   :  { %v2658_v50 = vpop.eup %2657  ;;  %v1480_v40 = vsub.f32 %v1448_v4, %v1464_v1  ;;  %v1449_v46 = vmul.f32 0.03125, %v1425_v44  ;;  %v1842_v2 = vmul.f32 %v1826_v31, %v1810_v49  ;;  %v1829_v44 = vld [vmem:[%s3660_s4 + $0x38] sm:$0xff] }
 0x1fc   :  { %v1541_v24 = vmul.f32 %v2658_v50, %v1493_v54  ;;  %v1348_v47 = vpop.xlane.xlu0 %1347  ;;  %v1652_v10 = vmul.f32 %v3416_v25, %v1540_v39  ;;  %v1811_v32 = vsel %vm1779_vm6, %v1763_v57, %v1795_v21 }
 0x1fd   :  { %v1512_v52 = vadd.f32 1e-05, %v1480_v40  ;;  %v1481_v61 = vsub.f32 %v1449_v46, %v1465_v30  ;;  %v3533_v17 = vmul.f32 0.03125, %v1348_v47  ;;  %2545 = vmatprep.mubr.msk.f32.mxu0 %vm1309_vm0, %v1842_v2  ;;  %v1843_v23 = vmul.f32 %v1827_v55, %v1811_v32 }
 0x1fe   :  { %v1351_v53 = vpop.xlane.xlu1 %1350  ;;  %v1764_v7 = vadd.f32 %v3420_v11, %v1652_v10  ;;  %v1653_v3 = vmul.f32 %v3418_v56, %v1541_v24  ;;  %v1496_v2 = vsub.f32 %v3332_v48, %v3509_v62  ;;  %v1830_v48 = vld [vmem:[%s3660_s4 + $0x40] sm:$0xff] }
 0x1ff   :  { %2663 = vrsqrt.f32 %v1512_v52  ;;  %v1513_v25 = vadd.f32 1e-05, %v1481_v61  ;;  %v3543_v33 = vmul.f32 0.03125, %v1351_v53  ;;  %v1466_v56 = vmul.f32 %v3533_v17, %v3533_v17  ;;  %2546 = vmatmul.mubr.msk.f32.gmra.mrb[68].mxu0 %vm1309_vm0, %v1843_v23 }
 0x200   :  { %v1428_v59 = vpop.xlane.xlu0 %1427  ;;  %vm1780_vm7 = vcmp.gt.f32.partialorder %v1764_v7, 0.0  ;;  %v1796_v34 = vmul.f32 0.2, %v1764_v7  ;;  %v1765_v18 = vadd.f32 %v3422_v12, %v1653_v3 }
 0x201   :  { %v2660_v6 = vpop.eup %2659  ;;  %2665 = vrsqrt.f32 %v1513_v25  ;;  %v1450_v11 = vmul.f32 0.03125, %v1428_v59  ;;  %v1467_v42 = vmul.f32 %v3543_v33, %v3543_v33 }
 0x202   :  { %v1542_v0 = vmul.f32 %v2660_v6, %v1494_v45  ;;  %v1431_v63 = vpop.xlane.xlu1 %1430  ;;  %v1812_v41 = vsel %vm1780_vm7, %v1764_v7, %v1796_v34  ;;  %vm1781_vm8 = vcmp.gt.f32.partialorder %v1765_v18, 0.0  ;;  %v1797_v39 = vmul.f32 0.2, %v1765_v18  ;;  %v1831_v7 = vld [vmem:[%s3660_s4 + $0x48] sm:$0xff] }
 0x203   :  { %v2662_v31 = vpop.eup %2661  ;;  %v1482_v60 = vsub.f32 %v1450_v11, %v1466_v56  ;;  %v1451_v1 = vmul.f32 0.03125, %v1431_v63  ;;  %v1844_v4 = vmul.f32 %v1828_v35, %v1812_v41 }
 0x204   :  { %v1543_v57 = vmul.f32 %v2662_v31, %v1495_v43  ;;  %v1354_v54 = vpop.xlane.xlu0 %1353  ;;  %v1654_v12 = vmul.f32 %v3424_v13, %v1542_v0  ;;  %v1813_v40 = vsel %vm1781_vm8, %v1765_v18, %v1797_v39  ;;  %v1498_v0 = vsub.f32 %v3356_v15, %v3533_v17  ;;  %v1833_v15 = vld [vmem:[%s3660_s4 + $0x58] sm:$0xff] }
 0x205   :  { %v1514_v30 = vadd.f32 1e-05, %v1482_v60  ;;  %v1483_v22 = vsub.f32 %v1451_v1, %v1467_v42  ;;  %v3557_v38 = vmul.f32 0.03125, %v1354_v54  ;;  %2548 = vmatprep.mubr.msk.f32.mxu0 %vm1309_vm0, %v1844_v4  ;;  %v1845_v10 = vmul.f32 %v1829_v44, %v1813_v40  ;;  %v3668_v40 = vld [vmem:[#allocation6_spill] sm:$0xff] }
 0x206   :  { %v1655_v49 = vmul.f32 %v3426_v14, %v1543_v57  ;;  %v1434_v50 = vpop.xlane.xlu1 %1433  ;;  %v1766_v46 = vadd.f32 %v3428_v16, %v1654_v12  ;;  %v1497_v14 = vsub.f32 %v3338_v51, %v3519_v36 }
 0x207   :  { %2667 = vrsqrt.f32 %v1514_v30  ;;  %v1515_v13 = vadd.f32 1e-05, %v1483_v22  ;;  %v1468_v24 = vmul.f32 %v3557_v38, %v3557_v38  ;;  %v1452_v21 = vmul.f32 0.03125, %v1434_v50  ;;  %2549 = vmatmul.mubr.msk.f32.gmra.mrb[70].mxu0 %vm1309_vm0, %v1845_v10  ;;  %v1834_v22 = vld [vmem:[%s3660_s4 + $0x60] sm:$0xff]  ;;  %v3669_v10 = vld [vmem:[#allocation7_spill] sm:$0xff] }
 0x208   :  { %v1767_v47 = vadd.f32 %v3430_v58, %v1655_v49  ;;  %v1357_v52 = vpop.xlane.xlu0 %1356  ;;  %vm1782_vm9 = vcmp.gt.f32.partialorder %v1766_v46, 0.0  ;;  %v1798_v55 = vmul.f32 0.2, %v1766_v46  ;;  %v3667_v49 = vld [vmem:[#allocation5_spill] sm:$0xff] }
 0x209   :  { %v2664_v61 = vpop.eup %2663  ;;  %2669 = vrsqrt.f32 %v1515_v13  ;;  %v3572_v16 = vmul.f32 0.03125, %v1357_v52  ;;  %v1484_v53 = vsub.f32 %v1452_v21, %v1468_v24 }
 0x20a   :  { %v1544_v62 = vmul.f32 %v2664_v61, %v1496_v2  ;;  %v1437_v58 = vpop.xlane.xlu1 %1436  ;;  %vm1783_vm10 = vcmp.gt.f32.partialorder %v1767_v47, 0.0  ;;  %v1799_v32 = vmul.f32 0.2, %v1767_v47  ;;  %v1814_v45 = vsel %vm1782_vm9, %v1766_v46, %v1798_v55 }
 0x20b   :  { %v2666_v51 = vpop.eup %2665  ;;  %v1469_v36 = vmul.f32 %v3572_v16, %v3572_v16  ;;  %v1453_v3 = vmul.f32 0.03125, %v1437_v58  ;;  %v1516_v23 = vadd.f32 1e-05, %v1484_v53  ;;  %v1846_v59 = vmul.f32 %v1830_v48, %v1814_v45 }
 0x20c   :  { %v1545_v25 = vmul.f32 %v2666_v51, %v1497_v14  ;;  %v1815_v34 = vsel %vm1783_vm10, %v1767_v47, %v1799_v32  ;;  %v1656_v56 = vmul.f32 %v3432_v19, %v1544_v62  ;;  %v1832_v19 = vld [vmem:[%s3660_s4 + $0x50] sm:$0xff]  ;;  %v1837_v62 = vld [vmem:[%s3660_s4 + $0x78] sm:$0xff] }
 0x20d   :  { %v1485_v35 = vsub.f32 %v1453_v3, %v1469_v36  ;;  %v1847_v6 = vmul.f32 %v1831_v7, %v1815_v34  ;;  %2671 = vrsqrt.f32 %v1516_v23  ;;  %2551 = vmatprep.mubr.msk.f32.mxu1 %vm1309_vm0, %v1846_v59  ;;  %v1836_v14 = vld [vmem:[%s3660_s4 + $0x70] sm:$0xff] }
 0x20e   :  { %v1657_v11 = vmul.f32 %v3434_v20, %v1545_v25  ;;  %v1768_v43 = vadd.f32 %v3436_v26, %v1656_v56  ;;  %v1499_v20 = vsub.f32 %v3362_v5, %v3543_v33  ;;  %v1500_v33 = vsub.f32 %v3376_v8, %v3557_v38  ;;  %v1835_v8 = vld [vmem:[%s3660_s4 + $0x68] sm:$0xff]  ;;  %v1756_v61 = vpop.permute.xlu1 %1755  ;;  %s2704_s4 = smov [#allocation2]  }
 0x20f   :  { %v1517_v18 = vadd.f32 1e-05, %v1485_v35  ;;  %2552 = vmatmul.mubr.msk.f32.vlgmr.msra.gmra.mrb[64].mxu1 %vm1309_vm0, %v1847_v6  ;;  %s2103_s30 = sshll.u32 %s2704_s4, 4  ;;  %s2104_s30 = int_to_ptr.vmem [resolvable:$true] %s2103_s30 }
 0x210   :  { %v1769_v42 = vadd.f32 %v3438_v27, %v1657_v11  ;;  %vm1784_vm11 = vcmp.gt.f32.partialorder %v1768_v43, 0.0  ;;  %v1800_v41 = vmul.f32 0.2, %v1768_v43  ;;  %v1751_v24 = vpop.permute.xlu0 %1750  ;;  %s2679_s7 = scalar_lea.vmem %s2104_s30, 16  ;;  %s2683_s8 = scalar_lea.vmem %s2104_s30, 32 }
 0x211   :  { %v2668_v63 = vpop.eup %2667  ;;  %2673 = vrsqrt.f32 %v1517_v18  ;;  %p2680_p0 = scmp.ne.s32.totalorder %s2104_s30, %s2679_s7  ;;  %p2684_p1 = scmp.lt.s32.totalorder %s2104_s30, %s2104_s30 }
 0x212   :  { %v1546_v31 = vmul.f32 %v2668_v63, %v1498_v0  ;;  %vm1785_vm12 = vcmp.gt.f32.partialorder %v1769_v42, 0.0  ;;  %v1801_v60 = vmul.f32 0.2, %v1769_v42  ;;  %v1816_v27 = vsel %vm1784_vm11, %v1768_v43, %v1800_v41  ;;  %p2685_p2 = scmp.lt.s32.totalorder %s2683_s8, %s2679_s7 }
 0x213   :  { %v2670_v26 = vpop.eup %2669  ;;  %v1848_v1 = vmul.f32 %v1832_v19, %v1816_v27 }
 0x214   :  { %v1547_v17 = vmul.f32 %v2670_v26, %v1499_v20  ;;  %v1817_v4 = vsel %vm1785_vm12, %v1769_v42, %v1801_v60  ;;  %v1658_v57 = vmul.f32 %v3440_v9, %v1546_v31  ;;  %p2686_p3 = por %p2685_p2, %p2684_p1 }
 0x215   :  { %v1849_v54 = vmul.f32 %v1833_v15, %v1817_v4  ;;  %2554 = vmatprep.mubr.msk.f32.mxu1 %vm1309_vm0, %v1848_v1 }
 0x216   :  { %v1770_v39 = vadd.f32 %v3444_v28, %v1658_v57  ;;  %v1659_v5 = vmul.f32 %v3442_v37, %v1547_v17  ;;  %v1501_v28 = vsub.f32 %v3667_v49, %v3572_v16  ;;  %p2687_p4 = pnand %p2686_p3, %p2680_p0 }
 0x217   :  { %2555 = vmatmul.mubr.msk.f32.gmra.mrb[66].mxu1 %vm1309_vm0, %v1849_v54  ;;  %v2672_v12 = vpop.eup %2671 }
 0x218   :  { %vm1786_vm13 = vcmp.gt.f32.partialorder %v1770_v39, 0.0  ;;  %v1802_v30 = vmul.f32 0.2, %v1770_v39  ;;  %v1771_v9 = vadd.f32 %v3446_v29, %v1659_v5  ;;  %v1548_v44 = vmul.f32 %v2672_v12, %v1500_v33 }
 0x21a   :  { %v1818_v50 = vsel %vm1786_vm13, %v1770_v39, %v1802_v30  ;;  %vm1787_vm14 = vcmp.gt.f32.partialorder %v1771_v9, 0.0  ;;  %v1803_v37 = vmul.f32 0.2, %v1771_v9  ;;  %v1660_v46 = vmul.f32 %v3668_v40, %v1548_v44 }
 0x21b   :  { %v2674_v38 = vpop.eup %2673  ;;  %v1850_v2 = vmul.f32 %v1834_v22, %v1818_v50 }
 0x21c   :  { %v1549_v13 = vmul.f32 %v2674_v38, %v1501_v28  ;;  %v1819_v47 = vsel %vm1787_vm14, %v1771_v9, %v1803_v37  ;;  %v1772_v21 = vadd.f32 %v1751_v24, %v1660_v46 }
 0x21d   :  { %2557 = vmatprep.mubr.msk.f32.mxu1 %vm1309_vm0, %v1850_v2  ;;  %v1851_v29 = vmul.f32 %v1835_v8, %v1819_v47 }
 0x21e   :  { %v1661_v52 = vmul.f32 %v3669_v10, %v1549_v13  ;;  %vm1788_vm15 = vcmp.gt.f32.partialorder %v1772_v21, 0.0  ;;  %v1804_v16 = vmul.f32 0.2, %v1772_v21 }
 0x21f   :  { %2558 = vmatmul.mubr.msk.f32.gmra.mrb[68].mxu1 %vm1309_vm0, %v1851_v29 }
 0x220   :  { %v1773_v55 = vadd.f32 %v1756_v61, %v1661_v52  ;;  %v1820_v48 = vsel %vm1788_vm15, %v1772_v21, %v1804_v16 }
 0x221   :  { %v1852_v58 = vmul.f32 %v1836_v14, %v1820_v48 }
 0x222   :  { %vm1789_vm1 = vcmp.gt.f32.partialorder %v1773_v55, 0.0  ;;  %v1805_v53 = vmul.f32 0.2, %v1773_v55 }
 0x223   :  { %2560 = vmatprep.mubr.msk.f32.mxu1 %vm1309_vm0, %v1852_v58 }
 0x224   :  { %v1821_v32 = vsel %vm1789_vm1, %v1773_v55, %v1805_v53 }
 0x225   :  { %v1853_v7 = vmul.f32 %v1837_v62, %v1821_v32 }
 0x227   :  { %2561 = vmatmul.mubr.msk.f32.gmra.mrb[70].mxu1 %vm1309_vm0, %v1853_v7  ;;  %vm2095_vm0 = vcmask 8192  }
 0x2c2   :  { %v2541_v51 = vpop.f32.mrb[64].mxu0 }
 0x2c3   :  { %v2053_v36 = vsel %vm2051_vm2, %v2541_v51, 0.0  ;;  %v1972_v3 = vpop.f32.mrb[65].mxu0 }
 0x2c4   :  { %v2052_v45 = vsel %vm2051_vm2, %v1972_v3, 0.0 }
 0x2c5   :  { %v2054_v25 = vadd.f32 %v2053_v36, %v2052_v45 }
 0x2ca   :  { %v2544_v23 = vpop.f32.mrb[66].mxu0 }
 0x2cb   :  { %v1982_v59 = vpop.f32.mrb[67].mxu0  ;;  %v2057_v6 = vsel %vm2051_vm2, %v2544_v23, 0.0 }
 0x2cc   :  { %v2055_v34 = vsel %vm2051_vm2, %v1982_v59, 0.0 }
 0x2cd   :  { %v2056_v35 = vadd.f32 %v2055_v34, %v2054_v25 }
 0x2cf   :  { %v2058_v56 = vadd.f32 %v2057_v6, %v2056_v35 }
 0x2d2   :  { %v2547_v11 = vpop.f32.mrb[68].mxu0 }
 0x2d3   :  { %v1992_v18 = vpop.f32.mrb[69].mxu0  ;;  %v2061_v42 = vsel %vm2051_vm2, %v2547_v11, 0.0 }
 0x2d4   :  { %v2059_v43 = vsel %vm2051_vm2, %v1992_v18, 0.0 }
 0x2d5   :  { %v2060_v0 = vadd.f32 %v2059_v43, %v2058_v56 }
 0x2d7   :  { %v2062_v63 = vadd.f32 %v2061_v42, %v2060_v0 }
 0x2da   :  { %v2550_v41 = vpop.f32.mrb[70].mxu0 }
 0x2db   :  { %v2002_v19 = vpop.f32.mrb[71].mxu0  ;;  %v2065_v60 = vsel %vm2051_vm2, %v2550_v41, 0.0 }
 0x2dc   :  { %v2063_v20 = vsel %vm2051_vm2, %v2002_v19, 0.0 }
 0x2dd   :  { %v2064_v31 = vadd.f32 %v2063_v20, %v2062_v63 }
 0x2df   :  { %v2066_v26 = vadd.f32 %v2065_v60, %v2064_v31 }
 0x2e2   :  { %v2553_v15 = vpop.f32.mrb[64].mxu1 }
 0x2e3   :  { %v2012_v27 = vpop.f32.mrb[65].mxu1  ;;  %v2069_v4 = vsel %vm2051_vm2, %v2553_v15, 0.0 }
 0x2e4   :  { %v2067_v17 = vsel %vm2051_vm2, %v2012_v27, 0.0 }
 0x2e5   :  { %v2068_v1 = vadd.f32 %v2067_v17, %v2066_v26 }
 0x2e7   :  { %v2070_v57 = vadd.f32 %v2069_v4, %v2068_v1 }
 0x2ea   :  { %v2556_v54 = vpop.f32.mrb[66].mxu1 }
 0x2eb   :  { %v2022_v39 = vpop.f32.mrb[67].mxu1  ;;  %v2073_v12 = vsel %vm2051_vm2, %v2556_v54, 0.0 }
 0x2ec   :  { %v2071_v5 = vsel %vm2051_vm2, %v2022_v39, 0.0 }
 0x2ed   :  { %v2072_v33 = vadd.f32 %v2071_v5, %v2070_v57 }
 0x2ef   :  { %v2074_v30 = vadd.f32 %v2073_v12, %v2072_v33 }
 0x2f2   :  { %v2559_v22 = vpop.f32.mrb[68].mxu1 }
 0x2f3   :  { %v2032_v9 = vpop.f32.mrb[69].mxu1  ;;  %v2077_v28 = vsel %vm2051_vm2, %v2559_v22, 0.0 }
 0x2f4   :  { %v2075_v44 = vsel %vm2051_vm2, %v2032_v9, 0.0 }
 0x2f5   :  { %v2076_v49 = vadd.f32 %v2075_v44, %v2074_v30 }
 0x2f7   :  { %v2078_v50 = vadd.f32 %v2077_v28, %v2076_v49 }
 0x2fa   :  { %v2562_v37 = vpop.f32.mrb[70].mxu1 }
 0x2fb   :  { %v2042_v8 = vpop.f32.mrb[71].mxu1  ;;  %v2081_v46 = vsel %vm2051_vm2, %v2562_v37, 0.0 }
 0x2fc   :  { %v2079_v38 = vsel %vm2051_vm2, %v2042_v8, 0.0 }
 0x2fd   :  { %v2080_v40 = vadd.f32 %v2079_v38, %v2078_v50 }
 0x2ff   :  { %v2082_v2 = vadd.f32 %v2081_v46, %v2080_v40 }
 0x301   :  { %v2083_v13 = vrot.slane %v2082_v2, 4 }
 0x303   :  { %v2084_v24 = vadd.f32 %v2083_v13, %v2082_v2 }
 0x305   :  { %v2085_v47 = vrot.slane %v2084_v24, 2 }
 0x307   :  { %v2086_v21 = vadd.f32 %v2085_v47, %v2084_v24 }
 0x309   :  { %v2087_v29 = vrot.slane %v2086_v21, 1 }
 0x30b   :  { %v2088_v10 = vadd.f32 %v2087_v29, %v2086_v21 }
 0x30d   :  { %v2089_v52 = vsub.f32 0.0, %v2088_v10 }
 0x30f   :  { %v2090_v61 = vmul.f32 1.442695, %v2089_v52 }
 0x311   :  { %2675 = vpow2.f32 %v2090_v61 }
 0x31b   :  { %v2676_v14 = vpop.eup %2675 }
 0x31c   :  { %v2092_v16 = vadd.f32 1.0, %v2676_v14 }
 0x31e   :  { %2677 = vrcp.f32 %v2092_v16 }
 0x328   :  { %v2678_v55 = vpop.eup %2677 }
 0x329   :  { %2096 = vst.msk [vmem:[#allocation2] sm:$0x1] %vm2095_vm0, %v2678_v55 }
 0x32a   :  { %2690 = shalt.err (!%p2687_p4)
}
 0x32b   :  { %s2691_s11 = scalar_lea.hbm %s3662_s6, 16 }
 0x32c   :  { %p2692_p5 = scmp.ne.s32.totalorder %s3662_s6, %s2691_s11  ;;  %p2695_p6 = scmp.lt.u32.totalorder %s2691_s11, %s3662_s6 }
 0x32e   :  { %p2697_p7 = pnand %p2695_p6, %p2692_p5 }
 0x330   :  { %2700 = shalt.err (!%p2697_p7)
}
 0x331   :  { %2106 = dma.vmem_to_hbm [thread:$0]  %s2104_s30, 16, %s3662_s6, [#allocation3]  }
 0x332   :  { %2701 = dma.done.wait [#allocation3], 16  }
 0x333   :  { %2702 = vsyncadd [#allocation3], 4294967280 }
 0x334   :  { %2110 = vsyncpa [#allocation3], 1 }

</bundles_post_ra>
